<compile_context>
chip_gen: v5e
topology: v5e:2x2
jax: 0.10.0
libtpu: 0.0.40
codegen_flags: <defaults>
</compile_context>

<pallas_src>
import functools

import jax
import jax.numpy as jnp
import numpy as np
from jax.experimental import pallas as pl
from jax.experimental.pallas import tpu as pltpu

EPS = 1e-5
# Activation storage dtype for the intermediate / output feature groups.
# jnp.bfloat16 halves HBM traffic (the kernels are memory-bound) but drifts
# from exact PyTorch float32 numerics; kept float32 here.
ACT_DTYPE = jnp.float32


def _vmem_limit_bytes():
    """Generation-aware VMEM limit (leave headroom; v7x has 64 MiB physical)."""
    cap = 128 << 20
    try:
        info_fn = getattr(pltpu, "get_tpu_info", None)
        if info_fn is not None:
            cap = int(getattr(info_fn(), "vmem_capacity_bytes", cap))
    except Exception:
        cap = 128 << 20
    if cap <= (64 << 20):
        return 48 << 20        # v7x-class parts
    return 100 << 20           # v5e / v6e (128 MiB physical)


def _pick_m_tile(m, cin, c4, vmem_limit):
    """Lane-axis tile of the flattened batch*spatial dim (multiple of 128)."""
    budget = vmem_limit // 3                 # headroom for outputs + slack
    best_fallback = None
    for t in (1024, 512, 256, 128):          # 1024 when VMEM allows (v5e/v6e)
        if m % t != 0:
            continue
        if best_fallback is None:
            best_fallback = t
        if 2 * (cin + c4) * t * 4 > budget:  # double-buffered f32 in/out tiles
            continue
        if m // t >= 2 or t == 128:
            return t
    if best_fallback is not None:
        return best_fallback
    # TODO(synk): non-multiple-of-128 M falls back to one untiled block
    # (correct but unpipelined).
    return m


# ---------------------------------------------------------------------------
# Stage 1: BN1(folded affine) -> ReLU -> 1x1 conv, tiled over M (lane axis).
# The feature map arrives as separate channel groups (no HBM concat); the
# contraction is accumulated per group on the MXU with f32 accumulation.
# Also emits per-tile per-channel sum / sum-of-squares for BN2 statistics.
# ---------------------------------------------------------------------------
def _make_stage1_kernel(n_groups):
    def kernel(*refs):
        xs = refs[0:n_groups]
        ss = refs[n_groups:2 * n_groups]
        ts = refs[2 * n_groups:3 * n_groups]
        ws = refs[3 * n_groups:4 * n_groups]
        y_ref, ps_ref, pq_ref = refs[4 * n_groups:]
        acc = None
        for g in range(n_groups):
            # folded BN1 + ReLU: one fma per element (rsqrt folded in wrapper)
            a = jnp.maximum(xs[g][...] * ss[g][...] + ts[g][...], 0.0)
            part = jnp.dot(ws[g][...], a.astype(jnp.float32),
                           preferred_element_type=jnp.float32)     # (C4, TM)
            acc = part if acc is None else acc + part
        y_ref[...] = acc.astype(y_ref.dtype)
        # lane-dense per-tile partial sums -> BN2 statistics stay global
        ps_ref[...] = jnp.sum(acc, axis=1)[None, None, :]           # (1,1,C4)
        pq_ref[...] = jnp.sum(acc * acc, axis=1)[None, None, :]
    return kernel


def _stage1_call(groups, s_list, t_list, w_list, tm, vmem_limit):
    m = groups[0].shape[1]
    c4 = w_list[0].shape[0]
    g = m // tm
    n_groups = len(groups)
    in_specs = (
        [pl.BlockSpec((x.shape[0], tm), lambda i: (0, i)) for x in groups]
        + [pl.BlockSpec((s.shape[0], 1), lambda i: (0, 0)) for s in s_list]
        + [pl.BlockSpec((t.shape[0], 1), lambda i: (0, 0)) for t in t_list]
        + [pl.BlockSpec((c4, wg.shape[1]), lambda i: (0, 0)) for wg in w_list])
    out_specs = [pl.BlockSpec((c4, tm), lambda i: (0, i)),
                 pl.BlockSpec((1, 1, c4), lambda i: (i, 0, 0)),
                 pl.BlockSpec((1, 1, c4), lambda i: (i, 0, 0))]
    return pl.pallas_call(
        _make_stage1_kernel(n_groups),
        out_shape=(jax.ShapeDtypeStruct((c4, m), ACT_DTYPE),
                   jax.ShapeDtypeStruct((g, 1, c4), jnp.float32),
                   jax.ShapeDtypeStruct((g, 1, c4), jnp.float32)),
        grid=(g,),
        in_specs=in_specs,
        out_specs=out_specs,
        compiler_params=pltpu.CompilerParams(
            dimension_semantics=("parallel",),
            vmem_limit_bytes=vmem_limit),
    )(*groups, *s_list, *t_list, *w_list)


# ---------------------------------------------------------------------------
# Stage 2: BN2(folded affine) -> ReLU -> 3x3 conv (pad=1), channels-major.
#   y:    (C4, M)  per-image block (C4, H*W), lane-dense
#   s2/t2:(C4, 1)  folded BN2 scale/shift (global stats)
#   w2t:  (9, K, C4)  per-tap weights
#   out:  (K, M)   per-image block (K, H*W), written directly in CM layout
#   ps/pq:(N, 1, K) per-image per-channel sums (next layer's BN1 stats cache)
# The 3x3 conv is 9 accumulating (K,C4)x(C4,HW) dots over lane-shifted slices
# of a flat-padded VMEM scratch; row halo = flat zero pad, column wrap = two
# cheap (1,HW) masks on the K-wide product.
# ---------------------------------------------------------------------------
def _make_stage2_kernel(h, w, k, c4):
    hw = h * w
    pad = w + 1
    hwp = hw + 2 * pad
    taps = [(a - 1, b - 1) for a in range(3) for b in range(3)]  # t = 3a+b

    def kernel(y_ref, s2_ref, t2_ref, w2_ref, o_ref, ps_ref, pq_ref, zpad_ref):
        # folded BN2 affine + ReLU (one fma), f32
        z = jnp.maximum(y_ref[...].astype(jnp.float32) * s2_ref[...]
                        + t2_ref[...], 0.0)                        # (C4, HW)
        zero_strip = jnp.zeros((c4, pad), jnp.float32)
        zpad_ref[:, 0:pad] = zero_strip
        zpad_ref[:, pad + hw:hwp] = zero_strip
        zpad_ref[:, pad:pad + hw] = z
        col = jax.lax.broadcasted_iota(jnp.int32, (1, hw), 1) % w  # column idx
        acc = jnp.zeros((k, hw), jnp.float32)
        for t, (dy, dx) in enumerate(taps):
            off = pad + dy * w + dx
            tap = zpad_ref[:, off:off + hw]                        # (C4, HW)
            p = jnp.dot(w2_ref[t], tap,
                        preferred_element_type=jnp.float32)        # (K, HW)
            if dx == -1:
                p = jnp.where(col >= 1, p, 0.0)
            elif dx == 1:
                p = jnp.where(col <= w - 2, p, 0.0)
            acc = acc + p
        o_ref[...] = acc.astype(o_ref.dtype)
        ps_ref[...] = jnp.sum(acc, axis=1)[None, None, :]          # (1,1,K)
        pq_ref[...] = jnp.sum(acc * acc, axis=1)[None, None, :]

    return kernel


def _stage2_call(y, s2, t2, w2t, n, h, w, vmem_limit):
    c4, m = y.shape
    k = w2t.shape[1]
    hw = h * w
    hwp = hw + 2 * (w + 1)
    return pl.pallas_call(
        _make_stage2_kernel(h, w, k, c4),
        out_shape=(jax.ShapeDtypeStruct((k, m), ACT_DTYPE),
                   jax.ShapeDtypeStruct((n, 1, k), jnp.float32),
                   jax.ShapeDtypeStruct((n, 1, k), jnp.float32)),
        grid=(n,),
        in_specs=[pl.BlockSpec((c4, hw), lambda i: (0, i)),
                  pl.BlockSpec((c4, 1), lambda i: (0, 0)),
                  pl.BlockSpec((c4, 1), lambda i: (0, 0)),
                  pl.BlockSpec((9, k, c4), lambda i: (0, 0, 0))],
        out_specs=[pl.BlockSpec((k, hw), lambda i: (0, i)),
                   pl.BlockSpec((1, 1, k), lambda i: (i, 0, 0)),
                   pl.BlockSpec((1, 1, k), lambda i: (i, 0, 0))],
        scratch_shapes=[pltpu.VMEM((c4, hwp), jnp.float32)],
        compiler_params=pltpu.CompilerParams(
            dimension_semantics=("parallel",),
            vmem_limit_bytes=vmem_limit),
    )(y, s2, t2, w2t)


# ---------------------------------------------------------------------------
# Bottleneck layer: conv1x1(BN,ReLU) -> conv3x3(BN,ReLU, padding=1)
# feats: list of (Cg, M) channel groups; feat_stats: cached (sum, sumsq) per
# group, so BN1 statistics never re-read old groups from HBM.
# ---------------------------------------------------------------------------
def _bottleneck(feats, feat_stats, n, h, w, p, vmem_limit):
    m = feats[0].shape[1]
    cgs = [f.shape[0] for f in feats]
    cin = sum(cgs)
    c4 = p["w1"].shape[1]

    # ---- BN1 (global batch stats) folded to per-channel scale/shift ----
    mu1 = jnp.concatenate([s for s, _ in feat_stats]) / m
    ex2 = jnp.concatenate([q for _, q in feat_stats]) / m
    var1 = jnp.maximum(ex2 - mu1 * mu1, 0.0)
    s1 = p["gamma1"] * jax.lax.rsqrt(var1 + EPS)
    t1 = p["beta1"] - mu1 * s1

    offs = np.cumsum([0] + cgs)
    n_g = len(feats)
    s_list = [s1[offs[i]:offs[i + 1]][:, None] for i in range(n_g)]
    t_list = [t1[offs[i]:offs[i + 1]][:, None] for i in range(n_g)]
    w_list = [p["w1"][offs[i]:offs[i + 1], :].T for i in range(n_g)]   # (C4,Cg)

    tm = _pick_m_tile(m, cin, c4, vmem_limit)
    y, ps1, pq1 = _stage1_call(feats, s_list, t_list, w_list, tm, vmem_limit)

    # ---- BN2 statistics from stage-1 per-tile partial sums (still global) ----
    tot = jnp.sum(ps1, axis=(0, 1))
    totsq = jnp.sum(pq1, axis=(0, 1))
    mu2 = tot / m
    var2 = jnp.maximum(totsq / m - mu2 * mu2, 0.0)
    s2 = p["gamma2"] * jax.lax.rsqrt(var2 + EPS)
    t2 = p["beta2"] - mu2 * s2

    # ---- stage 2: BN2(affine)+ReLU+3x3 conv fused, CM in / CM out ----
    w2t = jnp.transpose(p["w2"], (0, 2, 1))                  # (9, K, C4)
    out, ps2, pq2 = _stage2_call(y, s2[:, None], t2[:, None], w2t,
                                 n, h, w, vmem_limit)
    out_stats = (jnp.sum(ps2, axis=(0, 1)), jnp.sum(pq2, axis=(0, 1)))
    return out, out_stats


def dense_block_forward(x_nchw, params):
    """x_nchw: (N, k0, H, W) float32 -> (N, k0 + k*n_layers, H, W)."""
    n, c0, h, w = x_nchw.shape
    m = n * h * w
    vmem_limit = _vmem_limit_bytes()
    # one-time layout change to channels-major (C, M=N*H*W): lane-dense tiles
    x_cm = jnp.transpose(x_nchw.astype(jnp.float32), (1, 0, 2, 3)).reshape(c0, m)
    feats = [x_cm]
    # per-group per-channel (sum, sum-of-squares) cache for BN1 statistics:
    # the input is read once here, every later group's sums come out of stage 2.
    stats = [(jnp.sum(x_cm, axis=1), jnp.sum(x_cm * x_cm, axis=1))]
    for p in params:
        out, st = _bottleneck(feats, stats, n, h, w, p, vmem_limit)
        feats.append(out)
        stats.append(st)
    # single final channel concat (the module's return torch.cat(inputs, 1));
    # the old per-layer O(L^2) concat is gone (stage 1 reads groups directly).
    out_cm = jnp.concatenate([f.astype(jnp.float32) for f in feats], axis=0)
    return jnp.transpose(out_cm.reshape(-1, n, h, w), (1, 0, 2, 3))   # NCHW


# ---------------------------------------------------------------------------
# Deterministic parameter init (shapes implied by the PyTorch module)
# ---------------------------------------------------------------------------
def init_params(key, k0, k, n_layers):
    params = []
    for layer in range(1, n_layers + 1):
        cin = k0 + k * (layer - 1)
        c4 = 4 * k
        kk = jax.random.fold_in(key, layer)
        k1, k2, k3, k4, k5, k6 = jax.random.split(kk, 6)
        params.append(dict(
            gamma1=jax.random.uniform(k1, (cin,), jnp.float32, 0.5, 1.5),
            beta1=0.1 * jax.random.normal(k2, (cin,), jnp.float32),
            w1=0.1 * jax.random.normal(k3, (cin, c4), jnp.float32),    # 1x1 conv
            gamma2=jax.random.uniform(k4, (c4,), jnp.float32, 0.5, 1.5),
            beta2=0.1 * jax.random.normal(k5, (c4,), jnp.float32),
            w2=0.1 * jax.random.normal(k6, (9, c4, k), jnp.float32),   # tap=3a+b
        ))
    return params


# ---------------------------------------------------------------------------
# Pure-JAX reference (NCHW, float32 end-to-end -- no bf16 dots anywhere)
# ---------------------------------------------------------------------------
def _ref_forward(x, params):
    feats = [x.astype(jnp.float32)]
    n_b, _, hh, ww = x.shape
    for p in params:
        inp = jnp.concatenate(feats, axis=1)
        mu = inp.mean(axis=(0, 2, 3), keepdims=True)
        var = ((inp - mu) ** 2).mean(axis=(0, 2, 3), keepdims=True)
        a = jnp.maximum((inp - mu) * jax.lax.rsqrt(var + EPS)
                        * p["gamma1"][None, :, None, None]
                        + p["beta1"][None, :, None, None], 0.0)
        y = jnp.einsum("nchw,ck->nkhw", a, p["w1"],
                       precision=jax.lax.Precision.HIGHEST,
                       preferred_element_type=jnp.float32)
        mu2 = y.mean(axis=(0, 2, 3), keepdims=True)
        var2 = ((y - mu2) ** 2).mean(axis=(0, 2, 3), keepdims=True)
        z = jnp.maximum((y - mu2) * jax.lax.rsqrt(var2 + EPS)
                        * p["gamma2"][None, :, None, None]
                        + p["beta2"][None, :, None, None], 0.0)
        zp = jnp.pad(z, ((0, 0), (0, 0), (1, 1), (1, 1)))
        out = jnp.zeros((n_b, p["w2"].shape[2], hh, ww), jnp.float32)
        for a_ in range(3):
            for b_ in range(3):
                out = out + jnp.einsum("nchw,ck->nkhw",
                                       zp[:, :, a_:a_ + hh, b_:b_ + ww],
                                       p["w2"][3 * a_ + b_],
                                       precision=jax.lax.Precision.HIGHEST,
                                       preferred_element_type=jnp.float32)
        feats.append(out)
    return jnp.concatenate(feats, axis=1)


if __name__ == "__main__":
    k0, k, n_layers = 4, 4, 3
    N, H, W = 2, 16, 16

    key = jax.random.PRNGKey(0)
    xkey, pkey = jax.random.split(key)
    x = jax.random.normal(xkey, (N, k0, H, W), jnp.float32)
    params = init_params(pkey, k0, k, n_layers)

    fwd = jax.jit(functools.partial(dense_block_forward, params=params))
    out = jax.block_until_ready(fwd(x))

    assert out.shape == (N, k0 + k * n_layers, H, W), out.shape

    ref = jax.block_until_ready(_ref_forward(x, params))
    np.testing.assert_allclose(np.asarray(out), np.asarray(ref),
                               rtol=2e-3, atol=2e-3)

    print("KERNEL_OK")
</pallas_src>

<mosaic_0001>
module attributes {stable_mosaic.version = 11 : i64} {
  func.func @kernel(%arg0: i32, %arg1: memref<4x256xf32, #tpu.memory_space<vmem>>, %arg2: memref<4x256xf32, #tpu.memory_space<vmem>>, %arg3: memref<4x1xf32, #tpu.memory_space<vmem>>, %arg4: memref<4x1xf32, #tpu.memory_space<vmem>>, %arg5: memref<4x1xf32, #tpu.memory_space<vmem>>, %arg6: memref<4x1xf32, #tpu.memory_space<vmem>>, %arg7: memref<16x4xf32, #tpu.memory_space<vmem>>, %arg8: memref<16x4xf32, #tpu.memory_space<vmem>>, %arg9: memref<16x256xf32, #tpu.memory_space<vmem>>, %arg10: memref<1x1x16xf32, #tpu.memory_space<vmem>>, %arg11: memref<1x1x16xf32, #tpu.memory_space<vmem>>) attributes {dimension_semantics = [#tpu.dimension_semantics<parallel>], iteration_bounds = array<i64: 2>, scalar_prefetch = 0 : i64, scratch_operands = 0 : i64, tpu.core_type = #tpu.core_type<tc>, window_params = [{transform_indices = @transform_0, window_bounds = array<i64: 4, 256>}, {transform_indices = @transform_1, window_bounds = array<i64: 4, 256>}, {pipeline_mode = #tpu.pipeline_mode<synchronous>, transform_indices = @transform_2, window_bounds = array<i64: 4, 1>}, {pipeline_mode = #tpu.pipeline_mode<synchronous>, transform_indices = @transform_3, window_bounds = array<i64: 4, 1>}, {pipeline_mode = #tpu.pipeline_mode<synchronous>, transform_indices = @transform_4, window_bounds = array<i64: 4, 1>}, {pipeline_mode = #tpu.pipeline_mode<synchronous>, transform_indices = @transform_5, window_bounds = array<i64: 4, 1>}, {pipeline_mode = #tpu.pipeline_mode<synchronous>, transform_indices = @transform_6, window_bounds = array<i64: 16, 4>}, {pipeline_mode = #tpu.pipeline_mode<synchronous>, transform_indices = @transform_7, window_bounds = array<i64: 16, 4>}, {transform_indices = @transform_8, window_bounds = array<i64: 16, 256>}, {transform_indices = @transform_9, window_bounds = array<i64: 1, 1, 16>}, {transform_indices = @transform_10, window_bounds = array<i64: 1, 1, 16>}]} {
    %c0 = arith.constant 0 : index
    %c0_0 = arith.constant 0 : index
    %0 = vector.load %arg1[%c0, %c0_0] : memref<4x256xf32, #tpu.memory_space<vmem>>, vector<4x256xf32>
    %c0_1 = arith.constant 0 : index
    %c0_2 = arith.constant 0 : index
    %1 = vector.load %arg3[%c0_1, %c0_2] : memref<4x1xf32, #tpu.memory_space<vmem>>, vector<4x1xf32>
    %2 = vector.broadcast %1 : vector<4x1xf32> to vector<4x256xf32>
    %3 = arith.mulf %0, %2 : vector<4x256xf32>
    %c0_3 = arith.constant 0 : index
    %c0_4 = arith.constant 0 : index
    %4 = vector.load %arg5[%c0_3, %c0_4] : memref<4x1xf32, #tpu.memory_space<vmem>>, vector<4x1xf32>
    %5 = vector.broadcast %4 : vector<4x1xf32> to vector<4x256xf32>
    %6 = arith.addf %3, %5 : vector<4x256xf32>
    %cst = arith.constant 0.000000e+00 : f32
    %7 = vector.broadcast %cst : f32 to vector<4x256xf32>
    %8 = arith.maximumf %6, %7 : vector<4x256xf32>
    %c0_5 = arith.constant 0 : index
    %c0_6 = arith.constant 0 : index
    %9 = vector.load %arg7[%c0_5, %c0_6] : memref<16x4xf32, #tpu.memory_space<vmem>>, vector<16x4xf32>
    %cst_7 = arith.constant dense<0.000000e+00> : vector<16x256xf32>
    %10 = tpu.matmul %9, %8, %cst_7 {dimension_numbers = #tpu.dot_dimension_numbers<[1], [0], [0], [1], [0, 0, 1, 1], [], []>} : vector<16x4xf32>, vector<4x256xf32>, vector<16x256xf32> -> vector<16x256xf32>
    %c0_8 = arith.constant 0 : index
    %c0_9 = arith.constant 0 : index
    %11 = vector.load %arg2[%c0_8, %c0_9] : memref<4x256xf32, #tpu.memory_space<vmem>>, vector<4x256xf32>
    %c0_10 = arith.constant 0 : index
    %c0_11 = arith.constant 0 : index
    %12 = vector.load %arg4[%c0_10, %c0_11] : memref<4x1xf32, #tpu.memory_space<vmem>>, vector<4x1xf32>
    %13 = vector.broadcast %12 : vector<4x1xf32> to vector<4x256xf32>
    %14 = arith.mulf %11, %13 : vector<4x256xf32>
    %c0_12 = arith.constant 0 : index
    %c0_13 = arith.constant 0 : index
    %15 = vector.load %arg6[%c0_12, %c0_13] : memref<4x1xf32, #tpu.memory_space<vmem>>, vector<4x1xf32>
    %16 = vector.broadcast %15 : vector<4x1xf32> to vector<4x256xf32>
    %17 = arith.addf %14, %16 : vector<4x256xf32>
    %cst_14 = arith.constant 0.000000e+00 : f32
    %18 = vector.broadcast %cst_14 : f32 to vector<4x256xf32>
    %19 = arith.maximumf %17, %18 : vector<4x256xf32>
    %c0_15 = arith.constant 0 : index
    %c0_16 = arith.constant 0 : index
    %20 = vector.load %arg8[%c0_15, %c0_16] : memref<16x4xf32, #tpu.memory_space<vmem>>, vector<16x4xf32>
    %cst_17 = arith.constant dense<0.000000e+00> : vector<16x256xf32>
    %21 = tpu.matmul %20, %19, %cst_17 {dimension_numbers = #tpu.dot_dimension_numbers<[1], [0], [0], [1], [0, 0, 1, 1], [], []>} : vector<16x4xf32>, vector<4x256xf32>, vector<16x256xf32> -> vector<16x256xf32>
    %22 = arith.addf %10, %21 : vector<16x256xf32>
    %c0_18 = arith.constant 0 : index
    %c0_19 = arith.constant 0 : index
    %23 = vector.load %arg9[%c0_18, %c0_19] : memref<16x256xf32, #tpu.memory_space<vmem>>, vector<16x256xf32>
    tpu.vector_store %arg9[%c0_18, %c0_19], %22 {strides = array<i32>} : memref<16x256xf32, #tpu.memory_space<vmem>>, vector<16x256xf32>,
    %cst_20 = arith.constant dense<0.000000e+00> : vector<16xf32>
    %24 = vector.multi_reduction <add>, %22, %cst_20 [1] : vector<16x256xf32> to vector<16xf32>
    %25 = vector.shape_cast %24 : vector<16xf32> to vector<1x1x16xf32>
    %c0_21 = arith.constant 0 : index
    %c0_22 = arith.constant 0 : index
    %c0_23 = arith.constant 0 : index
    %26 = vector.load %arg10[%c0_21, %c0_22, %c0_23] : memref<1x1x16xf32, #tpu.memory_space<vmem>>, vector<1x1x16xf32>
    tpu.vector_store %arg10[%c0_21, %c0_22, %c0_23], %25 {strides = array<i32>} : memref<1x1x16xf32, #tpu.memory_space<vmem>>, vector<1x1x16xf32>,
    %27 = arith.mulf %22, %22 : vector<16x256xf32>
    %cst_24 = arith.constant dense<0.000000e+00> : vector<16xf32>
    %28 = vector.multi_reduction <add>, %27, %cst_24 [1] : vector<16x256xf32> to vector<16xf32>
    %29 = vector.shape_cast %28 : vector<16xf32> to vector<1x1x16xf32>
    %c0_25 = arith.constant 0 : index
    %c0_26 = arith.constant 0 : index
    %c0_27 = arith.constant 0 : index
    %30 = vector.load %arg11[%c0_25, %c0_26, %c0_27] : memref<1x1x16xf32, #tpu.memory_space<vmem>>, vector<1x1x16xf32>
    tpu.vector_store %arg11[%c0_25, %c0_26, %c0_27], %29 {strides = array<i32>} : memref<1x1x16xf32, #tpu.memory_space<vmem>>, vector<1x1x16xf32>,
    return
  }
  func.func @transform_0(%arg0: i32) -> (i32, i32) {
    %c0_i32 = arith.constant 0 : i32
    %c0_i32_0 = arith.constant 0 : i32
    return %c0_i32, %arg0 : i32, i32
  }
  func.func @transform_1(%arg0: i32) -> (i32, i32) {
    %c0_i32 = arith.constant 0 : i32
    %c0_i32_0 = arith.constant 0 : i32
    return %c0_i32, %arg0 : i32, i32
  }
  func.func @transform_2(%arg0: i32) -> (i32, i32) {
    %c0_i32 = arith.constant 0 : i32
    %c0_i32_0 = arith.constant 0 : i32
    %c0_i32_1 = arith.constant 0 : i32
    return %c0_i32, %c0_i32_0 : i32, i32
  }
  func.func @transform_3(%arg0: i32) -> (i32, i32) {
    %c0_i32 = arith.constant 0 : i32
    %c0_i32_0 = arith.constant 0 : i32
    %c0_i32_1 = arith.constant 0 : i32
    return %c0_i32, %c0_i32_0 : i32, i32
  }
  func.func @transform_4(%arg0: i32) -> (i32, i32) {
    %c0_i32 = arith.constant 0 : i32
    %c0_i32_0 = arith.constant 0 : i32
    %c0_i32_1 = arith.constant 0 : i32
    return %c0_i32, %c0_i32_0 : i32, i32
  }
  func.func @transform_5(%arg0: i32) -> (i32, i32) {
    %c0_i32 = arith.constant 0 : i32
    %c0_i32_0 = arith.constant 0 : i32
    %c0_i32_1 = arith.constant 0 : i32
    return %c0_i32, %c0_i32_0 : i32, i32
  }
  func.func @transform_6(%arg0: i32) -> (i32, i32) {
    %c0_i32 = arith.constant 0 : i32
    %c0_i32_0 = arith.constant 0 : i32
    %c0_i32_1 = arith.constant 0 : i32
    return %c0_i32, %c0_i32_0 : i32, i32
  }
  func.func @transform_7(%arg0: i32) -> (i32, i32) {
    %c0_i32 = arith.constant 0 : i32
    %c0_i32_0 = arith.constant 0 : i32
    %c0_i32_1 = arith.constant 0 : i32
    return %c0_i32, %c0_i32_0 : i32, i32
  }
  func.func @transform_8(%arg0: i32) -> (i32, i32) {
    %c0_i32 = arith.constant 0 : i32
    %c0_i32_0 = arith.constant 0 : i32
    return %c0_i32, %arg0 : i32, i32
  }
  func.func @transform_9(%arg0: i32) -> (i32, i32, i32) {
    %c0_i32 = arith.constant 0 : i32
    %c0_i32_0 = arith.constant 0 : i32
    %c0_i32_1 = arith.constant 0 : i32
    return %arg0, %c0_i32, %c0_i32_0 : i32, i32, i32
  }
  func.func @transform_10(%arg0: i32) -> (i32, i32, i32) {
    %c0_i32 = arith.constant 0 : i32
    %c0_i32_0 = arith.constant 0 : i32
    %c0_i32_1 = arith.constant 0 : i32
    return %arg0, %c0_i32, %c0_i32_0 : i32, i32, i32
  }
}

module attributes {stable_mosaic.version = 11 : i64} {
  func.func @kernel(%arg0: i32, %arg1: memref<4x256xf32, #tpu.memory_space<vmem>>, %arg2: memref<4x256xf32, #tpu.memory_space<vmem>>, %arg3: memref<4x256xf32, #tpu.memory_space<vmem>>, %arg4: memref<4x1xf32, #tpu.memory_space<vmem>>, %arg5: memref<4x1xf32, #tpu.memory_space<vmem>>, %arg6: memref<4x1xf32, #tpu.memory_space<vmem>>, %arg7: memref<4x1xf32, #tpu.memory_space<vmem>>, %arg8: memref<4x1xf32, #tpu.memory_space<vmem>>, %arg9: memref<4x1xf32, #tpu.memory_space<vmem>>, %arg10: memref<16x4xf32, #tpu.memory_space<vmem>>, %arg11: memref<16x4xf32, #tpu.memory_space<vmem>>, %arg12: memref<16x4xf32, #tpu.memory_space<vmem>>, %arg13: memref<16x256xf32, #tpu.memory_space<vmem>>, %arg14: memref<1x1x16xf32, #tpu.memory_space<vmem>>, %arg15: memref<1x1x16xf32, #tpu.memory_space<vmem>>) attributes {dimension_semantics = [#tpu.dimension_semantics<parallel>], iteration_bounds = array<i64: 2>, scalar_prefetch = 0 : i64, scratch_operands = 0 : i64, tpu.core_type = #tpu.core_type<tc>, window_params = [{transform_indices = @transform_0, window_bounds = array<i64: 4, 256>}, {transform_indices = @transform_1, window_bounds = array<i64: 4, 256>}, {transform_indices = @transform_2, window_bounds = array<i64: 4, 256>}, {pipeline_mode = #tpu.pipeline_mode<synchronous>, transform_indices = @transform_3, window_bounds = array<i64: 4, 1>}, {pipeline_mode = #tpu.pipeline_mode<synchronous>, transform_indices = @transform_4, window_bounds = array<i64: 4, 1>}, {pipeline_mode = #tpu.pipeline_mode<synchronous>, transform_indices = @transform_5, window_bounds = array<i64: 4, 1>}, {pipeline_mode = #tpu.pipeline_mode<synchronous>, transform_indices = @transform_6, window_bounds = array<i64: 4, 1>}, {pipeline_mode = #tpu.pipeline_mode<synchronous>, transform_indices = @transform_7, window_bounds = array<i64: 4, 1>}, {pipeline_mode = #tpu.pipeline_mode<synchronous>, transform_indices = @transform_8, window_bounds = array<i64: 4, 1>}, {pipeline_mode = #tpu.pipeline_mode<synchronous>, transform_indices = @transform_9, window_bounds = array<i64: 16, 4>}, {pipeline_mode = #tpu.pipeline_mode<synchronous>, transform_indices = @transform_10, window_bounds = array<i64: 16, 4>}, {pipeline_mode = #tpu.pipeline_mode<synchronous>, transform_indices = @transform_11, window_bounds = array<i64: 16, 4>}, {transform_indices = @transform_12, window_bounds = array<i64: 16, 256>}, {transform_indices = @transform_13, window_bounds = array<i64: 1, 1, 16>}, {transform_indices = @transform_14, window_bounds = array<i64: 1, 1, 16>}]} {
    %c0 = arith.constant 0 : index
    %c0_0 = arith.constant 0 : index
    %0 = vector.load %arg1[%c0, %c0_0] : memref<4x256xf32, #tpu.memory_space<vmem>>, vector<4x256xf32>
    %c0_1 = arith.constant 0 : index
    %c0_2 = arith.constant 0 : index
    %1 = vector.load %arg4[%c0_1, %c0_2] : memref<4x1xf32, #tpu.memory_space<vmem>>, vector<4x1xf32>
    %2 = vector.broadcast %1 : vector<4x1xf32> to vector<4x256xf32>
    %3 = arith.mulf %0, %2 : vector<4x256xf32>
    %c0_3 = arith.constant 0 : index
    %c0_4 = arith.constant 0 : index
    %4 = vector.load %arg7[%c0_3, %c0_4] : memref<4x1xf32, #tpu.memory_space<vmem>>, vector<4x1xf32>
    %5 = vector.broadcast %4 : vector<4x1xf32> to vector<4x256xf32>
    %6 = arith.addf %3, %5 : vector<4x256xf32>
    %cst = arith.constant 0.000000e+00 : f32
    %7 = vector.broadcast %cst : f32 to vector<4x256xf32>
    %8 = arith.maximumf %6, %7 : vector<4x256xf32>
    %c0_5 = arith.constant 0 : index
    %c0_6 = arith.constant 0 : index
    %9 = vector.load %arg10[%c0_5, %c0_6] : memref<16x4xf32, #tpu.memory_space<vmem>>, vector<16x4xf32>
    %cst_7 = arith.constant dense<0.000000e+00> : vector<16x256xf32>
    %10 = tpu.matmul %9, %8, %cst_7 {dimension_numbers = #tpu.dot_dimension_numbers<[1], [0], [0], [1], [0, 0, 1, 1], [], []>} : vector<16x4xf32>, vector<4x256xf32>, vector<16x256xf32> -> vector<16x256xf32>
    %c0_8 = arith.constant 0 : index
    %c0_9 = arith.constant 0 : index
    %11 = vector.load %arg2[%c0_8, %c0_9] : memref<4x256xf32, #tpu.memory_space<vmem>>, vector<4x256xf32>
    %c0_10 = arith.constant 0 : index
    %c0_11 = arith.constant 0 : index
    %12 = vector.load %arg5[%c0_10, %c0_11] : memref<4x1xf32, #tpu.memory_space<vmem>>, vector<4x1xf32>
    %13 = vector.broadcast %12 : vector<4x1xf32> to vector<4x256xf32>
    %14 = arith.mulf %11, %13 : vector<4x256xf32>
    %c0_12 = arith.constant 0 : index
    %c0_13 = arith.constant 0 : index
    %15 = vector.load %arg8[%c0_12, %c0_13] : memref<4x1xf32, #tpu.memory_space<vmem>>, vector<4x1xf32>
    %16 = vector.broadcast %15 : vector<4x1xf32> to vector<4x256xf32>
    %17 = arith.addf %14, %16 : vector<4x256xf32>
    %cst_14 = arith.constant 0.000000e+00 : f32
    %18 = vector.broadcast %cst_14 : f32 to vector<4x256xf32>
    %19 = arith.maximumf %17, %18 : vector<4x256xf32>
    %c0_15 = arith.constant 0 : index
    %c0_16 = arith.constant 0 : index
    %20 = vector.load %arg11[%c0_15, %c0_16] : memref<16x4xf32, #tpu.memory_space<vmem>>, vector<16x4xf32>
    %cst_17 = arith.constant dense<0.000000e+00> : vector<16x256xf32>
    %21 = tpu.matmul %20, %19, %cst_17 {dimension_numbers = #tpu.dot_dimension_numbers<[1], [0], [0], [1], [0, 0, 1, 1], [], []>} : vector<16x4xf32>, vector<4x256xf32>, vector<16x256xf32> -> vector<16x256xf32>
    %22 = arith.addf %10, %21 : vector<16x256xf32>
    %c0_18 = arith.constant 0 : index
    %c0_19 = arith.constant 0 : index
    %23 = vector.load %arg3[%c0_18, %c0_19] : memref<4x256xf32, #tpu.memory_space<vmem>>, vector<4x256xf32>
    %c0_20 = arith.constant 0 : index
    %c0_21 = arith.constant 0 : index
    %24 = vector.load %arg6[%c0_20, %c0_21] : memref<4x1xf32, #tpu.memory_space<vmem>>, vector<4x1xf32>
    %25 = vector.broadcast %24 : vector<4x1xf32> to vector<4x256xf32>
    %26 = arith.mulf %23, %25 : vector<4x256xf32>
    %c0_22 = arith.constant 0 : index
    %c0_23 = arith.constant 0 : index
    %27 = vector.load %arg9[%c0_22, %c0_23] : memref<4x1xf32, #tpu.memory_space<vmem>>, vector<4x1xf32>
    %28 = vector.broadcast %27 : vector<4x1xf32> to vector<4x256xf32>
    %29 = arith.addf %26, %28 : vector<4x256xf32>
    %cst_24 = arith.constant 0.000000e+00 : f32
    %30 = vector.broadcast %cst_24 : f32 to vector<4x256xf32>
    %31 = arith.maximumf %29, %30 : vector<4x256xf32>
    %c0_25 = arith.constant 0 : index
    %c0_26 = arith.constant 0 : index
    %32 = vector.load %arg12[%c0_25, %c0_26] : memref<16x4xf32, #tpu.memory_space<vmem>>, vector<16x4xf32>
    %cst_27 = arith.constant dense<0.000000e+00> : vector<16x256xf32>
    %33 = tpu.matmul %32, %31, %cst_27 {dimension_numbers = #tpu.dot_dimension_numbers<[1], [0], [0], [1], [0, 0, 1, 1], [], []>} : vector<16x4xf32>, vector<4x256xf32>, vector<16x256xf32> -> vector<16x256xf32>
    %34 = arith.addf %22, %33 : vector<16x256xf32>
    %c0_28 = arith.constant 0 : index
    %c0_29 = arith.constant 0 : index
    %35 = vector.load %arg13[%c0_28, %c0_29] : memref<16x256xf32, #tpu.memory_space<vmem>>, vector<16x256xf32>
    tpu.vector_store %arg13[%c0_28, %c0_29], %34 {strides = array<i32>} : memref<16x256xf32, #tpu.memory_space<vmem>>, vector<16x256xf32>,
    %cst_30 = arith.constant dense<0.000000e+00> : vector<16xf32>
    %36 = vector.multi_reduction <add>, %34, %cst_30 [1] : vector<16x256xf32> to vector<16xf32>
    %37 = vector.shape_cast %36 : vector<16xf32> to vector<1x1x16xf32>
    %c0_31 = arith.constant 0 : index
    %c0_32 = arith.constant 0 : index
    %c0_33 = arith.constant 0 : index
    %38 = vector.load %arg14[%c0_31, %c0_32, %c0_33] : memref<1x1x16xf32, #tpu.memory_space<vmem>>, vector<1x1x16xf32>
    tpu.vector_store %arg14[%c0_31, %c0_32, %c0_33], %37 {strides = array<i32>} : memref<1x1x16xf32, #tpu.memory_space<vmem>>, vector<1x1x16xf32>,
    %39 = arith.mulf %34, %34 : vector<16x256xf32>
    %cst_34 = arith.constant dense<0.000000e+00> : vector<16xf32>
    %40 = vector.multi_reduction <add>, %39, %cst_34 [1] : vector<16x256xf32> to vector<16xf32>
    %41 = vector.shape_cast %40 : vector<16xf32> to vector<1x1x16xf32>
    %c0_35 = arith.constant 0 : index
    %c0_36 = arith.constant 0 : index
    %c0_37 = arith.constant 0 : index
    %42 = vector.load %arg15[%c0_35, %c0_36, %c0_37] : memref<1x1x16xf32, #tpu.memory_space<vmem>>, vector<1x1x16xf32>
    tpu.vector_store %arg15[%c0_35, %c0_36, %c0_37], %41 {strides = array<i32>} : memref<1x1x16xf32, #tpu.memory_space<vmem>>, vector<1x1x16xf32>,
    return
  }
  func.func @transform_0(%arg0: i32) -> (i32, i32) {
    %c0_i32 = arith.constant 0 : i32
    %c0_i32_0 = arith.constant 0 : i32
    return %c0_i32, %arg0 : i32, i32
  }
  func.func @transform_1(%arg0: i32) -> (i32, i32) {
    %c0_i32 = arith.constant 0 : i32
    %c0_i32_0 = arith.constant 0 : i32
    return %c0_i32, %arg0 : i32, i32
  }
  func.func @transform_2(%arg0: i32) -> (i32, i32) {
    %c0_i32 = arith.constant 0 : i32
    %c0_i32_0 = arith.constant 0 : i32
    return %c0_i32, %arg0 : i32, i32
  }
  func.func @transform_3(%arg0: i32) -> (i32, i32) {
    %c0_i32 = arith.constant 0 : i32
    %c0_i32_0 = arith.constant 0 : i32
    %c0_i32_1 = arith.constant 0 : i32
    return %c0_i32, %c0_i32_0 : i32, i32
  }
  func.func @transform_4(%arg0: i32) -> (i32, i32) {
    %c0_i32 = arith.constant 0 : i32
    %c0_i32_0 = arith.constant 0 : i32
    %c0_i32_1 = arith.constant 0 : i32
    return %c0_i32, %c0_i32_0 : i32, i32
  }
  func.func @transform_5(%arg0: i32) -> (i32, i32) {
    %c0_i32 = arith.constant 0 : i32
    %c0_i32_0 = arith.constant 0 : i32
    %c0_i32_1 = arith.constant 0 : i32
    return %c0_i32, %c0_i32_0 : i32, i32
  }
  func.func @transform_6(%arg0: i32) -> (i32, i32) {
    %c0_i32 = arith.constant 0 : i32
    %c0_i32_0 = arith.constant 0 : i32
    %c0_i32_1 = arith.constant 0 : i32
    return %c0_i32, %c0_i32_0 : i32, i32
  }
  func.func @transform_7(%arg0: i32) -> (i32, i32) {
    %c0_i32 = arith.constant 0 : i32
    %c0_i32_0 = arith.constant 0 : i32
    %c0_i32_1 = arith.constant 0 : i32
    return %c0_i32, %c0_i32_0 : i32, i32
  }
  func.func @transform_8(%arg0: i32) -> (i32, i32) {
    %c0_i32 = arith.constant 0 : i32
    %c0_i32_0 = arith.constant 0 : i32
    %c0_i32_1 = arith.constant 0 : i32
    return %c0_i32, %c0_i32_0 : i32, i32
  }
  func.func @transform_9(%arg0: i32) -> (i32, i32) {
    %c0_i32 = arith.constant 0 : i32
    %c0_i32_0 = arith.constant 0 : i32
    %c0_i32_1 = arith.constant 0 : i32
    return %c0_i32, %c0_i32_0 : i32, i32
  }
  func.func @transform_10(%arg0: i32) -> (i32, i32) {
    %c0_i32 = arith.constant 0 : i32
    %c0_i32_0 = arith.constant 0 : i32
    %c0_i32_1 = arith.constant 0 : i32
    return %c0_i32, %c0_i32_0 : i32, i32
  }
  func.func @transform_11(%arg0: i32) -> (i32, i32) {
    %c0_i32 = arith.constant 0 : i32
    %c0_i32_0 = arith.constant 0 : i32
    %c0_i32_1 = arith.constant 0 : i32
    return %c0_i32, %c0_i32_0 : i32, i32
  }
  func.func @transform_12(%arg0: i32) -> (i32, i32) {
    %c0_i32 = arith.constant 0 : i32
    %c0_i32_0 = arith.constant 0 : i32
    return %c0_i32, %arg0 : i32, i32
  }
  func.func @transform_13(%arg0: i32) -> (i32, i32, i32) {
    %c0_i32 = arith.constant 0 : i32
    %c0_i32_0 = arith.constant 0 : i32
    %c0_i32_1 = arith.constant 0 : i32
    return %arg0, %c0_i32, %c0_i32_0 : i32, i32, i32
  }
  func.func @transform_14(%arg0: i32) -> (i32, i32, i32) {
    %c0_i32 = arith.constant 0 : i32
    %c0_i32_0 = arith.constant 0 : i32
    %c0_i32_1 = arith.constant 0 : i32
    return %arg0, %c0_i32, %c0_i32_0 : i32, i32, i32
  }
}

module attributes {stable_mosaic.version = 11 : i64} {
  func.func @kernel(%arg0: i32, %arg1: memref<4x256xf32, #tpu.memory_space<vmem>>, %arg2: memref<4x1xf32, #tpu.memory_space<vmem>>, %arg3: memref<4x1xf32, #tpu.memory_space<vmem>>, %arg4: memref<16x4xf32, #tpu.memory_space<vmem>>, %arg5: memref<16x256xf32, #tpu.memory_space<vmem>>, %arg6: memref<1x1x16xf32, #tpu.memory_space<vmem>>, %arg7: memref<1x1x16xf32, #tpu.memory_space<vmem>>) attributes {dimension_semantics = [#tpu.dimension_semantics<parallel>], iteration_bounds = array<i64: 2>, scalar_prefetch = 0 : i64, scratch_operands = 0 : i64, tpu.core_type = #tpu.core_type<tc>, window_params = [{transform_indices = @transform_0, window_bounds = array<i64: 4, 256>}, {pipeline_mode = #tpu.pipeline_mode<synchronous>, transform_indices = @transform_1, window_bounds = array<i64: 4, 1>}, {pipeline_mode = #tpu.pipeline_mode<synchronous>, transform_indices = @transform_2, window_bounds = array<i64: 4, 1>}, {pipeline_mode = #tpu.pipeline_mode<synchronous>, transform_indices = @transform_3, window_bounds = array<i64: 16, 4>}, {transform_indices = @transform_4, window_bounds = array<i64: 16, 256>}, {transform_indices = @transform_5, window_bounds = array<i64: 1, 1, 16>}, {transform_indices = @transform_6, window_bounds = array<i64: 1, 1, 16>}]} {
    %c0 = arith.constant 0 : index
    %c0_0 = arith.constant 0 : index
    %0 = vector.load %arg1[%c0, %c0_0] : memref<4x256xf32, #tpu.memory_space<vmem>>, vector<4x256xf32>
    %c0_1 = arith.constant 0 : index
    %c0_2 = arith.constant 0 : index
    %1 = vector.load %arg2[%c0_1, %c0_2] : memref<4x1xf32, #tpu.memory_space<vmem>>, vector<4x1xf32>
    %2 = vector.broadcast %1 : vector<4x1xf32> to vector<4x256xf32>
    %3 = arith.mulf %0, %2 : vector<4x256xf32>
    %c0_3 = arith.constant 0 : index
    %c0_4 = arith.constant 0 : index
    %4 = vector.load %arg3[%c0_3, %c0_4] : memref<4x1xf32, #tpu.memory_space<vmem>>, vector<4x1xf32>
    %5 = vector.broadcast %4 : vector<4x1xf32> to vector<4x256xf32>
    %6 = arith.addf %3, %5 : vector<4x256xf32>
    %cst = arith.constant 0.000000e+00 : f32
    %7 = vector.broadcast %cst : f32 to vector<4x256xf32>
    %8 = arith.maximumf %6, %7 : vector<4x256xf32>
    %c0_5 = arith.constant 0 : index
    %c0_6 = arith.constant 0 : index
    %9 = vector.load %arg4[%c0_5, %c0_6] : memref<16x4xf32, #tpu.memory_space<vmem>>, vector<16x4xf32>
    %cst_7 = arith.constant dense<0.000000e+00> : vector<16x256xf32>
    %10 = tpu.matmul %9, %8, %cst_7 {dimension_numbers = #tpu.dot_dimension_numbers<[1], [0], [0], [1], [0, 0, 1, 1], [], []>} : vector<16x4xf32>, vector<4x256xf32>, vector<16x256xf32> -> vector<16x256xf32>
    %c0_8 = arith.constant 0 : index
    %c0_9 = arith.constant 0 : index
    %11 = vector.load %arg5[%c0_8, %c0_9] : memref<16x256xf32, #tpu.memory_space<vmem>>, vector<16x256xf32>
    tpu.vector_store %arg5[%c0_8, %c0_9], %10 {strides = array<i32>} : memref<16x256xf32, #tpu.memory_space<vmem>>, vector<16x256xf32>,
    %cst_10 = arith.constant dense<0.000000e+00> : vector<16xf32>
    %12 = vector.multi_reduction <add>, %10, %cst_10 [1] : vector<16x256xf32> to vector<16xf32>
    %13 = vector.shape_cast %12 : vector<16xf32> to vector<1x1x16xf32>
    %c0_11 = arith.constant 0 : index
    %c0_12 = arith.constant 0 : index
    %c0_13 = arith.constant 0 : index
    %14 = vector.load %arg6[%c0_11, %c0_12, %c0_13] : memref<1x1x16xf32, #tpu.memory_space<vmem>>, vector<1x1x16xf32>
    tpu.vector_store %arg6[%c0_11, %c0_12, %c0_13], %13 {strides = array<i32>} : memref<1x1x16xf32, #tpu.memory_space<vmem>>, vector<1x1x16xf32>,
    %15 = arith.mulf %10, %10 : vector<16x256xf32>
    %cst_14 = arith.constant dense<0.000000e+00> : vector<16xf32>
    %16 = vector.multi_reduction <add>, %15, %cst_14 [1] : vector<16x256xf32> to vector<16xf32>
    %17 = vector.shape_cast %16 : vector<16xf32> to vector<1x1x16xf32>
    %c0_15 = arith.constant 0 : index
    %c0_16 = arith.constant 0 : index
    %c0_17 = arith.constant 0 : index
    %18 = vector.load %arg7[%c0_15, %c0_16, %c0_17] : memref<1x1x16xf32, #tpu.memory_space<vmem>>, vector<1x1x16xf32>
    tpu.vector_store %arg7[%c0_15, %c0_16, %c0_17], %17 {strides = array<i32>} : memref<1x1x16xf32, #tpu.memory_space<vmem>>, vector<1x1x16xf32>,
    return
  }
  func.func @transform_0(%arg0: i32) -> (i32, i32) {
    %c0_i32 = arith.constant 0 : i32
    %c0_i32_0 = arith.constant 0 : i32
    return %c0_i32, %arg0 : i32, i32
  }
  func.func @transform_1(%arg0: i32) -> (i32, i32) {
    %c0_i32 = arith.constant 0 : i32
    %c0_i32_0 = arith.constant 0 : i32
    %c0_i32_1 = arith.constant 0 : i32
    return %c0_i32, %c0_i32_0 : i32, i32
  }
  func.func @transform_2(%arg0: i32) -> (i32, i32) {
    %c0_i32 = arith.constant 0 : i32
    %c0_i32_0 = arith.constant 0 : i32
    %c0_i32_1 = arith.constant 0 : i32
    return %c0_i32, %c0_i32_0 : i32, i32
  }
  func.func @transform_3(%arg0: i32) -> (i32, i32) {
    %c0_i32 = arith.constant 0 : i32
    %c0_i32_0 = arith.constant 0 : i32
    %c0_i32_1 = arith.constant 0 : i32
    return %c0_i32, %c0_i32_0 : i32, i32
  }
  func.func @transform_4(%arg0: i32) -> (i32, i32) {
    %c0_i32 = arith.constant 0 : i32
    %c0_i32_0 = arith.constant 0 : i32
    return %c0_i32, %arg0 : i32, i32
  }
  func.func @transform_5(%arg0: i32) -> (i32, i32, i32) {
    %c0_i32 = arith.constant 0 : i32
    %c0_i32_0 = arith.constant 0 : i32
    %c0_i32_1 = arith.constant 0 : i32
    return %arg0, %c0_i32, %c0_i32_0 : i32, i32, i32
  }
  func.func @transform_6(%arg0: i32) -> (i32, i32, i32) {
    %c0_i32 = arith.constant 0 : i32
    %c0_i32_0 = arith.constant 0 : i32
    %c0_i32_1 = arith.constant 0 : i32
    return %arg0, %c0_i32, %c0_i32_0 : i32, i32, i32
  }
}

module attributes {stable_mosaic.version = 11 : i64} {
  func.func @kernel(%arg0: i32, %arg1: memref<16x256xf32, #tpu.memory_space<vmem>>, %arg2: memref<16x1xf32, #tpu.memory_space<vmem>>, %arg3: memref<16x1xf32, #tpu.memory_space<vmem>>, %arg4: memref<9x4x16xf32, #tpu.memory_space<vmem>>, %arg5: memref<4x256xf32, #tpu.memory_space<vmem>>, %arg6: memref<1x1x4xf32, #tpu.memory_space<vmem>>, %arg7: memref<1x1x4xf32, #tpu.memory_space<vmem>>, %arg8: memref<16x290xf32, #tpu.memory_space<vmem>>) attributes {dimension_semantics = [#tpu.dimension_semantics<parallel>], iteration_bounds = array<i64: 2>, scalar_prefetch = 0 : i64, scratch_operands = 1 : i64, tpu.core_type = #tpu.core_type<tc>, window_params = [{transform_indices = @transform_0, window_bounds = array<i64: 16, 256>}, {pipeline_mode = #tpu.pipeline_mode<synchronous>, transform_indices = @transform_1, window_bounds = array<i64: 16, 1>}, {pipeline_mode = #tpu.pipeline_mode<synchronous>, transform_indices = @transform_2, window_bounds = array<i64: 16, 1>}, {pipeline_mode = #tpu.pipeline_mode<synchronous>, transform_indices = @transform_3, window_bounds = array<i64: 9, 4, 16>}, {transform_indices = @transform_4, window_bounds = array<i64: 4, 256>}, {transform_indices = @transform_5, window_bounds = array<i64: 1, 1, 4>}, {transform_indices = @transform_6, window_bounds = array<i64: 1, 1, 4>}]} {
    %c0 = arith.constant 0 : index
    %c0_0 = arith.constant 0 : index
    %0 = vector.load %arg1[%c0, %c0_0] : memref<16x256xf32, #tpu.memory_space<vmem>>, vector<16x256xf32>
    %c0_1 = arith.constant 0 : index
    %c0_2 = arith.constant 0 : index
    %1 = vector.load %arg2[%c0_1, %c0_2] : memref<16x1xf32, #tpu.memory_space<vmem>>, vector<16x1xf32>
    %2 = vector.broadcast %1 : vector<16x1xf32> to vector<16x256xf32>
    %3 = arith.mulf %0, %2 : vector<16x256xf32>
    %c0_3 = arith.constant 0 : index
    %c0_4 = arith.constant 0 : index
    %4 = vector.load %arg3[%c0_3, %c0_4] : memref<16x1xf32, #tpu.memory_space<vmem>>, vector<16x1xf32>
    %5 = vector.broadcast %4 : vector<16x1xf32> to vector<16x256xf32>
    %6 = arith.addf %3, %5 : vector<16x256xf32>
    %cst = arith.constant 0.000000e+00 : f32
    %7 = vector.broadcast %cst : f32 to vector<16x256xf32>
    %8 = arith.maximumf %6, %7 : vector<16x256xf32>
    %cst_5 = arith.constant 0.000000e+00 : f32
    %9 = vector.broadcast %cst_5 : f32 to vector<16x17xf32>
    %c0_6 = arith.constant 0 : index
    %c0_7 = arith.constant 0 : index
    %10 = vector.load %arg8[%c0_6, %c0_7] : memref<16x290xf32, #tpu.memory_space<vmem>>, vector<16x17xf32>
    tpu.vector_store %arg8[%c0_6, %c0_7], %9 {strides = array<i32>} : memref<16x290xf32, #tpu.memory_space<vmem>>, vector<16x17xf32>,
    %c0_8 = arith.constant 0 : index
    %c273 = arith.constant 273 : index
    %11 = vector.load %arg8[%c0_8, %c273] : memref<16x290xf32, #tpu.memory_space<vmem>>, vector<16x17xf32>
    tpu.vector_store %arg8[%c0_8, %c273], %9 {strides = array<i32>} : memref<16x290xf32, #tpu.memory_space<vmem>>, vector<16x17xf32>,
    %c0_9 = arith.constant 0 : index
    %c17 = arith.constant 17 : index
    %12 = vector.load %arg8[%c0_9, %c17] : memref<16x290xf32, #tpu.memory_space<vmem>>, vector<16x256xf32>
    tpu.vector_store %arg8[%c0_9, %c17], %8 {strides = array<i32>} : memref<16x290xf32, #tpu.memory_space<vmem>>, vector<16x256xf32>,
    %13 = tpu.iota {dimensions = array<i32: 1>} : vector<1x256xi32>
    %c16_i32 = arith.constant 16 : i32
    %c0_i32 = arith.constant 0 : i32
    %14 = arith.cmpi eq, %c16_i32, %c0_i32 : i32
    %c1_i32 = arith.constant 1 : i32
    %15 = arith.select %14, %c1_i32, %c16_i32 : i32
    %16 = vector.broadcast %15 : i32 to vector<1x256xi32>
    %17 = arith.remsi %13, %16 : vector<1x256xi32>
    %c0_i32_10 = arith.constant 0 : i32
    %18 = vector.broadcast %c0_i32_10 : i32 to vector<1x256xi32>
    %19 = arith.cmpi ne, %17, %18 : vector<1x256xi32>
    %c0_i32_11 = arith.constant 0 : i32
    %20 = vector.broadcast %c0_i32_11 : i32 to vector<1x256xi32>
    %21 = arith.cmpi slt, %17, %20 : vector<1x256xi32>
    %c0_i32_12 = arith.constant 0 : i32
    %22 = arith.cmpi slt, %15, %c0_i32_12 : i32
    %23 = vector.broadcast %22 : i1 to vector<1x256xi1>
    %24 = vector.broadcast %23 : vector<1x256xi1> to vector<1x256xi1>
    %25 = arith.xori %21, %24 : vector<1x256xi1>
    %26 = arith.andi %25, %19 : vector<1x256xi1>
    %27 = vector.broadcast %15 : i32 to vector<1x256xi32>
    %28 = arith.addi %17, %27 : vector<1x256xi32>
    %29 = arith.select %26, %28, %17 : vector<1x256xi1>, vector<1x256xi32>
    %cst_13 = arith.constant 0.000000e+00 : f32
    %30 = vector.broadcast %cst_13 : f32 to vector<4x256xf32>
    %c0_14 = arith.constant 0 : index
    %c0_15 = arith.constant 0 : index
    %31 = vector.load %arg8[%c0_14, %c0_15] : memref<16x290xf32, #tpu.memory_space<vmem>>, vector<16x256xf32>
    %c0_16 = arith.constant 0 : index
    %c0_17 = arith.constant 0 : index
    %c0_18 = arith.constant 0 : index
    %32 = vector.load %arg4[%c0_16, %c0_17, %c0_18] : memref<9x4x16xf32, #tpu.memory_space<vmem>>, vector<1x4x16xf32>
    %33 = vector.shape_cast %32 : vector<1x4x16xf32> to vector<4x16xf32>
    %cst_19 = arith.constant dense<0.000000e+00> : vector<4x256xf32>
    %34 = tpu.matmul %33, %31, %cst_19 {dimension_numbers = #tpu.dot_dimension_numbers<[1], [0], [0], [1], [0, 0, 1, 1], [], []>} : vector<4x16xf32>, vector<16x256xf32>, vector<4x256xf32> -> vector<4x256xf32>
    %c1_i32_20 = arith.constant 1 : i32
    %35 = vector.broadcast %c1_i32_20 : i32 to vector<1x256xi32>
    %36 = arith.cmpi sge, %29, %35 : vector<1x256xi32>
    %cst_21 = arith.constant 0.000000e+00 : f32
    %37 = vector.shape_cast %36 : vector<1x256xi1> to vector<1x256xi1>
    %38 = vector.broadcast %37 : vector<1x256xi1> to vector<4x256xi1>
    %39 = vector.broadcast %cst_21 : f32 to vector<4x256xf32>
    %40 = arith.select %38, %34, %39 : vector<4x256xi1>, vector<4x256xf32>
    %41 = arith.addf %30, %40 : vector<4x256xf32>
    %c0_22 = arith.constant 0 : index
    %c1 = arith.constant 1 : index
    %42 = vector.load %arg8[%c0_22, %c1] : memref<16x290xf32, #tpu.memory_space<vmem>>, vector<16x256xf32>
    %c1_23 = arith.constant 1 : index
    %c0_24 = arith.constant 0 : index
    %c0_25 = arith.constant 0 : index
    %43 = vector.load %arg4[%c1_23, %c0_24, %c0_25] : memref<9x4x16xf32, #tpu.memory_space<vmem>>, vector<1x4x16xf32>
    %44 = vector.shape_cast %43 : vector<1x4x16xf32> to vector<4x16xf32>
    %cst_26 = arith.constant dense<0.000000e+00> : vector<4x256xf32>
    %45 = tpu.matmul %44, %42, %cst_26 {dimension_numbers = #tpu.dot_dimension_numbers<[1], [0], [0], [1], [0, 0, 1, 1], [], []>} : vector<4x16xf32>, vector<16x256xf32>, vector<4x256xf32> -> vector<4x256xf32>
    %46 = arith.addf %41, %45 : vector<4x256xf32>
    %c0_27 = arith.constant 0 : index
    %c2 = arith.constant 2 : index
    %47 = vector.load %arg8[%c0_27, %c2] : memref<16x290xf32, #tpu.memory_space<vmem>>, vector<16x256xf32>
    %c2_28 = arith.constant 2 : index
    %c0_29 = arith.constant 0 : index
    %c0_30 = arith.constant 0 : index
    %48 = vector.load %arg4[%c2_28, %c0_29, %c0_30] : memref<9x4x16xf32, #tpu.memory_space<vmem>>, vector<1x4x16xf32>
    %49 = vector.shape_cast %48 : vector<1x4x16xf32> to vector<4x16xf32>
    %cst_31 = arith.constant dense<0.000000e+00> : vector<4x256xf32>
    %50 = tpu.matmul %49, %47, %cst_31 {dimension_numbers = #tpu.dot_dimension_numbers<[1], [0], [0], [1], [0, 0, 1, 1], [], []>} : vector<4x16xf32>, vector<16x256xf32>, vector<4x256xf32> -> vector<4x256xf32>
    %c14_i32 = arith.constant 14 : i32
    %51 = vector.broadcast %c14_i32 : i32 to vector<1x256xi32>
    %52 = arith.cmpi sle, %29, %51 : vector<1x256xi32>
    %cst_32 = arith.constant 0.000000e+00 : f32
    %53 = vector.shape_cast %52 : vector<1x256xi1> to vector<1x256xi1>
    %54 = vector.broadcast %53 : vector<1x256xi1> to vector<4x256xi1>
    %55 = vector.broadcast %cst_32 : f32 to vector<4x256xf32>
    %56 = arith.select %54, %50, %55 : vector<4x256xi1>, vector<4x256xf32>
    %57 = arith.addf %46, %56 : vector<4x256xf32>
    %c0_33 = arith.constant 0 : index
    %c16 = arith.constant 16 : index
    %58 = vector.load %arg8[%c0_33, %c16] : memref<16x290xf32, #tpu.memory_space<vmem>>, vector<16x256xf32>
    %c3 = arith.constant 3 : index
    %c0_34 = arith.constant 0 : index
    %c0_35 = arith.constant 0 : index
    %59 = vector.load %arg4[%c3, %c0_34, %c0_35] : memref<9x4x16xf32, #tpu.memory_space<vmem>>, vector<1x4x16xf32>
    %60 = vector.shape_cast %59 : vector<1x4x16xf32> to vector<4x16xf32>
    %cst_36 = arith.constant dense<0.000000e+00> : vector<4x256xf32>
    %61 = tpu.matmul %60, %58, %cst_36 {dimension_numbers = #tpu.dot_dimension_numbers<[1], [0], [0], [1], [0, 0, 1, 1], [], []>} : vector<4x16xf32>, vector<16x256xf32>, vector<4x256xf32> -> vector<4x256xf32>
    %c1_i32_37 = arith.constant 1 : i32
    %62 = vector.broadcast %c1_i32_37 : i32 to vector<1x256xi32>
    %63 = arith.cmpi sge, %29, %62 : vector<1x256xi32>
    %cst_38 = arith.constant 0.000000e+00 : f32
    %64 = vector.shape_cast %63 : vector<1x256xi1> to vector<1x256xi1>
    %65 = vector.broadcast %64 : vector<1x256xi1> to vector<4x256xi1>
    %66 = vector.broadcast %cst_38 : f32 to vector<4x256xf32>
    %67 = arith.select %65, %61, %66 : vector<4x256xi1>, vector<4x256xf32>
    %68 = arith.addf %57, %67 : vector<4x256xf32>
    %c0_39 = arith.constant 0 : index
    %c17_40 = arith.constant 17 : index
    %69 = vector.load %arg8[%c0_39, %c17_40] : memref<16x290xf32, #tpu.memory_space<vmem>>, vector<16x256xf32>
    %c4 = arith.constant 4 : index
    %c0_41 = arith.constant 0 : index
    %c0_42 = arith.constant 0 : index
    %70 = vector.load %arg4[%c4, %c0_41, %c0_42] : memref<9x4x16xf32, #tpu.memory_space<vmem>>, vector<1x4x16xf32>
    %71 = vector.shape_cast %70 : vector<1x4x16xf32> to vector<4x16xf32>
    %cst_43 = arith.constant dense<0.000000e+00> : vector<4x256xf32>
    %72 = tpu.matmul %71, %69, %cst_43 {dimension_numbers = #tpu.dot_dimension_numbers<[1], [0], [0], [1], [0, 0, 1, 1], [], []>} : vector<4x16xf32>, vector<16x256xf32>, vector<4x256xf32> -> vector<4x256xf32>
    %73 = arith.addf %68, %72 : vector<4x256xf32>
    %c0_44 = arith.constant 0 : index
    %c18 = arith.constant 18 : index
    %74 = vector.load %arg8[%c0_44, %c18] : memref<16x290xf32, #tpu.memory_space<vmem>>, vector<16x256xf32>
    %c5 = arith.constant 5 : index
    %c0_45 = arith.constant 0 : index
    %c0_46 = arith.constant 0 : index
    %75 = vector.load %arg4[%c5, %c0_45, %c0_46] : memref<9x4x16xf32, #tpu.memory_space<vmem>>, vector<1x4x16xf32>
    %76 = vector.shape_cast %75 : vector<1x4x16xf32> to vector<4x16xf32>
    %cst_47 = arith.constant dense<0.000000e+00> : vector<4x256xf32>
    %77 = tpu.matmul %76, %74, %cst_47 {dimension_numbers = #tpu.dot_dimension_numbers<[1], [0], [0], [1], [0, 0, 1, 1], [], []>} : vector<4x16xf32>, vector<16x256xf32>, vector<4x256xf32> -> vector<4x256xf32>
    %c14_i32_48 = arith.constant 14 : i32
    %78 = vector.broadcast %c14_i32_48 : i32 to vector<1x256xi32>
    %79 = arith.cmpi sle, %29, %78 : vector<1x256xi32>
    %cst_49 = arith.constant 0.000000e+00 : f32
    %80 = vector.shape_cast %79 : vector<1x256xi1> to vector<1x256xi1>
    %81 = vector.broadcast %80 : vector<1x256xi1> to vector<4x256xi1>
    %82 = vector.broadcast %cst_49 : f32 to vector<4x256xf32>
    %83 = arith.select %81, %77, %82 : vector<4x256xi1>, vector<4x256xf32>
    %84 = arith.addf %73, %83 : vector<4x256xf32>
    %c0_50 = arith.constant 0 : index
    %c32 = arith.constant 32 : index
    %85 = vector.load %arg8[%c0_50, %c32] : memref<16x290xf32, #tpu.memory_space<vmem>>, vector<16x256xf32>
    %c6 = arith.constant 6 : index
    %c0_51 = arith.constant 0 : index
    %c0_52 = arith.constant 0 : index
    %86 = vector.load %arg4[%c6, %c0_51, %c0_52] : memref<9x4x16xf32, #tpu.memory_space<vmem>>, vector<1x4x16xf32>
    %87 = vector.shape_cast %86 : vector<1x4x16xf32> to vector<4x16xf32>
    %cst_53 = arith.constant dense<0.000000e+00> : vector<4x256xf32>
    %88 = tpu.matmul %87, %85, %cst_53 {dimension_numbers = #tpu.dot_dimension_numbers<[1], [0], [0], [1], [0, 0, 1, 1], [], []>} : vector<4x16xf32>, vector<16x256xf32>, vector<4x256xf32> -> vector<4x256xf32>
    %c1_i32_54 = arith.constant 1 : i32
    %89 = vector.broadcast %c1_i32_54 : i32 to vector<1x256xi32>
    %90 = arith.cmpi sge, %29, %89 : vector<1x256xi32>
    %cst_55 = arith.constant 0.000000e+00 : f32
    %91 = vector.shape_cast %90 : vector<1x256xi1> to vector<1x256xi1>
    %92 = vector.broadcast %91 : vector<1x256xi1> to vector<4x256xi1>
    %93 = vector.broadcast %cst_55 : f32 to vector<4x256xf32>
    %94 = arith.select %92, %88, %93 : vector<4x256xi1>, vector<4x256xf32>
    %95 = arith.addf %84, %94 : vector<4x256xf32>
    %c0_56 = arith.constant 0 : index
    %c33 = arith.constant 33 : index
    %96 = vector.load %arg8[%c0_56, %c33] : memref<16x290xf32, #tpu.memory_space<vmem>>, vector<16x256xf32>
    %c7 = arith.constant 7 : index
    %c0_57 = arith.constant 0 : index
    %c0_58 = arith.constant 0 : index
    %97 = vector.load %arg4[%c7, %c0_57, %c0_58] : memref<9x4x16xf32, #tpu.memory_space<vmem>>, vector<1x4x16xf32>
    %98 = vector.shape_cast %97 : vector<1x4x16xf32> to vector<4x16xf32>
    %cst_59 = arith.constant dense<0.000000e+00> : vector<4x256xf32>
    %99 = tpu.matmul %98, %96, %cst_59 {dimension_numbers = #tpu.dot_dimension_numbers<[1], [0], [0], [1], [0, 0, 1, 1], [], []>} : vector<4x16xf32>, vector<16x256xf32>, vector<4x256xf32> -> vector<4x256xf32>
    %100 = arith.addf %95, %99 : vector<4x256xf32>
    %c0_60 = arith.constant 0 : index
    %c34 = arith.constant 34 : index
    %101 = vector.load %arg8[%c0_60, %c34] : memref<16x290xf32, #tpu.memory_space<vmem>>, vector<16x256xf32>
    %c8 = arith.constant 8 : index
    %c0_61 = arith.constant 0 : index
    %c0_62 = arith.constant 0 : index
    %102 = vector.load %arg4[%c8, %c0_61, %c0_62] : memref<9x4x16xf32, #tpu.memory_space<vmem>>, vector<1x4x16xf32>
    %103 = vector.shape_cast %102 : vector<1x4x16xf32> to vector<4x16xf32>
    %cst_63 = arith.constant dense<0.000000e+00> : vector<4x256xf32>
    %104 = tpu.matmul %103, %101, %cst_63 {dimension_numbers = #tpu.dot_dimension_numbers<[1], [0], [0], [1], [0, 0, 1, 1], [], []>} : vector<4x16xf32>, vector<16x256xf32>, vector<4x256xf32> -> vector<4x256xf32>
    %c14_i32_64 = arith.constant 14 : i32
    %105 = vector.broadcast %c14_i32_64 : i32 to vector<1x256xi32>
    %106 = arith.cmpi sle, %29, %105 : vector<1x256xi32>
    %cst_65 = arith.constant 0.000000e+00 : f32
    %107 = vector.shape_cast %106 : vector<1x256xi1> to vector<1x256xi1>
    %108 = vector.broadcast %107 : vector<1x256xi1> to vector<4x256xi1>
    %109 = vector.broadcast %cst_65 : f32 to vector<4x256xf32>
    %110 = arith.select %108, %104, %109 : vector<4x256xi1>, vector<4x256xf32>
    %111 = arith.addf %100, %110 : vector<4x256xf32>
    %c0_66 = arith.constant 0 : index
    %c0_67 = arith.constant 0 : index
    %112 = vector.load %arg5[%c0_66, %c0_67] : memref<4x256xf32, #tpu.memory_space<vmem>>, vector<4x256xf32>
    tpu.vector_store %arg5[%c0_66, %c0_67], %111 {strides = array<i32>} : memref<4x256xf32, #tpu.memory_space<vmem>>, vector<4x256xf32>,
    %cst_68 = arith.constant dense<0.000000e+00> : vector<4xf32>
    %113 = vector.multi_reduction <add>, %111, %cst_68 [1] : vector<4x256xf32> to vector<4xf32>
    %114 = vector.shape_cast %113 : vector<4xf32> to vector<1x1x4xf32>
    %c0_69 = arith.constant 0 : index
    %c0_70 = arith.constant 0 : index
    %c0_71 = arith.constant 0 : index
    %115 = vector.load %arg6[%c0_69, %c0_70, %c0_71] : memref<1x1x4xf32, #tpu.memory_space<vmem>>, vector<1x1x4xf32>
    tpu.vector_store %arg6[%c0_69, %c0_70, %c0_71], %114 {strides = array<i32>} : memref<1x1x4xf32, #tpu.memory_space<vmem>>, vector<1x1x4xf32>,
    %116 = arith.mulf %111, %111 : vector<4x256xf32>
    %cst_72 = arith.constant dense<0.000000e+00> : vector<4xf32>
    %117 = vector.multi_reduction <add>, %116, %cst_72 [1] : vector<4x256xf32> to vector<4xf32>
    %118 = vector.shape_cast %117 : vector<4xf32> to vector<1x1x4xf32>
    %c0_73 = arith.constant 0 : index
    %c0_74 = arith.constant 0 : index
    %c0_75 = arith.constant 0 : index
    %119 = vector.load %arg7[%c0_73, %c0_74, %c0_75] : memref<1x1x4xf32, #tpu.memory_space<vmem>>, vector<1x1x4xf32>
    tpu.vector_store %arg7[%c0_73, %c0_74, %c0_75], %118 {strides = array<i32>} : memref<1x1x4xf32, #tpu.memory_space<vmem>>, vector<1x1x4xf32>,
    return
  }
  func.func @transform_0(%arg0: i32) -> (i32, i32) {
    %c0_i32 = arith.constant 0 : i32
    %c0_i32_0 = arith.constant 0 : i32
    return %c0_i32, %arg0 : i32, i32
  }
  func.func @transform_1(%arg0: i32) -> (i32, i32) {
    %c0_i32 = arith.constant 0 : i32
    %c0_i32_0 = arith.constant 0 : i32
    %c0_i32_1 = arith.constant 0 : i32
    return %c0_i32, %c0_i32_0 : i32, i32
  }
  func.func @transform_2(%arg0: i32) -> (i32, i32) {
    %c0_i32 = arith.constant 0 : i32
    %c0_i32_0 = arith.constant 0 : i32
    %c0_i32_1 = arith.constant 0 : i32
    return %c0_i32, %c0_i32_0 : i32, i32
  }
  func.func @transform_3(%arg0: i32) -> (i32, i32, i32) {
    %c0_i32 = arith.constant 0 : i32
    %c0_i32_0 = arith.constant 0 : i32
    %c0_i32_1 = arith.constant 0 : i32
    %c0_i32_2 = arith.constant 0 : i32
    return %c0_i32, %c0_i32_0, %c0_i32_1 : i32, i32, i32
  }
  func.func @transform_4(%arg0: i32) -> (i32, i32) {
    %c0_i32 = arith.constant 0 : i32
    %c0_i32_0 = arith.constant 0 : i32
    return %c0_i32, %arg0 : i32, i32
  }
  func.func @transform_5(%arg0: i32) -> (i32, i32, i32) {
    %c0_i32 = arith.constant 0 : i32
    %c0_i32_0 = arith.constant 0 : i32
    %c0_i32_1 = arith.constant 0 : i32
    return %arg0, %c0_i32, %c0_i32_0 : i32, i32, i32
  }
  func.func @transform_6(%arg0: i32) -> (i32, i32, i32) {
    %c0_i32 = arith.constant 0 : i32
    %c0_i32_0 = arith.constant 0 : i32
    %c0_i32_1 = arith.constant 0 : i32
    return %arg0, %c0_i32, %c0_i32_0 : i32, i32, i32
  }
}

module attributes {stable_mosaic.version = 11 : i64} {
  func.func @kernel(%arg0: i32, %arg1: memref<16x256xf32, #tpu.memory_space<vmem>>, %arg2: memref<16x1xf32, #tpu.memory_space<vmem>>, %arg3: memref<16x1xf32, #tpu.memory_space<vmem>>, %arg4: memref<9x4x16xf32, #tpu.memory_space<vmem>>, %arg5: memref<4x256xf32, #tpu.memory_space<vmem>>, %arg6: memref<1x1x4xf32, #tpu.memory_space<vmem>>, %arg7: memref<1x1x4xf32, #tpu.memory_space<vmem>>, %arg8: memref<16x290xf32, #tpu.memory_space<vmem>>) attributes {dimension_semantics = [#tpu.dimension_semantics<parallel>], iteration_bounds = array<i64: 2>, scalar_prefetch = 0 : i64, scratch_operands = 1 : i64, tpu.core_type = #tpu.core_type<tc>, window_params = [{transform_indices = @transform_0, window_bounds = array<i64: 16, 256>}, {pipeline_mode = #tpu.pipeline_mode<synchronous>, transform_indices = @transform_1, window_bounds = array<i64: 16, 1>}, {pipeline_mode = #tpu.pipeline_mode<synchronous>, transform_indices = @transform_2, window_bounds = array<i64: 16, 1>}, {pipeline_mode = #tpu.pipeline_mode<synchronous>, transform_indices = @transform_3, window_bounds = array<i64: 9, 4, 16>}, {transform_indices = @transform_4, window_bounds = array<i64: 4, 256>}, {transform_indices = @transform_5, window_bounds = array<i64: 1, 1, 4>}, {transform_indices = @transform_6, window_bounds = array<i64: 1, 1, 4>}]} {
    %c0 = arith.constant 0 : index
    %c0_0 = arith.constant 0 : index
    %0 = vector.load %arg1[%c0, %c0_0] : memref<16x256xf32, #tpu.memory_space<vmem>>, vector<16x256xf32>
    %c0_1 = arith.constant 0 : index
    %c0_2 = arith.constant 0 : index
    %1 = vector.load %arg2[%c0_1, %c0_2] : memref<16x1xf32, #tpu.memory_space<vmem>>, vector<16x1xf32>
    %2 = vector.broadcast %1 : vector<16x1xf32> to vector<16x256xf32>
    %3 = arith.mulf %0, %2 : vector<16x256xf32>
    %c0_3 = arith.constant 0 : index
    %c0_4 = arith.constant 0 : index
    %4 = vector.load %arg3[%c0_3, %c0_4] : memref<16x1xf32, #tpu.memory_space<vmem>>, vector<16x1xf32>
    %5 = vector.broadcast %4 : vector<16x1xf32> to vector<16x256xf32>
    %6 = arith.addf %3, %5 : vector<16x256xf32>
    %cst = arith.constant 0.000000e+00 : f32
    %7 = vector.broadcast %cst : f32 to vector<16x256xf32>
    %8 = arith.maximumf %6, %7 : vector<16x256xf32>
    %cst_5 = arith.constant 0.000000e+00 : f32
    %9 = vector.broadcast %cst_5 : f32 to vector<16x17xf32>
    %c0_6 = arith.constant 0 : index
    %c0_7 = arith.constant 0 : index
    %10 = vector.load %arg8[%c0_6, %c0_7] : memref<16x290xf32, #tpu.memory_space<vmem>>, vector<16x17xf32>
    tpu.vector_store %arg8[%c0_6, %c0_7], %9 {strides = array<i32>} : memref<16x290xf32, #tpu.memory_space<vmem>>, vector<16x17xf32>,
    %c0_8 = arith.constant 0 : index
    %c273 = arith.constant 273 : index
    %11 = vector.load %arg8[%c0_8, %c273] : memref<16x290xf32, #tpu.memory_space<vmem>>, vector<16x17xf32>
    tpu.vector_store %arg8[%c0_8, %c273], %9 {strides = array<i32>} : memref<16x290xf32, #tpu.memory_space<vmem>>, vector<16x17xf32>,
    %c0_9 = arith.constant 0 : index
    %c17 = arith.constant 17 : index
    %12 = vector.load %arg8[%c0_9, %c17] : memref<16x290xf32, #tpu.memory_space<vmem>>, vector<16x256xf32>
    tpu.vector_store %arg8[%c0_9, %c17], %8 {strides = array<i32>} : memref<16x290xf32, #tpu.memory_space<vmem>>, vector<16x256xf32>,
    %13 = tpu.iota {dimensions = array<i32: 1>} : vector<1x256xi32>
    %c16_i32 = arith.constant 16 : i32
    %c0_i32 = arith.constant 0 : i32
    %14 = arith.cmpi eq, %c16_i32, %c0_i32 : i32
    %c1_i32 = arith.constant 1 : i32
    %15 = arith.select %14, %c1_i32, %c16_i32 : i32
    %16 = vector.broadcast %15 : i32 to vector<1x256xi32>
    %17 = arith.remsi %13, %16 : vector<1x256xi32>
    %c0_i32_10 = arith.constant 0 : i32
    %18 = vector.broadcast %c0_i32_10 : i32 to vector<1x256xi32>
    %19 = arith.cmpi ne, %17, %18 : vector<1x256xi32>
    %c0_i32_11 = arith.constant 0 : i32
    %20 = vector.broadcast %c0_i32_11 : i32 to vector<1x256xi32>
    %21 = arith.cmpi slt, %17, %20 : vector<1x256xi32>
    %c0_i32_12 = arith.constant 0 : i32
    %22 = arith.cmpi slt, %15, %c0_i32_12 : i32
    %23 = vector.broadcast %22 : i1 to vector<1x256xi1>
    %24 = vector.broadcast %23 : vector<1x256xi1> to vector<1x256xi1>
    %25 = arith.xori %21, %24 : vector<1x256xi1>
    %26 = arith.andi %25, %19 : vector<1x256xi1>
    %27 = vector.broadcast %15 : i32 to vector<1x256xi32>
    %28 = arith.addi %17, %27 : vector<1x256xi32>
    %29 = arith.select %26, %28, %17 : vector<1x256xi1>, vector<1x256xi32>
    %cst_13 = arith.constant 0.000000e+00 : f32
    %30 = vector.broadcast %cst_13 : f32 to vector<4x256xf32>
    %c0_14 = arith.constant 0 : index
    %c0_15 = arith.constant 0 : index
    %31 = vector.load %arg8[%c0_14, %c0_15] : memref<16x290xf32, #tpu.memory_space<vmem>>, vector<16x256xf32>
    %c0_16 = arith.constant 0 : index
    %c0_17 = arith.constant 0 : index
    %c0_18 = arith.constant 0 : index
    %32 = vector.load %arg4[%c0_16, %c0_17, %c0_18] : memref<9x4x16xf32, #tpu.memory_space<vmem>>, vector<1x4x16xf32>
    %33 = vector.shape_cast %32 : vector<1x4x16xf32> to vector<4x16xf32>
    %cst_19 = arith.constant dense<0.000000e+00> : vector<4x256xf32>
    %34 = tpu.matmul %33, %31, %cst_19 {dimension_numbers = #tpu.dot_dimension_numbers<[1], [0], [0], [1], [0, 0, 1, 1], [], []>} : vector<4x16xf32>, vector<16x256xf32>, vector<4x256xf32> -> vector<4x256xf32>
    %c1_i32_20 = arith.constant 1 : i32
    %35 = vector.broadcast %c1_i32_20 : i32 to vector<1x256xi32>
    %36 = arith.cmpi sge, %29, %35 : vector<1x256xi32>
    %cst_21 = arith.constant 0.000000e+00 : f32
    %37 = vector.shape_cast %36 : vector<1x256xi1> to vector<1x256xi1>
    %38 = vector.broadcast %37 : vector<1x256xi1> to vector<4x256xi1>
    %39 = vector.broadcast %cst_21 : f32 to vector<4x256xf32>
    %40 = arith.select %38, %34, %39 : vector<4x256xi1>, vector<4x256xf32>
    %41 = arith.addf %30, %40 : vector<4x256xf32>
    %c0_22 = arith.constant 0 : index
    %c1 = arith.constant 1 : index
    %42 = vector.load %arg8[%c0_22, %c1] : memref<16x290xf32, #tpu.memory_space<vmem>>, vector<16x256xf32>
    %c1_23 = arith.constant 1 : index
    %c0_24 = arith.constant 0 : index
    %c0_25 = arith.constant 0 : index
    %43 = vector.load %arg4[%c1_23, %c0_24, %c0_25] : memref<9x4x16xf32, #tpu.memory_space<vmem>>, vector<1x4x16xf32>
    %44 = vector.shape_cast %43 : vector<1x4x16xf32> to vector<4x16xf32>
    %cst_26 = arith.constant dense<0.000000e+00> : vector<4x256xf32>
    %45 = tpu.matmul %44, %42, %cst_26 {dimension_numbers = #tpu.dot_dimension_numbers<[1], [0], [0], [1], [0, 0, 1, 1], [], []>} : vector<4x16xf32>, vector<16x256xf32>, vector<4x256xf32> -> vector<4x256xf32>
    %46 = arith.addf %41, %45 : vector<4x256xf32>
    %c0_27 = arith.constant 0 : index
    %c2 = arith.constant 2 : index
    %47 = vector.load %arg8[%c0_27, %c2] : memref<16x290xf32, #tpu.memory_space<vmem>>, vector<16x256xf32>
    %c2_28 = arith.constant 2 : index
    %c0_29 = arith.constant 0 : index
    %c0_30 = arith.constant 0 : index
    %48 = vector.load %arg4[%c2_28, %c0_29, %c0_30] : memref<9x4x16xf32, #tpu.memory_space<vmem>>, vector<1x4x16xf32>
    %49 = vector.shape_cast %48 : vector<1x4x16xf32> to vector<4x16xf32>
    %cst_31 = arith.constant dense<0.000000e+00> : vector<4x256xf32>
    %50 = tpu.matmul %49, %47, %cst_31 {dimension_numbers = #tpu.dot_dimension_numbers<[1], [0], [0], [1], [0, 0, 1, 1], [], []>} : vector<4x16xf32>, vector<16x256xf32>, vector<4x256xf32> -> vector<4x256xf32>
    %c14_i32 = arith.constant 14 : i32
    %51 = vector.broadcast %c14_i32 : i32 to vector<1x256xi32>
    %52 = arith.cmpi sle, %29, %51 : vector<1x256xi32>
    %cst_32 = arith.constant 0.000000e+00 : f32
    %53 = vector.shape_cast %52 : vector<1x256xi1> to vector<1x256xi1>
    %54 = vector.broadcast %53 : vector<1x256xi1> to vector<4x256xi1>
    %55 = vector.broadcast %cst_32 : f32 to vector<4x256xf32>
    %56 = arith.select %54, %50, %55 : vector<4x256xi1>, vector<4x256xf32>
    %57 = arith.addf %46, %56 : vector<4x256xf32>
    %c0_33 = arith.constant 0 : index
    %c16 = arith.constant 16 : index
    %58 = vector.load %arg8[%c0_33, %c16] : memref<16x290xf32, #tpu.memory_space<vmem>>, vector<16x256xf32>
    %c3 = arith.constant 3 : index
    %c0_34 = arith.constant 0 : index
    %c0_35 = arith.constant 0 : index
    %59 = vector.load %arg4[%c3, %c0_34, %c0_35] : memref<9x4x16xf32, #tpu.memory_space<vmem>>, vector<1x4x16xf32>
    %60 = vector.shape_cast %59 : vector<1x4x16xf32> to vector<4x16xf32>
    %cst_36 = arith.constant dense<0.000000e+00> : vector<4x256xf32>
    %61 = tpu.matmul %60, %58, %cst_36 {dimension_numbers = #tpu.dot_dimension_numbers<[1], [0], [0], [1], [0, 0, 1, 1], [], []>} : vector<4x16xf32>, vector<16x256xf32>, vector<4x256xf32> -> vector<4x256xf32>
    %c1_i32_37 = arith.constant 1 : i32
    %62 = vector.broadcast %c1_i32_37 : i32 to vector<1x256xi32>
    %63 = arith.cmpi sge, %29, %62 : vector<1x256xi32>
    %cst_38 = arith.constant 0.000000e+00 : f32
    %64 = vector.shape_cast %63 : vector<1x256xi1> to vector<1x256xi1>
    %65 = vector.broadcast %64 : vector<1x256xi1> to vector<4x256xi1>
    %66 = vector.broadcast %cst_38 : f32 to vector<4x256xf32>
    %67 = arith.select %65, %61, %66 : vector<4x256xi1>, vector<4x256xf32>
    %68 = arith.addf %57, %67 : vector<4x256xf32>
    %c0_39 = arith.constant 0 : index
    %c17_40 = arith.constant 17 : index
    %69 = vector.load %arg8[%c0_39, %c17_40] : memref<16x290xf32, #tpu.memory_space<vmem>>, vector<16x256xf32>
    %c4 = arith.constant 4 : index
    %c0_41 = arith.constant 0 : index
    %c0_42 = arith.constant 0 : index
    %70 = vector.load %arg4[%c4, %c0_41, %c0_42] : memref<9x4x16xf32, #tpu.memory_space<vmem>>, vector<1x4x16xf32>
    %71 = vector.shape_cast %70 : vector<1x4x16xf32> to vector<4x16xf32>
    %cst_43 = arith.constant dense<0.000000e+00> : vector<4x256xf32>
    %72 = tpu.matmul %71, %69, %cst_43 {dimension_numbers = #tpu.dot_dimension_numbers<[1], [0], [0], [1], [0, 0, 1, 1], [], []>} : vector<4x16xf32>, vector<16x256xf32>, vector<4x256xf32> -> vector<4x256xf32>
    %73 = arith.addf %68, %72 : vector<4x256xf32>
    %c0_44 = arith.constant 0 : index
    %c18 = arith.constant 18 : index
    %74 = vector.load %arg8[%c0_44, %c18] : memref<16x290xf32, #tpu.memory_space<vmem>>, vector<16x256xf32>
    %c5 = arith.constant 5 : index
    %c0_45 = arith.constant 0 : index
    %c0_46 = arith.constant 0 : index
    %75 = vector.load %arg4[%c5, %c0_45, %c0_46] : memref<9x4x16xf32, #tpu.memory_space<vmem>>, vector<1x4x16xf32>
    %76 = vector.shape_cast %75 : vector<1x4x16xf32> to vector<4x16xf32>
    %cst_47 = arith.constant dense<0.000000e+00> : vector<4x256xf32>
    %77 = tpu.matmul %76, %74, %cst_47 {dimension_numbers = #tpu.dot_dimension_numbers<[1], [0], [0], [1], [0, 0, 1, 1], [], []>} : vector<4x16xf32>, vector<16x256xf32>, vector<4x256xf32> -> vector<4x256xf32>
    %c14_i32_48 = arith.constant 14 : i32
    %78 = vector.broadcast %c14_i32_48 : i32 to vector<1x256xi32>
    %79 = arith.cmpi sle, %29, %78 : vector<1x256xi32>
    %cst_49 = arith.constant 0.000000e+00 : f32
    %80 = vector.shape_cast %79 : vector<1x256xi1> to vector<1x256xi1>
    %81 = vector.broadcast %80 : vector<1x256xi1> to vector<4x256xi1>
    %82 = vector.broadcast %cst_49 : f32 to vector<4x256xf32>
    %83 = arith.select %81, %77, %82 : vector<4x256xi1>, vector<4x256xf32>
    %84 = arith.addf %73, %83 : vector<4x256xf32>
    %c0_50 = arith.constant 0 : index
    %c32 = arith.constant 32 : index
    %85 = vector.load %arg8[%c0_50, %c32] : memref<16x290xf32, #tpu.memory_space<vmem>>, vector<16x256xf32>
    %c6 = arith.constant 6 : index
    %c0_51 = arith.constant 0 : index
    %c0_52 = arith.constant 0 : index
    %86 = vector.load %arg4[%c6, %c0_51, %c0_52] : memref<9x4x16xf32, #tpu.memory_space<vmem>>, vector<1x4x16xf32>
    %87 = vector.shape_cast %86 : vector<1x4x16xf32> to vector<4x16xf32>
    %cst_53 = arith.constant dense<0.000000e+00> : vector<4x256xf32>
    %88 = tpu.matmul %87, %85, %cst_53 {dimension_numbers = #tpu.dot_dimension_numbers<[1], [0], [0], [1], [0, 0, 1, 1], [], []>} : vector<4x16xf32>, vector<16x256xf32>, vector<4x256xf32> -> vector<4x256xf32>
    %c1_i32_54 = arith.constant 1 : i32
    %89 = vector.broadcast %c1_i32_54 : i32 to vector<1x256xi32>
    %90 = arith.cmpi sge, %29, %89 : vector<1x256xi32>
    %cst_55 = arith.constant 0.000000e+00 : f32
    %91 = vector.shape_cast %90 : vector<1x256xi1> to vector<1x256xi1>
    %92 = vector.broadcast %91 : vector<1x256xi1> to vector<4x256xi1>
    %93 = vector.broadcast %cst_55 : f32 to vector<4x256xf32>
    %94 = arith.select %92, %88, %93 : vector<4x256xi1>, vector<4x256xf32>
    %95 = arith.addf %84, %94 : vector<4x256xf32>
    %c0_56 = arith.constant 0 : index
    %c33 = arith.constant 33 : index
    %96 = vector.load %arg8[%c0_56, %c33] : memref<16x290xf32, #tpu.memory_space<vmem>>, vector<16x256xf32>
    %c7 = arith.constant 7 : index
    %c0_57 = arith.constant 0 : index
    %c0_58 = arith.constant 0 : index
    %97 = vector.load %arg4[%c7, %c0_57, %c0_58] : memref<9x4x16xf32, #tpu.memory_space<vmem>>, vector<1x4x16xf32>
    %98 = vector.shape_cast %97 : vector<1x4x16xf32> to vector<4x16xf32>
    %cst_59 = arith.constant dense<0.000000e+00> : vector<4x256xf32>
    %99 = tpu.matmul %98, %96, %cst_59 {dimension_numbers = #tpu.dot_dimension_numbers<[1], [0], [0], [1], [0, 0, 1, 1], [], []>} : vector<4x16xf32>, vector<16x256xf32>, vector<4x256xf32> -> vector<4x256xf32>
    %100 = arith.addf %95, %99 : vector<4x256xf32>
    %c0_60 = arith.constant 0 : index
    %c34 = arith.constant 34 : index
    %101 = vector.load %arg8[%c0_60, %c34] : memref<16x290xf32, #tpu.memory_space<vmem>>, vector<16x256xf32>
    %c8 = arith.constant 8 : index
    %c0_61 = arith.constant 0 : index
    %c0_62 = arith.constant 0 : index
    %102 = vector.load %arg4[%c8, %c0_61, %c0_62] : memref<9x4x16xf32, #tpu.memory_space<vmem>>, vector<1x4x16xf32>
    %103 = vector.shape_cast %102 : vector<1x4x16xf32> to vector<4x16xf32>
    %cst_63 = arith.constant dense<0.000000e+00> : vector<4x256xf32>
    %104 = tpu.matmul %103, %101, %cst_63 {dimension_numbers = #tpu.dot_dimension_numbers<[1], [0], [0], [1], [0, 0, 1, 1], [], []>} : vector<4x16xf32>, vector<16x256xf32>, vector<4x256xf32> -> vector<4x256xf32>
    %c14_i32_64 = arith.constant 14 : i32
    %105 = vector.broadcast %c14_i32_64 : i32 to vector<1x256xi32>
    %106 = arith.cmpi sle, %29, %105 : vector<1x256xi32>
    %cst_65 = arith.constant 0.000000e+00 : f32
    %107 = vector.shape_cast %106 : vector<1x256xi1> to vector<1x256xi1>
    %108 = vector.broadcast %107 : vector<1x256xi1> to vector<4x256xi1>
    %109 = vector.broadcast %cst_65 : f32 to vector<4x256xf32>
    %110 = arith.select %108, %104, %109 : vector<4x256xi1>, vector<4x256xf32>
    %111 = arith.addf %100, %110 : vector<4x256xf32>
    %c0_66 = arith.constant 0 : index
    %c0_67 = arith.constant 0 : index
    %112 = vector.load %arg5[%c0_66, %c0_67] : memref<4x256xf32, #tpu.memory_space<vmem>>, vector<4x256xf32>
    tpu.vector_store %arg5[%c0_66, %c0_67], %111 {strides = array<i32>} : memref<4x256xf32, #tpu.memory_space<vmem>>, vector<4x256xf32>,
    %cst_68 = arith.constant dense<0.000000e+00> : vector<4xf32>
    %113 = vector.multi_reduction <add>, %111, %cst_68 [1] : vector<4x256xf32> to vector<4xf32>
    %114 = vector.shape_cast %113 : vector<4xf32> to vector<1x1x4xf32>
    %c0_69 = arith.constant 0 : index
    %c0_70 = arith.constant 0 : index
    %c0_71 = arith.constant 0 : index
    %115 = vector.load %arg6[%c0_69, %c0_70, %c0_71] : memref<1x1x4xf32, #tpu.memory_space<vmem>>, vector<1x1x4xf32>
    tpu.vector_store %arg6[%c0_69, %c0_70, %c0_71], %114 {strides = array<i32>} : memref<1x1x4xf32, #tpu.memory_space<vmem>>, vector<1x1x4xf32>,
    %116 = arith.mulf %111, %111 : vector<4x256xf32>
    %cst_72 = arith.constant dense<0.000000e+00> : vector<4xf32>
    %117 = vector.multi_reduction <add>, %116, %cst_72 [1] : vector<4x256xf32> to vector<4xf32>
    %118 = vector.shape_cast %117 : vector<4xf32> to vector<1x1x4xf32>
    %c0_73 = arith.constant 0 : index
    %c0_74 = arith.constant 0 : index
    %c0_75 = arith.constant 0 : index
    %119 = vector.load %arg7[%c0_73, %c0_74, %c0_75] : memref<1x1x4xf32, #tpu.memory_space<vmem>>, vector<1x1x4xf32>
    tpu.vector_store %arg7[%c0_73, %c0_74, %c0_75], %118 {strides = array<i32>} : memref<1x1x4xf32, #tpu.memory_space<vmem>>, vector<1x1x4xf32>,
    return
  }
  func.func @transform_0(%arg0: i32) -> (i32, i32) {
    %c0_i32 = arith.constant 0 : i32
    %c0_i32_0 = arith.constant 0 : i32
    return %c0_i32, %arg0 : i32, i32
  }
  func.func @transform_1(%arg0: i32) -> (i32, i32) {
    %c0_i32 = arith.constant 0 : i32
    %c0_i32_0 = arith.constant 0 : i32
    %c0_i32_1 = arith.constant 0 : i32
    return %c0_i32, %c0_i32_0 : i32, i32
  }
  func.func @transform_2(%arg0: i32) -> (i32, i32) {
    %c0_i32 = arith.constant 0 : i32
    %c0_i32_0 = arith.constant 0 : i32
    %c0_i32_1 = arith.constant 0 : i32
    return %c0_i32, %c0_i32_0 : i32, i32
  }
  func.func @transform_3(%arg0: i32) -> (i32, i32, i32) {
    %c0_i32 = arith.constant 0 : i32
    %c0_i32_0 = arith.constant 0 : i32
    %c0_i32_1 = arith.constant 0 : i32
    %c0_i32_2 = arith.constant 0 : i32
    return %c0_i32, %c0_i32_0, %c0_i32_1 : i32, i32, i32
  }
  func.func @transform_4(%arg0: i32) -> (i32, i32) {
    %c0_i32 = arith.constant 0 : i32
    %c0_i32_0 = arith.constant 0 : i32
    return %c0_i32, %arg0 : i32, i32
  }
  func.func @transform_5(%arg0: i32) -> (i32, i32, i32) {
    %c0_i32 = arith.constant 0 : i32
    %c0_i32_0 = arith.constant 0 : i32
    %c0_i32_1 = arith.constant 0 : i32
    return %arg0, %c0_i32, %c0_i32_0 : i32, i32, i32
  }
  func.func @transform_6(%arg0: i32) -> (i32, i32, i32) {
    %c0_i32 = arith.constant 0 : i32
    %c0_i32_0 = arith.constant 0 : i32
    %c0_i32_1 = arith.constant 0 : i32
    return %arg0, %c0_i32, %c0_i32_0 : i32, i32, i32
  }
}

</mosaic_0001>

<bundles_post_ra>
// kernel: dense_block_forward.8
= control target key start
LH: loop header
LB: loop body
LE: loop exit
PB: predicated region body
PF: predicated region fallthrough
CT: control target
= control target key end

     0   :  { %s891_s13 = smov 0   ;;  %s893_s14 = smov 0   ;;  %s990_s0 = inlined_call_operand.vmem [shape: f32[4,512], index: 0, kind: input, shape index: {}]   ;;  %s991_s1 = inlined_call_operand.vmem [shape: f32[4,512], index: 1, kind: input, shape index: {}]   ;;  %s992_s2 = inlined_call_operand.vmem [shape: f32[4,1], index: 2, kind: input, shape index: {}]   ;;  %s993_s3 = inlined_call_operand.vmem [shape: f32[4,1], index: 3, kind: input, shape index: {}]   ;;  %s994_s4 = inlined_call_operand.vmem [shape: f32[4,1], index: 4, kind: input, shape index: {}]   ;;  %s995_s5 = inlined_call_operand.vmem [shape: f32[4,1], index: 5, kind: input, shape index: {}]   ;;  %s996_s6 = inlined_call_operand.vmem [shape: f32[16,4], index: 6, kind: input, shape index: {}]   ;;  %s997_s7 = inlined_call_operand.vmem [shape: f32[16,4], index: 7, kind: input, shape index: {}]   ;;  %s998_s8 = inlined_call_operand.vmem [shape: f32[16,512], index: 8, kind: output, shape index: {0}]   ;;  %s999_s9 = inlined_call_operand.vmem [shape: f32[2,1,16], index: 9, kind: output, shape index: {1}]   ;;  %s1000_s10 = inlined_call_operand.vmem [shape: f32[2,1,16], index: 10, kind: output, shape index: {2}]  }
   0x1   :  { %s895_s15 = smov 0  }
   0x2 LB: > { %s904_s16 = sadd.s32 4294967295, %s832_s15   ;;  %s906_s17 = sadd.s32 1, %s832_s15   ;;  %s832_s15 = sphi %s895_s15, %s1004_s15   ;;  %s828_s14 = sphi %s893_s14, %s1003_s14   ;;  %s824_s13 = sphi %s891_s13, %s1002_s13  }
   0x3   : > { %s203_s18 = ssub.s32 %s832_s15, %s906_s17  ;;  %s206_s19 = sadd.s32 1, %s828_s14 }
   0x4   : > { %p204_p0 = scmp.eq.s32.totalorder %s203_s18, 0  ;;  %p216_p1 = scmp.ne.s32.totalorder %s828_s14, %s824_s13 }
   0x5   : > { %p217_p2 = scmp.eq.s32.totalorder %s904_s16, 1  ;;  %p758_p3 = scmp.ge.s32.totalorder %s832_s15, 1 }
   0x6   : > { %s914_s20 = scalar_select %p204_p0, %s828_s14, %s206_s19  }
   0x7   : > { %p916_p4 = por %p217_p2, %p216_p1  ;;  %p329_p5 = scmp.lt.s32.totalorder %s832_s15, 3 }
   0x9   : > { %p330_p6 = pnand %p758_p3, %p329_p5 }
   0xa   : > { %s760_s30 = sshll.u32 (!%p330_p6), %s904_s16, 1  ;;  %s364_s12 = sand.u32 (!%p330_p6), 1, %s824_s13  }
   0xb   : > { %333 = sbr.rel (%p330_p6) target bundleno = 430 (0x1ae), region = 52  ;;  %p378_p7 = scmp.lt.s32.totalorder (!%p330_p6), %s760_s30, 3 }
   0xc   : > { %s759_s15 = sshll.u32 (!%p330_p6), %s364_s12, 5  ;;  %p390_p8 = scmp.lt.s32.totalorder (!%p330_p6), %s904_s16, 1 }
  0x10   : > { %v423_v0 = vld [vmem:[%s993_s3] sm:$0xf]  ;;  %v834_v2 = vmov 0   ;;  %s1006_s30 = smov (!%p378_p7, %s760_s30), 3  ;;  %v835_v5 = vmov 839922192   ;;  %v582_v52 = vlaneseq }
  0x11   : > { %v397_v1 = vld [vmem:[%s992_s2] sm:$0xf]  ;;  %809 = vset.pattern.permute.xlu1 %v834_v2  ;;  %808 = vset.pattern.permute.xlu0 %v834_v2  ;;  %v403_v6 = vunpack.c.l.s4 %v835_v5  ;;  %s761_s11 = sshll.u32 %s1006_s30, 2  ;;  %vm459_vm0 = vcmask 1043456   ;;  %vm452_vm1 = vcmask 31744   ;;  %v447_v28 = vld [vmem:[%s997_s7 + $0x8] sm:$0xff] }
  0x12   : > { %426 = vperm.xlu0 %808, %v423_v0   ;;  %400 = vperm.xlu1 %809, %v397_v1   ;;  %v434_v3 = vld [vmem:[%s995_s5] sm:$0xf]  ;;  %s387_s18 = scalar_lea.vmem %s991_s1, %s761_s11  ;;  %s381_s23 = scalar_lea.vmem %s990_s0, %s761_s11  ;;  %v421_v31 = vld [vmem:[%s996_s6 + $0x8] sm:$0xff]  ;;  %v583_v54 = vand.u32 127, %v582_v52  ;;  %vm587_vm2 = vcmask 130112   ;;  %vm590_vm3 = vcmask 122880  }
  0x13   : > { %v408_v4 = vld [vmem:[%s994_s4] sm:$0xf]  ;;  %v404_v9 = vunpack.c.0.s8 %v403_v6  ;;  %s391_s13 = scalar_select %p390_p8, %s904_s16, 1 }
  0x14   : > { %v422_v11 = vld [vmem:[%s387_s18] sm:$0xff]  ;;  %s956_s18 = scalar_lea.vmem [#allocation2], %s759_s15  ;;  %v585_v55 = vadd.s32 4294967288, %v583_v54  ;;  %s781_s27 = sshll.u32 (%p916_p4), %s904_s16, 4 }
  0x15   : > { %v396_v16 = vld [vmem:[%s381_s23] sm:$0xff]  ;;  %s392_s23 = scalar_lea.vmem %s999_s9, %s391_s13  ;;  %s395_s26 = scalar_lea.vmem %s1000_s10, %s391_s13 }
  0x16   : > { %v446_v24 = vld [vmem:[%s997_s7] sm:$0xff]  ;;  %s624_s30 = scalar_lea.vmem (%p916_p4), %s998_s8, %s781_s27 }
  0x17   : > { %v420_v27 = vld [vmem:[%s996_s6] sm:$0xff] }
  0x1a   : > { %437 = vperm.xlu0 %808, %v434_v3   ;;  %411 = vperm.xlu1 %809, %v408_v4  }
  0x84   : > { %v427_v7 = vpop.permute.xlu0 %426  ;;  %v401_v8 = vpop.permute.xlu1 %400 }
  0x85   : > { %v431_v10 = vperm.slane %v427_v7, %v404_v9  ;;  %v405_v14 = vperm.slane %v401_v8, %v404_v9 }
  0x87   : > { %v433_v13 = vmul.f32 %v431_v10, %v422_v11  ;;  %v407_v19 = vmul.f32 %v405_v14, %v396_v16 }
  0x8c   : > { %v438_v12 = vpop.permute.xlu0 %437  ;;  %v412_v17 = vpop.permute.xlu1 %411 }
  0x8d   : > { %v442_v15 = vperm.slane %v438_v12, %v404_v9  ;;  %v416_v21 = vperm.slane %v412_v17, %v404_v9 }
  0x8f   : > { %v444_v18 = vadd.f32 %v442_v15, %v433_v13  ;;  %v418_v22 = vadd.f32 %v416_v21, %v407_v19 }
  0x91   : > { %v445_v20 = vmax.f32 %v444_v18, 0.0  ;;  %v419_v23 = vmax.f32 %v418_v22, 0.0 }
  0x93   : > { %449 = vst [vmem:[#allocation1] ss:$2 sm:$0xff] %v445_v20 }
  0x9a   : > { %v450_v25 = vld.sshfl [vmem:[#allocation1] sm:$0xff pattern:$0x75316420]  ;;  %v451_v26 = vld.sshfl [vmem:[#allocation1 + $0x8] sm:$0xff pattern:$0x75316420] }
  0x9b   : > { %764 = vmatpush.msk.msra.mxu0 %vm459_vm0, %v450_v25  ;;  %767 = vmatpush.msk.msra.mxu1 %vm459_vm0, %v451_v26  ;;  %511 = vst [vmem:[#allocation1] ss:$2 sm:$0xff] %v419_v23 }
  0x9c   : > { %765 = vmatmul.msk.f32.vlgmr.msra.gmra.mxu0 %vm452_vm1, %v446_v24  ;;  %768 = vmatmul.msk.f32.vlgmr.msra.gmra.mxu1 %vm452_vm1, %v446_v24 }
  0xa2   : > { %v512_v29 = vld.sshfl [vmem:[#allocation1] sm:$0xff pattern:$0x75316420]  ;;  %v513_v30 = vld.sshfl [vmem:[#allocation1 + $0x8] sm:$0xff pattern:$0x75316420] }
  0xa3   : > { %770 = vmatpush.msk.msra.mxu2 %vm459_vm0, %v512_v29  ;;  %773 = vmatpush.msk.msra.mxu3 %vm459_vm0, %v513_v30 }
  0xa4   : > { %771 = vmatmul.msk.f32.vlgmr.msra.gmra.mxu2 %vm452_vm1, %v420_v27  ;;  %774 = vmatmul.msk.f32.vlgmr.msra.gmra.mxu3 %vm452_vm1, %v420_v27 }
  0xa5   : > { %766 = vmatmul.msk.f32.gmra.mxu0 %vm452_vm1, %v447_v28  ;;  %769 = vmatmul.msk.f32.gmra.mxu1 %vm452_vm1, %v447_v28 }
  0xac   : > { %772 = vmatmul.msk.f32.gmra.mxu2 %vm452_vm1, %v421_v31  ;;  %775 = vmatmul.msk.f32.gmra.mxu3 %vm452_vm1, %v421_v31 }
 0x119   : > { %v481_v32 = vpop.f32.mrf.mxu0  ;;  %v504_v33 = vpop.f32.mrf.mxu1 }
 0x122   : > { %v484_v42 = vpop.f32.mrf.mxu0  ;;  %v507_v43 = vpop.f32.mrf.mxu1 }
 0x127   : > { %v541_v34 = vpop.f32.mrf.mxu2  ;;  %v564_v35 = vpop.f32.mrf.mxu3 }
 0x128   : > { %v542_v36 = vadd.f32 %v541_v34, %v481_v32  ;;  %v565_v37 = vadd.f32 %v564_v35, %v504_v33 }
 0x12a   : > { %570 = vst [vmem:[%s956_s18] sm:$0xff] %v542_v36  ;;  %v574_v38 = vadd.f32 %v565_v37, %v542_v36  ;;  %v592_v39 = vmul.f32 %v542_v36, %v542_v36  ;;  %v593_v40 = vmul.f32 %v565_v37, %v565_v37 }
 0x12b   : > { %571 = vst [vmem:[%s956_s18 + $0x8] sm:$0xff] %v565_v37 }
 0x12c   : > { %575 = vadd.xlane.f32.xlu2 %v574_v38  ;;  %v596_v41 = vadd.f32 %v593_v40, %v592_v39 }
 0x12e   : > { %597 = vadd.xlane.f32.xlu0 %v596_v41 }
 0x12f   : > { %v544_v44 = vpop.f32.mrf.mxu2  ;;  %v567_v45 = vpop.f32.mrf.mxu3 }
 0x130   : > { %v545_v46 = vadd.f32 %v544_v44, %v484_v42  ;;  %v568_v47 = vadd.f32 %v567_v45, %v507_v43 }
 0x131   : > { %v637_v1 = vld [vmem:[%s956_s18] sm:$0xff] (%p916_p4) }
 0x132   : > { %572 = vst [vmem:[%s956_s18 + $0x10] sm:$0xff] %v545_v46  ;;  %v577_v48 = vadd.f32 %v568_v47, %v545_v46  ;;  %v594_v49 = vmul.f32 %v545_v46, %v545_v46  ;;  %v595_v50 = vmul.f32 %v568_v47, %v568_v47  ;;  %v639_v2 = vld [vmem:[%s956_s18 + $0x8] sm:$0xff] (%p916_p4) }
 0x133   : > { %573 = vst [vmem:[%s956_s18 + $0x18] sm:$0xff] %v568_v47 }
 0x134   : > { %578 = vadd.xlane.f32.xlu2 %v577_v48  ;;  %v599_v51 = vadd.f32 %v595_v50, %v594_v49  ;;  %638 = vst [vmem:[%s624_s30] sm:$0xff] (%p916_p4), %v637_v1 }
 0x135   : > { %640 = vst [vmem:[%s624_s30 + $0x8] sm:$0xff] (%p916_p4), %v639_v2 }
 0x136   : > { %600 = vadd.xlane.f32.xlu1 %v599_v51 }
 0x139   : > { %v641_v3 = vld [vmem:[%s956_s18 + $0x10] sm:$0xff] (%p916_p4) }
 0x13a   : > { %v643_v4 = vld [vmem:[%s956_s18 + $0x18] sm:$0xff] (%p916_p4)  ;;  %642 = vst [vmem:[%s624_s30 + $0x20] sm:$0xff] (%p916_p4), %v641_v3 }
 0x13b   : > { %644 = vst [vmem:[%s624_s30 + $0x28] sm:$0xff] (%p916_p4), %v643_v4 }
 0x19f   : > { %v576_v53 = vpop.xlane.xlu2 %575 }
 0x1a0   : > { %v584_v58 = vperm.slane %v576_v53, %v583_v54 }
 0x1a1   : > { %v598_v56 = vpop.xlane.xlu0 %597 }
 0x1a2   : > { %v604_v61 = vperm.slane %v598_v56, %v583_v54 }
 0x1a7   : > { %v579_v57 = vpop.xlane.xlu2 %578 }
 0x1a8   : > { %v586_v59 = vperm.slane %v579_v57, %v585_v55 }
 0x1a9   : > { %v601_v60 = vpop.xlane.xlu1 %600  ;;  %621 = sbr.rel (!%p916_p4) target bundleno = 430 (0x1ae), region = 56 }
 0x1aa   : > { %v588_v62 = vsel %vm587_vm2, %v586_v59, %v584_v58  ;;  %v605_v63 = vperm.slane %v601_v60, %v585_v55 }
 0x1ab   : > { %591 = vst.msk [vmem:[%s392_s23] sm:$0x1] %vm590_vm3, %v588_v62 }
 0x1ac   : > { %v606_v0 = vsel %vm587_vm2, %v605_v63, %v604_v61 }
 0x1ad   : > { %608 = vst.msk [vmem:[%s395_s26] sm:$0x1] %vm590_vm3, %v606_v0 }
 0x1ae PF: > { %p18_p9 = scmp.ge.s32.totalorder %s906_s17, 4   ;;  %s1002_s13 = smov %s828_s14 }
 0x1af   : > { %s1003_s14 = smov %s914_s20  ;;  %s1004_s15 = smov %s906_s17 }
 0x1b0   :  { %20 = sbr.rel (!%p18_p9) target bundleno = 2 (0x2), region = 132 }

// kernel: dense_block_forward.6
= control target key start
LH: loop header
LB: loop body
LE: loop exit
PB: predicated region body
PF: predicated region fallthrough
CT: control target
= control target key end

     0   :  { %s636_s21 = smov 0   ;;  %s638_s22 = smov 0   ;;  %s716_s0 = inlined_call_operand.vmem [shape: f32[4,512], index: 0, kind: input, shape index: {}]   ;;  %s717_s1 = inlined_call_operand.vmem [shape: f32[4,1], index: 1, kind: input, shape index: {}]   ;;  %s718_s2 = inlined_call_operand.vmem [shape: f32[4,1], index: 2, kind: input, shape index: {}]   ;;  %s719_s3 = inlined_call_operand.vmem [shape: f32[16,4], index: 3, kind: input, shape index: {}]   ;;  %s720_s4 = inlined_call_operand.vmem [shape: f32[16,512], index: 4, kind: output, shape index: {0}]   ;;  %s721_s5 = inlined_call_operand.vmem [shape: f32[2,1,16], index: 5, kind: output, shape index: {1}]   ;;  %s722_s6 = inlined_call_operand.vmem [shape: f32[2,1,16], index: 6, kind: output, shape index: {2}]  }
   0x1   :  { %s640_s23 = smov 0  }
   0x2 LB: > { %s649_s24 = sadd.s32 4294967295, %s597_s23   ;;  %s651_s25 = sadd.s32 1, %s597_s23   ;;  %s597_s23 = sphi %s640_s23, %s726_s23   ;;  %s593_s22 = sphi %s638_s22, %s725_s22   ;;  %s589_s21 = sphi %s636_s21, %s724_s21  }
   0x3   : > { %s110_s26 = ssub.s32 %s597_s23, %s651_s25  ;;  %s113_s27 = sadd.s32 1, %s593_s22 }
   0x4   : > { %p111_p0 = scmp.eq.s32.totalorder %s110_s26, 0  ;;  %p123_p1 = scmp.ne.s32.totalorder %s593_s22, %s589_s21 }
   0x5   : > { %p124_p2 = scmp.eq.s32.totalorder %s649_s24, 1  ;;  %p530_p3 = scmp.ge.s32.totalorder %s597_s23, 1 }
   0x6   : > { %s659_s28 = scalar_select %p111_p0, %s593_s22, %s113_s27  }
   0x7   : > { %p661_p4 = por %p124_p2, %p123_p1  ;;  %p218_p5 = scmp.lt.s32.totalorder %s597_s23, 3 }
   0x9   : > { %p219_p6 = pnand %p530_p3, %p218_p5 }
   0xa   : > { %s532_s10 = sshll.u32 (!%p219_p6), %s649_s24, 1  ;;  %s240_s19 = sand.u32 (!%p219_p6), 1, %s589_s21  }
   0xb   : > { %222 = sbr.rel (%p219_p6) target bundleno = 415 (0x19f), region = 36  ;;  %p254_p7 = scmp.lt.s32.totalorder (!%p219_p6), %s532_s10, 3 }
   0xc   : > { %s531_s20 = sshll.u32 (!%p219_p6), %s240_s19, 5  ;;  %p260_p8 = scmp.lt.s32.totalorder (!%p219_p6), %s649_s24, 1 }
   0xd   : > { %s682_s23 = scalar_lea.vmem (!%p219_p6), [#allocation2], %s531_s20 }
  0x10   : > { %v267_v0 = vld [vmem:[%s717_s1] sm:$0xf]  ;;  %v599_v1 = vmov 0   ;;  %s728_s10 = smov (!%p254_p7, %s532_s10), 3  ;;  %v600_v3 = vmov 839922192   ;;  %v366_v30 = vlaneseq }
  0x11   : > { %574 = vset.pattern.permute.xlu0 %v599_v1  ;;  %v278_v2 = vld [vmem:[%s718_s2] sm:$0xf]  ;;  %v273_v4 = vunpack.c.l.s4 %v600_v3  ;;  %s533_s11 = sshll.u32 %s728_s10, 2  ;;  %vm303_vm0 = vcmask 1043456   ;;  %vm296_vm1 = vcmask 31744   ;;  %v291_v17 = vld [vmem:[%s719_s3 + $0x8] sm:$0xff] }
  0x12   : > { %270 = vperm.xlu0 %574, %v267_v0   ;;  %s257_s14 = scalar_lea.vmem %s716_s0, %s533_s11  ;;  %v290_v14 = vld [vmem:[%s719_s3] sm:$0xff]  ;;  %v367_v33 = vand.u32 127, %v366_v30  ;;  %vm371_vm2 = vcmask 130112   ;;  %vm374_vm3 = vcmask 122880   ;;  %s545_s10 = sshll.u32 (%p661_p4), %s649_s24, 4 }
  0x13   : > { %v274_v6 = vunpack.c.0.s8 %v273_v4  ;;  %v266_v8 = vld [vmem:[%s257_s14] sm:$0xff]  ;;  %s261_s21 = scalar_select %p260_p8, %s649_s24, 1 }
  0x14   : > { %v369_v34 = vadd.s32 4294967288, %v367_v33  ;;  %s408_s13 = scalar_lea.vmem (%p661_p4), %s720_s4, %s545_s10 }
  0x15   : > { %s262_s30 = scalar_lea.vmem %s721_s5, %s261_s21  ;;  %s265_s9 = scalar_lea.vmem %s722_s6, %s261_s21 }
  0x1a   : > { %281 = vperm.xlu0 %574, %v278_v2  }
  0x84   : > { %v271_v5 = vpop.permute.xlu0 %270 }
  0x85   : > { %v275_v7 = vperm.slane %v271_v5, %v274_v6 }
  0x87   : > { %v277_v10 = vmul.f32 %v275_v7, %v266_v8 }
  0x8c   : > { %v282_v9 = vpop.permute.xlu0 %281 }
  0x8d   : > { %v286_v11 = vperm.slane %v282_v9, %v274_v6 }
  0x8f   : > { %v288_v12 = vadd.f32 %v286_v11, %v277_v10 }
  0x91   : > { %v289_v13 = vmax.f32 %v288_v12, 0.0 }
  0x93   : > { %293 = vst [vmem:[#allocation1] ss:$2 sm:$0xff] %v289_v13 }
  0x9a   : > { %v294_v15 = vld.sshfl [vmem:[#allocation1] sm:$0xff pattern:$0x75316420]  ;;  %v295_v16 = vld.sshfl [vmem:[#allocation1 + $0x8] sm:$0xff pattern:$0x75316420] }
  0x9b   : > { %534 = vmatpush.msk.msra.mxu0 %vm303_vm0, %v294_v15  ;;  %546 = vmatpush.msk.msra.mxu2 %vm303_vm0, %v294_v15 }
  0x9c   : > { %537 = vmatpush.msk.msra.mxu1 %vm303_vm0, %v295_v16  ;;  %547 = vmatpush.msk.msra.mxu3 %vm303_vm0, %v295_v16 }
  0x9d   : > { %535 = vmatmul.msk.f32.vlgmr.msra.gmra.mxu0 %vm296_vm1, %v290_v14  ;;  %538 = vmatmul.msk.f32.vlgmr.msra.gmra.mxu1 %vm296_vm1, %v290_v14 }
  0x9e   : > { %536 = vmatmul.msk.f32.vlgmr.msra.gmra.mxu2 %vm296_vm1, %v291_v17  ;;  %539 = vmatmul.msk.f32.vlgmr.msra.gmra.mxu3 %vm296_vm1, %v291_v17 }
 0x11a   : > { %v325_v18 = vpop.f32.mrf.mxu0  ;;  %v348_v19 = vpop.f32.mrf.mxu1 }
 0x11b   : > { %354 = vst [vmem:[%s682_s23] sm:$0xff] %v325_v18  ;;  %v376_v20 = vmul.f32 %v325_v18, %v325_v18  ;;  %v377_v21 = vmul.f32 %v348_v19, %v348_v19  ;;  %v358_v22 = vadd.f32 %v348_v19, %v325_v18 }
 0x11c   : > { %355 = vst [vmem:[%s682_s23 + $0x8] sm:$0xff] %v348_v19 }
 0x11d   : > { %359 = vadd.xlane.f32.xlu1 %v358_v22  ;;  %v380_v23 = vadd.f32 %v377_v21, %v376_v20 }
 0x11f   : > { %381 = vadd.xlane.f32.xlu2 %v380_v23 }
 0x121   : > { %v328_v24 = vpop.f32.mrf.mxu2  ;;  %v351_v25 = vpop.f32.mrf.mxu3 }
 0x122   : > { %356 = vst [vmem:[%s682_s23 + $0x10] sm:$0xff] %v328_v24  ;;  %v378_v26 = vmul.f32 %v328_v24, %v328_v24  ;;  %v379_v27 = vmul.f32 %v351_v25, %v351_v25  ;;  %v361_v28 = vadd.f32 %v351_v25, %v328_v24  ;;  %v421_v43 = vld [vmem:[%s682_s23] sm:$0xff] (%p661_p4) }
 0x123   : > { %357 = vst [vmem:[%s682_s23 + $0x18] sm:$0xff] %v351_v25  ;;  %v423_v44 = vld [vmem:[%s682_s23 + $0x8] sm:$0xff] (%p661_p4) }
 0x124   : > { %v383_v29 = vadd.f32 %v379_v27, %v378_v26  ;;  %422 = vst [vmem:[%s408_s13] sm:$0xff] (%p661_p4), %v421_v43 }
 0x125   : > { %362 = vadd.xlane.f32.xlu1 %v361_v28  ;;  %424 = vst [vmem:[%s408_s13 + $0x8] sm:$0xff] (%p661_p4), %v423_v44 }
 0x127   : > { %384 = vadd.xlane.f32.xlu2 %v383_v29 }
 0x129   : > { %v425_v45 = vld [vmem:[%s682_s23 + $0x10] sm:$0xff] (%p661_p4) }
 0x12a   : > { %v427_v46 = vld [vmem:[%s682_s23 + $0x18] sm:$0xff] (%p661_p4)  ;;  %426 = vst [vmem:[%s408_s13 + $0x20] sm:$0xff] (%p661_p4), %v425_v45 }
 0x12b   : > { %428 = vst [vmem:[%s408_s13 + $0x28] sm:$0xff] (%p661_p4), %v427_v46 }
 0x190   : > { %v360_v31 = vpop.xlane.xlu1 %359 }
 0x191   : > { %v368_v36 = vperm.slane %v360_v31, %v367_v33 }
 0x192   : > { %v382_v32 = vpop.xlane.xlu2 %381 }
 0x193   : > { %v388_v39 = vperm.slane %v382_v32, %v367_v33 }
 0x198   : > { %v363_v35 = vpop.xlane.xlu1 %362 }
 0x199   : > { %v370_v37 = vperm.slane %v363_v35, %v369_v34 }
 0x19a   : > { %v385_v38 = vpop.xlane.xlu2 %384  ;;  %405 = sbr.rel (!%p661_p4) target bundleno = 415 (0x19f), region = 40 }
 0x19b   : > { %v372_v40 = vsel %vm371_vm2, %v370_v37, %v368_v36  ;;  %v389_v41 = vperm.slane %v385_v38, %v369_v34 }
 0x19c   : > { %375 = vst.msk [vmem:[%s262_s30] sm:$0x1] %vm374_vm3, %v372_v40 }
 0x19d   : > { %v390_v42 = vsel %vm371_vm2, %v389_v41, %v388_v39 }
 0x19e   : > { %392 = vst.msk [vmem:[%s265_s9] sm:$0x1] %vm374_vm3, %v390_v42 }
 0x19f PF: > { %p14_p9 = scmp.ge.s32.totalorder %s651_s25, 4   ;;  %s724_s21 = smov %s593_s22 }
 0x1a0   : > { %s725_s22 = smov %s659_s28  ;;  %s726_s23 = smov %s651_s25 }
 0x1a1   :  { %16 = sbr.rel (!%p14_p9) target bundleno = 2 (0x2), region = 113 }

// kernel: dense_block_forward.10
= control target key start
LH: loop header
LB: loop body
LE: loop exit
PB: predicated region body
PF: predicated region fallthrough
CT: control target
= control target key end

     0   :  { %s1154_s29 = smov 0   ;;  %s1156_s30 = smov 0   ;;  %s1284_s0 = inlined_call_operand.vmem [shape: f32[4,512], index: 0, kind: input, shape index: {}]   ;;  %s1285_s1 = inlined_call_operand.vmem [shape: f32[4,512], index: 1, kind: input, shape index: {}]   ;;  %s1286_s2 = inlined_call_operand.vmem [shape: f32[4,512], index: 2, kind: input, shape index: {}]   ;;  %s1287_s3 = inlined_call_operand.vmem [shape: f32[4,1], index: 3, kind: input, shape index: {}]   ;;  %s1288_s4 = inlined_call_operand.vmem [shape: f32[4,1], index: 4, kind: input, shape index: {}]   ;;  %s1289_s5 = inlined_call_operand.vmem [shape: f32[4,1], index: 5, kind: input, shape index: {}]   ;;  %s1290_s6 = inlined_call_operand.vmem [shape: f32[4,1], index: 6, kind: input, shape index: {}]   ;;  %s1291_s7 = inlined_call_operand.vmem [shape: f32[4,1], index: 7, kind: input, shape index: {}]   ;;  %s1292_s8 = inlined_call_operand.vmem [shape: f32[4,1], index: 8, kind: input, shape index: {}]   ;;  %s1293_s9 = inlined_call_operand.vmem [shape: f32[16,4], index: 9, kind: input, shape index: {}]   ;;  %s1294_s10 = inlined_call_operand.vmem [shape: f32[16,4], index: 10, kind: input, shape index: {}]   ;;  %s1295_s11 = inlined_call_operand.vmem [shape: f32[16,4], index: 11, kind: input, shape index: {}]   ;;  %s1296_s12 = inlined_call_operand.vmem [shape: f32[16,512], index: 12, kind: output, shape index: {0}]   ;;  %s1297_s13 = inlined_call_operand.vmem [shape: f32[2,1,16], index: 13, kind: output, shape index: {1}]   ;;  %s1298_s14 = inlined_call_operand.vmem [shape: f32[2,1,16], index: 14, kind: output, shape index: {2}]  }
   0x1   :  { %s1158_s15 = smov 0  }
   0x2 LB: > { %s1167_s16 = sadd.s32 4294967295, %s1075_s15   ;;  %s1169_s17 = sadd.s32 1, %s1075_s15   ;;  %s1075_s15 = sphi %s1158_s15, %s1302_s15   ;;  %s1071_s30 = sphi %s1156_s30, %s1301_s30   ;;  %s1067_s29 = sphi %s1154_s29, %s1300_s29  }
   0x3   : > { %s296_s18 = ssub.s32 %s1075_s15, %s1169_s17  ;;  %s299_s19 = sadd.s32 1, %s1071_s30 }
   0x4   : > { %p297_p0 = scmp.eq.s32.totalorder %s296_s18, 0  ;;  %p309_p1 = scmp.ne.s32.totalorder %s1071_s30, %s1067_s29 }
   0x5   : > { %p310_p2 = scmp.eq.s32.totalorder %s1167_s16, 1  ;;  %p990_p3 = scmp.ge.s32.totalorder %s1075_s15, 1 }
   0x6   : > { %s1177_s20 = scalar_select %p297_p0, %s1071_s30, %s299_s19  }
   0x7   : > { %p1179_p4 = por %p310_p2, %p309_p1  ;;  %p440_p5 = scmp.lt.s32.totalorder %s1075_s15, 3 }
   0x9   : > { %p441_p6 = pnand %p990_p3, %p440_p5 }
   0xa   : > { %s992_s24 = sshll.u32 (!%p441_p6), %s1167_s16, 1  ;;  %p520_p8 = scmp.lt.s32.totalorder (!%p441_p6), %s1167_s16, 1 }
   0xb   : > { %444 = sbr.rel (%p441_p6) target bundleno = 433 (0x1b1), region = 68  ;;  %p502_p7 = scmp.lt.s32.totalorder (!%p441_p6), %s992_s24, 3 }
  0x10   : > { %v553_v0 = vld [vmem:[%s1288_s4] sm:$0xf]  ;;  %v1077_v2 = vmov 0   ;;  %s1304_s24 = smov (!%p502_p7, %s992_s24), 3  ;;  %v1078_v7 = vmov 839922192  }
  0x11   : > { %v527_v1 = vld [vmem:[%s1287_s3] sm:$0xf]  ;;  %1051 = vset.pattern.permute.xlu1 %v1077_v2  ;;  %1050 = vset.pattern.permute.xlu0 %v1077_v2  ;;  %v533_v8 = vunpack.c.l.s4 %v1078_v7  ;;  %s993_s25 = sshll.u32 %s1304_s24, 2  ;;  %vm589_vm0 = vcmask 1043456   ;;  %v577_v32 = vld [vmem:[%s1294_s10 + $0x8] sm:$0xff]  ;;  %vm582_vm1 = vcmask 31744  }
  0x12   : > { %v701_v3 = vld [vmem:[%s1289_s5] sm:$0xf]  ;;  %556 = vperm.xlu0 %1050, %v553_v0   ;;  %530 = vperm.xlu1 %1051, %v527_v1   ;;  %s511_s28 = scalar_lea.vmem %s1285_s1, %s993_s25  ;;  %s505_s19 = scalar_lea.vmem %s1284_s0, %s993_s25  ;;  %v551_v41 = vld [vmem:[%s1293_s9 + $0x8] sm:$0xff]  ;;  %vm807_vm2 = vcmask 130112   ;;  %vm810_vm3 = vcmask 122880  }
  0x13   : > { %1052 = vset.pattern.permute.xlu2 %v1077_v2  ;;  %v564_v4 = vld [vmem:[%s1291_s7] sm:$0xf]  ;;  %v534_v11 = vunpack.c.0.s8 %v533_v8  ;;  %s517_s24 = scalar_lea.vmem %s1286_s2, %s993_s25  ;;  %v725_v45 = vld [vmem:[%s1295_s11 + $0x8] sm:$0xff]  ;;  %s488_s25 = sand.u32 1, %s1067_s29  }
  0x14   : > { %704 = vperm.xlu2 %1052, %v701_v3   ;;  %v538_v5 = vld [vmem:[%s1290_s6] sm:$0xf]  ;;  %s521_s29 = scalar_select %p520_p8, %s1167_s16, 1 }
  0x15   : > { %v712_v6 = vld [vmem:[%s1292_s8] sm:$0xf]  ;;  %s1021_s27 = sshll.u32 (%p1179_p4), %s1167_s16, 4 }
  0x16   : > { %v552_v13 = vld [vmem:[%s511_s28] sm:$0xff]  ;;  %s991_s28 = sshll.u32 %s488_s25, 5  ;;  %s522_s22 = scalar_lea.vmem %s1297_s13, %s521_s29 }
  0x17   : > { %v526_v19 = vld [vmem:[%s505_s19] sm:$0xff]  ;;  %s1250_s15 = scalar_lea.vmem [#allocation2], %s991_s28  ;;  %s525_s26 = scalar_lea.vmem %s1298_s14, %s521_s29 }
  0x18   : > { %v700_v27 = vld [vmem:[%s517_s24] sm:$0xff]  ;;  %s844_s18 = scalar_lea.vmem (%p1179_p4), %s1296_s12, %s1021_s27 }
  0x19   : > { %v576_v35 = vld [vmem:[%s1294_s10] sm:$0xff] }
  0x1a   : > { %567 = vperm.xlu0 %1050, %v564_v4   ;;  %541 = vperm.xlu1 %1051, %v538_v5   ;;  %v550_v38 = vld [vmem:[%s1293_s9] sm:$0xff] }
  0x1b   : > { %v724_v42 = vld [vmem:[%s1295_s11] sm:$0xff] }
  0x1c   : > { %715 = vperm.xlu2 %1052, %v712_v6  }
  0x6e   : > { %v705_v14 = vpop.permute.xlu2 %704 }
  0x6f   : > { %v709_v25 = vperm.slane %v705_v14, %v534_v11 }
  0x71   : > { %v711_v29 = vmul.f32 %v709_v25, %v700_v27 }
  0x76   : > { %v716_v28 = vpop.permute.xlu2 %715 }
  0x77   : > { %v720_v31 = vperm.slane %v716_v28, %v534_v11 }
  0x79   : > { %v722_v36 = vadd.f32 %v720_v31, %v711_v29 }
  0x7b   : > { %v723_v37 = vmax.f32 %v722_v36, 0.0 }
  0x84   : > { %v557_v9 = vpop.permute.xlu0 %556  ;;  %v531_v10 = vpop.permute.xlu1 %530 }
  0x85   : > { %v561_v12 = vperm.slane %v557_v9, %v534_v11  ;;  %v535_v17 = vperm.slane %v531_v10, %v534_v11  ;;  %v802_v10 = vlaneseq }
  0x87   : > { %v563_v16 = vmul.f32 %v561_v12, %v552_v13  ;;  %v537_v22 = vmul.f32 %v535_v17, %v526_v19  ;;  %v803_v12 = vand.u32 127, %v802_v10 }
  0x89   : > { %v805_v13 = vadd.s32 4294967288, %v803_v12 }
  0x8c   : > { %v568_v15 = vpop.permute.xlu0 %567  ;;  %v542_v20 = vpop.permute.xlu1 %541 }
  0x8d   : > { %v572_v18 = vperm.slane %v568_v15, %v534_v11  ;;  %v546_v24 = vperm.slane %v542_v20, %v534_v11 }
  0x8f   : > { %v574_v21 = vadd.f32 %v572_v18, %v563_v16  ;;  %v548_v26 = vadd.f32 %v546_v24, %v537_v22 }
  0x91   : > { %v575_v23 = vmax.f32 %v574_v21, 0.0  ;;  %v549_v30 = vmax.f32 %v548_v26, 0.0 }
  0x93   : > { %579 = vst [vmem:[#allocation1] ss:$2 sm:$0xff] %v575_v23 }
  0x9a   : > { %v580_v33 = vld.sshfl [vmem:[#allocation1] sm:$0xff pattern:$0x75316420]  ;;  %v581_v34 = vld.sshfl [vmem:[#allocation1 + $0x8] sm:$0xff pattern:$0x75316420] }
  0x9b   : > { %998 = vmatpush.msk.msra.mxu0 %vm589_vm0, %v580_v33  ;;  %1022 = vmatpush.msk.msra.mxu2 %vm589_vm0, %v580_v33  ;;  %641 = vst [vmem:[#allocation1] ss:$2 sm:$0xff] %v549_v30 }
  0x9c   : > { %1001 = vmatpush.msk.msra.mxu1 %vm589_vm0, %v581_v34  ;;  %1023 = vmatpush.msk.msra.mxu3 %vm589_vm0, %v581_v34 }
  0x9d   : > { %1000 = vmatmul.msk.f32.vlgmr.msra.gmra.mxu2 %vm582_vm1, %v577_v32  ;;  %1003 = vmatmul.msk.f32.vlgmr.msra.gmra.mxu3 %vm582_vm1, %v577_v32 }
  0x9e   : > { %999 = vmatmul.msk.f32.vlgmr.msra.gmra.mxu0 %vm582_vm1, %v576_v35  ;;  %1002 = vmatmul.msk.f32.vlgmr.msra.gmra.mxu1 %vm582_vm1, %v576_v35 }
  0xa2   : > { %v642_v39 = vld.sshfl [vmem:[#allocation1] sm:$0xff pattern:$0x75316420]  ;;  %v643_v40 = vld.sshfl [vmem:[#allocation1 + $0x8] sm:$0xff pattern:$0x75316420] }
  0xa3   : > { %1004 = vmatpush.msk.msrb.mxu2 %vm589_vm0, %v642_v39  ;;  %1007 = vmatpush.msk.msrb.mxu3 %vm589_vm0, %v643_v40  ;;  %727 = vst [vmem:[#allocation1] ss:$2 sm:$0xff] %v723_v37 }
  0xa5   : > { %1005 = vmatmul.msk.f32.vlgmr.msrb.gmra.mxu2 %vm582_vm1, %v550_v38  ;;  %1008 = vmatmul.msk.f32.vlgmr.msrb.gmra.mxu3 %vm582_vm1, %v550_v38 }
  0xaa   : > { %v728_v43 = vld.sshfl [vmem:[#allocation1] sm:$0xff pattern:$0x75316420]  ;;  %v729_v44 = vld.sshfl [vmem:[#allocation1 + $0x8] sm:$0xff pattern:$0x75316420] }
  0xab   : > { %1010 = vmatpush.msk.msrb.mxu0 %vm589_vm0, %v728_v43  ;;  %1013 = vmatpush.msk.msrb.mxu1 %vm589_vm0, %v729_v44 }
  0xac   : > { %1011 = vmatmul.msk.f32.vlgmr.msrb.gmra.mxu0 %vm582_vm1, %v724_v42  ;;  %1014 = vmatmul.msk.f32.vlgmr.msrb.gmra.mxu1 %vm582_vm1, %v724_v42 }
  0xad   : > { %1006 = vmatmul.msk.f32.gmra.mxu2 %vm582_vm1, %v551_v41  ;;  %1009 = vmatmul.msk.f32.gmra.mxu3 %vm582_vm1, %v551_v41 }
  0xb4   : > { %1012 = vmatmul.msk.f32.gmra.mxu0 %vm582_vm1, %v725_v45  ;;  %1015 = vmatmul.msk.f32.gmra.mxu1 %vm582_vm1, %v725_v45 }
 0x11b   : > { %v611_v46 = vpop.f32.mrf.mxu0  ;;  %v634_v47 = vpop.f32.mrf.mxu1 }
 0x120   : > { %v614_v48 = vpop.f32.mrf.mxu2  ;;  %v637_v49 = vpop.f32.mrf.mxu3 }
 0x128   : > { %v671_v50 = vpop.f32.mrf.mxu2  ;;  %v694_v51 = vpop.f32.mrf.mxu3 }
 0x129   : > { %v672_v52 = vadd.f32 %v671_v50, %v611_v46  ;;  %v695_v53 = vadd.f32 %v694_v51, %v634_v47  ;;  %v757_v54 = vpop.f32.mrf.mxu0  ;;  %v780_v55 = vpop.f32.mrf.mxu1 }
 0x12b   : > { %v786_v56 = vadd.f32 %v757_v54, %v672_v52  ;;  %v787_v57 = vadd.f32 %v780_v55, %v695_v53 }
 0x12d   : > { %790 = vst [vmem:[%s1250_s15] sm:$0xff] %v786_v56  ;;  %v794_v58 = vadd.f32 %v787_v57, %v786_v56  ;;  %v812_v59 = vmul.f32 %v786_v56, %v786_v56  ;;  %v813_v60 = vmul.f32 %v787_v57, %v787_v57 }
 0x12e   : > { %791 = vst [vmem:[%s1250_s15 + $0x8] sm:$0xff] %v787_v57 }
 0x12f   : > { %795 = vadd.xlane.f32.xlu0 %v794_v58  ;;  %v816_v61 = vadd.f32 %v813_v60, %v812_v59 }
 0x130   : > { %v674_v62 = vpop.f32.mrf.mxu2  ;;  %v697_v63 = vpop.f32.mrf.mxu3 }
 0x131   : > { %v675_v0 = vadd.f32 %v674_v62, %v614_v48  ;;  %v698_v1 = vadd.f32 %v697_v63, %v637_v49  ;;  %817 = vadd.xlane.f32.xlu2 %v816_v61  ;;  %v760_v2 = vpop.f32.mrf.mxu0  ;;  %v783_v3 = vpop.f32.mrf.mxu1 }
 0x133   : > { %v788_v4 = vadd.f32 %v760_v2, %v675_v0  ;;  %v789_v5 = vadd.f32 %v783_v3, %v698_v1 }
 0x134   : > { %v857_v23 = vld [vmem:[%s1250_s15] sm:$0xff] (%p1179_p4) }
 0x135   : > { %792 = vst [vmem:[%s1250_s15 + $0x10] sm:$0xff] %v788_v4  ;;  %v797_v6 = vadd.f32 %v789_v5, %v788_v4  ;;  %v814_v7 = vmul.f32 %v788_v4, %v788_v4  ;;  %v815_v8 = vmul.f32 %v789_v5, %v789_v5  ;;  %v859_v24 = vld [vmem:[%s1250_s15 + $0x8] sm:$0xff] (%p1179_p4) }
 0x136   : > { %793 = vst [vmem:[%s1250_s15 + $0x18] sm:$0xff] %v789_v5 }
 0x137   : > { %798 = vadd.xlane.f32.xlu1 %v797_v6  ;;  %v819_v9 = vadd.f32 %v815_v8, %v814_v7  ;;  %858 = vst [vmem:[%s844_s18] sm:$0xff] (%p1179_p4), %v857_v23 }
 0x138   : > { %860 = vst [vmem:[%s844_s18 + $0x8] sm:$0xff] (%p1179_p4), %v859_v24 }
 0x139   : > { %820 = vadd.xlane.f32.xlu2 %v819_v9 }
 0x13c   : > { %v861_v25 = vld [vmem:[%s1250_s15 + $0x10] sm:$0xff] (%p1179_p4) }
 0x13d   : > { %v863_v26 = vld [vmem:[%s1250_s15 + $0x18] sm:$0xff] (%p1179_p4)  ;;  %862 = vst [vmem:[%s844_s18 + $0x20] sm:$0xff] (%p1179_p4), %v861_v25 }
 0x13e   : > { %864 = vst [vmem:[%s844_s18 + $0x28] sm:$0xff] (%p1179_p4), %v863_v26 }
 0x1a2   : > { %v796_v14 = vpop.xlane.xlu0 %795 }
 0x1a3   : > { %v804_v16 = vperm.slane %v796_v14, %v803_v12 }
 0x1a4   : > { %v818_v11 = vpop.xlane.xlu2 %817 }
 0x1a5   : > { %v824_v19 = vperm.slane %v818_v11, %v803_v12 }
 0x1aa   : > { %v799_v15 = vpop.xlane.xlu1 %798 }
 0x1ab   : > { %v806_v17 = vperm.slane %v799_v15, %v805_v13 }
 0x1ac   : > { %v821_v18 = vpop.xlane.xlu2 %820  ;;  %841 = sbr.rel (!%p1179_p4) target bundleno = 433 (0x1b1), region = 72 }
 0x1ad   : > { %v808_v20 = vsel %vm807_vm2, %v806_v17, %v804_v16  ;;  %v825_v21 = vperm.slane %v821_v18, %v805_v13 }
 0x1ae   : > { %811 = vst.msk [vmem:[%s522_s22] sm:$0x1] %vm810_vm3, %v808_v20 }
 0x1af   : > { %v826_v22 = vsel %vm807_vm2, %v825_v21, %v824_v19 }
 0x1b0   : > { %828 = vst.msk [vmem:[%s525_s26] sm:$0x1] %vm810_vm3, %v826_v22 }
 0x1b1 PF: > { %p22_p9 = scmp.ge.s32.totalorder %s1169_s17, 4   ;;  %s1300_s29 = smov %s1071_s30 }
 0x1b2   : > { %s1301_s30 = smov %s1177_s20  ;;  %s1302_s15 = smov %s1169_s17 }
 0x1b3   :  { %24 = sbr.rel (!%p22_p9) target bundleno = 2 (0x2), region = 151 }

// kernel: dense_block_forward.7
= control target key start
LH: loop header
LB: loop body
LE: loop exit
PB: predicated region body
PF: predicated region fallthrough
CT: control target
= control target key end

     0   :  { %s1435_s21 = smov 0   ;;  %s1437_s22 = smov 0   ;;  %s1649_s0 = inlined_call_operand.vmem [shape: f32[16,512], index: 0, kind: input, shape index: {}]   ;;  %s1650_s1 = inlined_call_operand.vmem [shape: f32[16,1], index: 1, kind: input, shape index: {}]   ;;  %s1651_s2 = inlined_call_operand.vmem [shape: f32[16,1], index: 2, kind: input, shape index: {}]   ;;  %s1652_s3 = inlined_call_operand.vmem [shape: f32[9,4,16], index: 3, kind: input, shape index: {}]   ;;  %s1653_s4 = inlined_call_operand.vmem [shape: f32[4,512], index: 4, kind: output, shape index: {0}]   ;;  %s1654_s5 = inlined_call_operand.vmem [shape: f32[2,1,4], index: 5, kind: output, shape index: {1}]   ;;  %s1655_s6 = inlined_call_operand.vmem [shape: f32[2,1,4], index: 6, kind: output, shape index: {2}]  }
   0x1   :  { %s1439_s23 = smov 0  }
   0x2 LB: > { %s1451_s24 = sadd.s32 4294967295, %s1387_s23   ;;  %s1454_s25 = sadd.s32 1, %s1387_s23   ;;  %s1387_s23 = sphi %s1439_s23, %s1666_s23   ;;  %s1383_s22 = sphi %s1437_s22, %s1665_s22   ;;  %s1379_s21 = sphi %s1435_s21, %s1664_s21  }
   0x3   : > { %s21_s26 = ssub.s32 %s1387_s23, %s1454_s25  ;;  %s24_s27 = sadd.s32 1, %s1383_s22 }
   0x4   : > { %p22_p0 = scmp.eq.s32.totalorder %s21_s26, 0  ;;  %p31_p1 = scmp.ne.s32.totalorder %s1383_s22, %s1379_s21 }
   0x5   : > { %p32_p2 = scmp.eq.s32.totalorder %s1387_s23, 0  ;;  %p1171_p4 = scmp.ge.s32.totalorder %s1387_s23, 2 }
   0x6   : > { %s1463_s28 = scalar_select %p22_p0, %s1383_s22, %s24_s27  }
   0x7   : > { %p33_p3 = por %p32_p2, %p31_p1  ;;  %207 = sbr.rel (%p1171_p4) target bundleno = 20 (0x14), region = 28 }
   0xc   : > { %210 = sbr.rel (!%p33_p3) target bundleno = 20 (0x14), region = 32  ;;  %s212_s29 = sand.u32 (%p33_p3), 1, %s1383_s22  }
   0xd   : > { %s1207_s30 = sshll.u32 (%p33_p3), %s1387_s23, 4  ;;  %s1172_s7 = sshll.u32 (%p33_p3), %s212_s29, 5 }
   0xe   : > { %s217_s10 = scalar_lea.vmem (%p33_p3), %s1649_s0, %s1207_s30  ;;  %s214_s11 = scalar_lea.vmem (%p33_p3), [#allocation3], %s1172_s7 }
   0xf   : > { %v230_v0 = vld [vmem:[%s217_s10] sm:$0xff] (%p33_p3)  ;;  %v232_v1 = vld [vmem:[%s217_s10 + $0x8] sm:$0xff] (%p33_p3) }
  0x10   : > { %v234_v2 = vld [vmem:[%s217_s10 + $0x20] sm:$0xff] (%p33_p3)  ;;  %231 = vst [vmem:[%s214_s11] sm:$0xff] (%p33_p3), %v230_v0  ;;  %v236_v3 = vld [vmem:[%s217_s10 + $0x28] sm:$0xff] (%p33_p3) }
  0x11   : > { %233 = vst [vmem:[%s214_s11 + $0x8] sm:$0xff] %v232_v1 }
  0x12   : > { %235 = vst [vmem:[%s214_s11 + $0x10] sm:$0xff] %v234_v2 }
  0x13   : > { %237 = vst [vmem:[%s214_s11 + $0x18] sm:$0xff] %v236_v3 }
  0x14 PF: > { %p1175_p5 = scmp.ge.s32.totalorder %s1387_s23, 1  ;;  %p242_p6 = scmp.lt.s32.totalorder %s1387_s23, 3 }
  0x16   : > { %p243_p7 = pnand %p1175_p5, %p242_p6 }
  0x17   : > { %s249_s20 = sand.u32 (!%p243_p7), 1, %s1379_s21   ;;  %s1391_s27 = smov (!%p243_p7), 17  }
  0x18   : > { %246 = sbr.rel (%p243_p7) target bundleno = 716 (0x2cc), region = 55  ;;  %s1176_s23 = sshll.u32 (!%p243_p7), %s249_s20, 5 }
  0x19   : > { %s251_s26 = scalar_lea.vmem (!%p243_p7), [#allocation3], %s1176_s23  ;;  %s1392_s21 = smov (!%p243_p7), 127  }
  0x1a   : > { %s1393_s29 = smov (!%p243_p7), 112   ;;  %s1394_s30 = smov (!%p243_p7), 110  }
  0x1b   : > { %s1395_s7 = smov (!%p243_p7), 126   ;;  %s1396_s8 = smov (!%p243_p7), 95  }
  0x1c   : > { %s1397_s9 = smov (!%p243_p7), 111   ;;  %s1398_s10 = smov (!%p243_p7), 96  }
  0x1d   : > { %v318_v4 = vld [vmem:[%s1651_s2 + $0x8] sm:$0xff]  ;;  %v1389_v6 = vmov 0   ;;  %v317_v7 = vld [vmem:[%s1651_s2] sm:$0xff]  ;;  %vm337_vm0 = vcmask 138240   ;;  %v1390_v9 = vmov 0.0   ;;  %v297_v18 = vld [vmem:[%s251_s26] sm:$0xff] }
  0x1e   : > { %v302_v5 = vld [vmem:[%s1650_s1 + $0x8] sm:$0xff]  ;;  %1244 = vset.pattern.permute.xlu1 %v1389_v6  ;;  %1243 = vset.pattern.permute.xlu0 %v1389_v6  ;;  %v301_v8 = vld [vmem:[%s1650_s1] sm:$0xff]  ;;  %339 = vst.msk [vmem:[#allocation2 + $0x18] sm:$0xff] %vm337_vm0, %v1390_v9  ;;  %v298_v19 = vld [vmem:[%s251_s26 + $0x8] sm:$0xff]  ;;  %vm340_vm1 = vcmask 277640   ;;  %vm363_vm2 = vcmask 1047688  }
  0x1f   : > { %326 = vperm.xlu1 %1244, %v318_v4   ;;  %310 = vperm.xlu0 %1243, %v302_v5   ;;  %338 = vst.msk [vmem:[#allocation2] sm:$0xff] %vm337_vm0, %v1390_v9  ;;  %v299_v10 = vld [vmem:[%s251_s26 + $0x10] sm:$0xff]  ;;  %v300_v14 = vld [vmem:[%s251_s26 + $0x18] sm:$0xff]  ;;  %s1399_s11 = smov 94   ;;  %vm402_vm3 = vcmask 130048   ;;  %vm482_vm4 = vcmask 1039360  }
  0x20   : > { %342 = vst.msk [vmem:[#allocation2 + $0x28] sm:$0xff] %vm340_vm1, %v1390_v9  ;;  %v401_v46 = vld [vmem:[%s1652_s3] sm:$0xf]  ;;  %v1181_v58 = vld [vmem:[%s1652_s3 + $0x4] sm:$0xf]  ;;  %vm626_vm5 = vcmask 916480  }
  0x21   : > { %341 = vst.msk [vmem:[#allocation2 + $0x10] sm:$0xff] %vm340_vm1, %v1390_v9  ;;  %vm550_vm6 = vcmask 1031168   ;;  %vm764_vm7 = vcmask 900096   ;;  %vm696_vm8 = vcmask 908288   ;;  %vm904_vm9 = vcmask 777216   ;;  %p291_p9 = scmp.lt.s32.totalorder %s1451_s24, 1 }
  0x22   : > { %vm834_vm10 = vcmask 785408   ;;  %vm972_vm11 = vcmask 769024   ;;  %vm1043_vm1 = vcmask 24576  }
  0x27   : > { %321 = vperm.xlu1 %1244, %v317_v7   ;;  %305 = vperm.xlu0 %1243, %v301_v8  }
  0x91   : > { %v327_v11 = vpop.permute.xlu1 %326  ;;  %v311_v12 = vpop.permute.xlu0 %310 }
  0x92   : > { %v315_v13 = vmul.f32 %v311_v12, %v299_v10  ;;  %v316_v16 = vmul.f32 %v311_v12, %v300_v14 }
  0x94   : > { %v331_v15 = vadd.f32 %v327_v11, %v315_v13  ;;  %v332_v21 = vadd.f32 %v327_v11, %v316_v16 }
  0x96   : > { %v335_v17 = vmax.f32 %v331_v15, 0.0  ;;  %v336_v27 = vmax.f32 %v332_v21, 0.0  ;;  %v1187_v15 = vld [vmem:[%s1652_s3 + $0xc] sm:$0xf] }
  0x98   : > { %351 = vrot.lane.b32.xlu2 %v335_v17, %s1391_s27 }
  0x99   : > { %v306_v20 = vpop.permute.xlu0 %305  ;;  %v322_v24 = vpop.permute.xlu1 %321 }
  0x9a   : > { %v313_v22 = vmul.f32 %v306_v20, %v297_v18  ;;  %v314_v23 = vmul.f32 %v306_v20, %v298_v19 }
  0x9c   : > { %v329_v25 = vadd.f32 %v322_v24, %v313_v22  ;;  %v330_v26 = vadd.f32 %v322_v24, %v314_v23 }
  0x9e   : > { %v334_v28 = vmax.f32 %v330_v26, 0.0  ;;  %v333_v29 = vmax.f32 %v329_v25, 0.0 }
  0xa0   : > { %353 = vrot.lane.b32.xlu2 %v336_v27, %s1391_s27  ;;  %349 = vrot.lane.b32.xlu1 %v334_v28, %s1391_s27 }
  0xa1   : > { %347 = vrot.lane.b32.xlu0 %v333_v29, %s1391_s27 }
  0xf2   : > { %v352_v30 = vpop.permute.xlu2 %351 }
  0xf3   : > { %367 = vst.msk [vmem:[#allocation2 + $0x18] sm:$0xff] %vm363_vm2, %v352_v30 }
  0xfa   : > { %v354_v31 = vpop.permute.xlu2 %353  ;;  %v399_v32 = vld [vmem:[#allocation2 + $0x18] sm:$0xff] }
  0xfb   : > { %v356_v33 = vsel %vm337_vm0, %v352_v30, %v354_v31  ;;  %369 = vst.msk [vmem:[#allocation2 + $0x28] sm:$0xff] %vm337_vm0, %v354_v31  ;;  %420 = vmatpush.msra.mxu0 %v399_v32 }
  0xfc   : > { %440 = vmatpush.msra.mxu1 %v356_v33  ;;  %v1295_v42 = vpack.i.bf16 %v356_v33, %v399_v32 }
 0x102   : > { %v461_v39 = vld [vmem:[#allocation2 + $0x28] sm:$0xff] }
 0x112   : > { %v350_v34 = vpop.permute.xlu1 %349 }
 0x113   : > { %366 = vst.msk [vmem:[#allocation2 + $0x10] sm:$0xff] %vm337_vm0, %v350_v34  ;;  %v348_v35 = vpop.permute.xlu0 %347 }
 0x114   : > { %v355_v36 = vsel %vm337_vm0, %v348_v35, %v350_v34  ;;  %364 = vst.msk [vmem:[#allocation2] sm:$0xff] %vm363_vm2, %v348_v35  ;;  %vm1031_vm0 = vcmask 1043456  }
 0x115   : > { %441 = vmatpush.msra.mxu1 %v355_v36 }
 0x116   : > { %1180 = vmatmul.msk.f32.vlgmr.msra.gmra.mxu1 %vm402_vm3, %v401_v46 }
 0x11a   : > { %v458_v37 = vld [vmem:[#allocation2 + $0x10] sm:$0xff] }
 0x11b   : > { %v397_v38 = vld [vmem:[#allocation2] sm:$0xff]  ;;  %v1285_v40 = vpack.i.bf16 %v458_v37, %v355_v36  ;;  %v1184_v37 = vld [vmem:[%s1652_s3 + $0x8] sm:$0xf] }
 0x11c   : > { %421 = vmatpush.msra.mxu0 %v397_v38  ;;  %v1255_v41 = vpack.i.bf16 %v397_v38, %v461_v39 }
 0x11d   : > { %1286 = vrot.lane.b32.xlu1 %v1285_v40, %s1392_s21  ;;  %1179 = vmatmul.msk.f32.vlgmr.msra.gmra.mxu0 %vm402_vm3, %v401_v46 }
 0x11e   : > { %1256 = vrot.lane.b32.xlu2 %v1255_v41, %s1393_s29  ;;  %1246 = vrot.lane.b32.xlu0 %v1255_v41, %s1392_s21 }
 0x125   : > { %1296 = vrot.lane.b32.xlu1 %v1295_v42, %s1393_s29 }
 0x126   : > { %1266 = vrot.lane.b32.xlu2 %v1255_v41, %s1394_s30  ;;  %1251 = vrot.lane.b32.xlu0 %v1255_v41, %s1395_s7 }
 0x12d   : > { %1306 = vrot.lane.b32.xlu1 %v1285_v40, %s1393_s29 }
 0x12e   : > { %1276 = vrot.lane.b32.xlu2 %v1255_v41, %s1396_s8  ;;  %1261 = vrot.lane.b32.xlu0 %v1255_v41, %s1397_s9 }
 0x135   : > { %1316 = vrot.lane.b32.xlu1 %v1295_v42, %s1394_s30 }
 0x136   : > { %1281 = vrot.lane.b32.xlu2 %v1295_v42, %s1392_s21  ;;  %1271 = vrot.lane.b32.xlu0 %v1255_v41, %s1398_s10 }
 0x13d   : > { %1326 = vrot.lane.b32.xlu1 %v1285_v40, %s1394_s30 }
 0x13e   : > { %1291 = vrot.lane.b32.xlu2 %v1295_v42, %s1395_s7  ;;  %1301 = vrot.lane.b32.xlu0 %v1285_v40, %s1395_s7 }
 0x145   : > { %1336 = vrot.lane.b32.xlu1 %v1295_v42, %s1396_s8 }
 0x146   : > { %1311 = vrot.lane.b32.xlu2 %v1295_v42, %s1397_s9  ;;  %1321 = vrot.lane.b32.xlu0 %v1285_v40, %s1397_s9 }
 0x14d   : > { %1346 = vrot.lane.b32.xlu1 %v1285_v40, %s1396_s8 }
 0x14e   : > { %1331 = vrot.lane.b32.xlu2 %v1295_v42, %s1398_s10  ;;  %1341 = vrot.lane.b32.xlu0 %v1285_v40, %s1398_s10  ;;  %s1177_s10 = sshll.u32 %s1451_s24, 1  ;;  %s1670_s24 = smov (!%p291_p9, %s1451_s24), 1 }
 0x14f   : > { %p286_p8 = scmp.lt.s32.totalorder %s1177_s10, 3  ;;  %s293_s17 = scalar_lea.vmem %s1654_s5, %s1670_s24 }
 0x150   : > { %s296_s20 = scalar_lea.vmem %s1655_s6, %s1670_s24 }
 0x151   : > { %s1668_s10 = smov (!%p286_p8, %s1177_s10), 3 }
 0x155   : > { %1361 = vrot.lane.b32.xlu1 %v1285_v40, %s1399_s11 }
 0x156   : > { %1351 = vrot.lane.b32.xlu2 %v1295_v42, %s1399_s11  ;;  %1356 = vrot.lane.b32.xlu0 %v1255_v41, %s1399_s11  ;;  %s1178_s11 = sshll.u32 %s1668_s10, 2 }
 0x157   : > { %s289_s14 = scalar_lea.vmem %s1653_s4, %s1178_s11 }
 0x178   : > { %v1257_v43 = vpop.permute.xlu2 %1256 }
 0x179   : > { %v1258_v62 = vunpack.i.l.bf16 %v1257_v43  ;;  %v1259_v11 = vunpack.i.h.bf16 %v1257_v43  ;;  %v1193_v43 = vld [vmem:[%s1652_s3 + $0x14] sm:$0xf] }
 0x180   : > { %v1492_v44 = vpop.permute.xlu2 %1266 }
 0x181   : > { %v1268_v19 = vunpack.i.l.bf16 %v1492_v44  ;;  %v1269_v26 = vunpack.i.h.bf16 %v1492_v44 }
 0x188   : > { %v1494_v45 = vpop.permute.xlu2 %1276 }
 0x18f   : > { %v1287_v47 = vpop.permute.xlu1 %1286 }
 0x190   : > { %v1282_v48 = vpop.permute.xlu2 %1281  ;;  %v1247_v49 = vpop.permute.xlu0 %1246  ;;  %v1289_v50 = vunpack.i.h.bf16 %v1287_v47  ;;  %v1288_v51 = vunpack.i.l.bf16 %v1287_v47  ;;  %v1278_v47 = vunpack.i.l.bf16 %v1494_v45 }
 0x191   : > { %v1284_v52 = vunpack.i.h.bf16 %v1282_v48  ;;  %v1283_v53 = vunpack.i.l.bf16 %v1282_v48  ;;  %v1249_v54 = vunpack.i.h.bf16 %v1247_v49  ;;  %v1248_v55 = vunpack.i.l.bf16 %v1247_v49 }
 0x192   : > { %v484_v60 = vsel %vm482_vm4, %v1288_v51, %v1289_v50 }
 0x193   : > { %v485_v56 = vsel %vm482_vm4, %v1283_v53, %v1284_v52  ;;  %v486_v57 = vsel %vm482_vm4, %v1284_v52, %v1248_v55  ;;  %v483_v59 = vsel %vm482_vm4, %v1249_v54, %v1288_v51 }
 0x194   : > { %508 = vmatpush.msra.mxu2 %v485_v56  ;;  %528 = vmatpush.msra.mxu3 %v486_v57 }
 0x196   : > { %509 = vmatpush.msra.mxu2 %v483_v59  ;;  %529 = vmatpush.msra.mxu3 %v484_v60 }
 0x197   : > { %v1297_v61 = vpop.permute.xlu1 %1296  ;;  %1182 = vmatmul.msk.f32.vlgmr.msra.gmra.mxu2 %vm402_vm3, %v1181_v58  ;;  %1183 = vmatmul.msk.f32.vlgmr.msra.gmra.mxu3 %vm402_vm3, %v1181_v58  ;;  %v1190_v58 = vld [vmem:[%s1652_s3 + $0x10] sm:$0xf] }
 0x198   : > { %v1292_v63 = vpop.permute.xlu2 %1291  ;;  %v1252_v0 = vpop.permute.xlu0 %1251  ;;  %v1299_v1 = vunpack.i.h.bf16 %v1297_v61  ;;  %v1298_v2 = vunpack.i.l.bf16 %v1297_v61 }
 0x199   : > { %v1294_v3 = vunpack.i.h.bf16 %v1292_v63  ;;  %v1293_v4 = vunpack.i.l.bf16 %v1292_v63  ;;  %v1253_v5 = vunpack.i.l.bf16 %v1252_v0  ;;  %v1254_v28 = vunpack.i.h.bf16 %v1252_v0 }
 0x19a   : > { %v629_v6 = vsel %vm626_vm5, %v1298_v2, %v1299_v1  ;;  %v630_v7 = vsel %vm626_vm5, %v1299_v1, %v1258_v62 }
 0x19b   : > { %v553_v8 = vsel %vm550_vm6, %v1293_v4, %v1294_v3  ;;  %v554_v9 = vsel %vm550_vm6, %v1294_v3, %v1253_v5  ;;  %652 = vmatpush.msrb.mxu2 %v629_v6  ;;  %672 = vmatpush.msrb.mxu3 %v630_v7  ;;  %v1279_v3 = vunpack.i.h.bf16 %v1494_v45 }
 0x19c   : > { %576 = vmatpush.msrb.mxu0 %v553_v8  ;;  %596 = vmatpush.msrb.mxu1 %v554_v9 }
 0x19f   : > { %v1307_v10 = vpop.permute.xlu1 %1306 }
 0x1a0   : > { %v1510_v12 = vpop.permute.xlu0 %1261  ;;  %v1309_v13 = vunpack.i.h.bf16 %v1307_v10  ;;  %v1308_v14 = vunpack.i.l.bf16 %v1307_v10  ;;  %v1312_v23 = vpop.permute.xlu2 %1311 }
 0x1a1   : > { %v1314_v29 = vunpack.i.h.bf16 %v1312_v23  ;;  %v1313_v33 = vunpack.i.l.bf16 %v1312_v23  ;;  %v1263_v34 = vunpack.i.l.bf16 %v1510_v12  ;;  %v1264_v49 = vunpack.i.h.bf16 %v1510_v12  ;;  %v1196_v12 = vld [vmem:[%s1652_s3 + $0x18] sm:$0xf] }
 0x1a2   : > { %v627_v16 = vsel %vm626_vm5, %v1259_v11, %v1308_v14  ;;  %v628_v17 = vsel %vm626_vm5, %v1308_v14, %v1309_v13 }
 0x1a3   : > { %653 = vmatpush.msrb.mxu2 %v627_v16  ;;  %673 = vmatpush.msrb.mxu3 %v628_v17  ;;  %v699_v44 = vsel %vm696_vm8, %v1313_v33, %v1314_v29  ;;  %v700_v46 = vsel %vm696_vm8, %v1314_v29, %v1263_v34  ;;  %v1199_v16 = vld [vmem:[%s1652_s3 + $0x1c] sm:$0xf]  ;;  %v423_v29 = vpop.f32.mrf.mxu0 }
 0x1a4   : > { %1188 = vmatmul.msk.f32.vlgmr.msrb.gmra.mxu2 %vm402_vm3, %v1187_v15  ;;  %1189 = vmatmul.msk.f32.vlgmr.msrb.gmra.mxu3 %vm402_vm3, %v1187_v15 }
 0x1a7   : > { %v1317_v18 = vpop.permute.xlu1 %1316 }
 0x1a8   : > { %v1520_v20 = vpop.permute.xlu0 %1271  ;;  %v1319_v21 = vunpack.i.h.bf16 %v1317_v18  ;;  %v1318_v22 = vunpack.i.l.bf16 %v1317_v18  ;;  %v1332_v42 = vpop.permute.xlu2 %1331 }
 0x1a9   : > { %v1334_v50 = vunpack.i.h.bf16 %v1332_v42  ;;  %v1333_v54 = vunpack.i.l.bf16 %v1332_v42  ;;  %v1273_v55 = vunpack.i.l.bf16 %v1520_v20  ;;  %v1274_v4 = vunpack.i.h.bf16 %v1520_v20 }
 0x1aa   : > { %v767_v24 = vsel %vm764_vm7, %v1318_v22, %v1319_v21  ;;  %v768_v25 = vsel %vm764_vm7, %v1319_v21, %v1268_v19 }
 0x1ab   : > { %790 = vmatpush.msra.mxu2 %v767_v24  ;;  %810 = vmatpush.msra.mxu3 %v768_v25  ;;  %v837_v63 = vsel %vm834_vm10, %v1333_v54, %v1334_v50  ;;  %v838_v0 = vsel %vm834_vm10, %v1334_v50, %v1273_v55  ;;  %v1202_v24 = vld [vmem:[%s1652_s3 + $0x20] sm:$0xf] }
 0x1af   : > { %v1327_v27 = vpop.permute.xlu1 %1326 }
 0x1b0   : > { %v1302_v30 = vpop.permute.xlu0 %1301  ;;  %v1329_v31 = vunpack.i.h.bf16 %v1327_v27  ;;  %v1328_v32 = vunpack.i.l.bf16 %v1327_v27  ;;  %v1352_v1 = vpop.permute.xlu2 %1351 }
 0x1b1   : > { %v1304_v35 = vunpack.i.h.bf16 %v1302_v30  ;;  %v1303_v36 = vunpack.i.l.bf16 %v1302_v30  ;;  %v1354_v8 = vunpack.i.h.bf16 %v1352_v1  ;;  %v1353_v9 = vunpack.i.l.bf16 %v1352_v1  ;;  %v443_v30 = vpop.f32.mrf.mxu1 }
 0x1b2   : > { %v765_v38 = vsel %vm764_vm7, %v1269_v26, %v1328_v32  ;;  %v766_v39 = vsel %vm764_vm7, %v1328_v32, %v1329_v31 }
 0x1b3   : > { %v551_v40 = vsel %vm550_vm6, %v1254_v28, %v1303_v36  ;;  %v552_v41 = vsel %vm550_vm6, %v1303_v36, %v1304_v35  ;;  %791 = vmatpush.msra.mxu2 %v765_v38  ;;  %811 = vmatpush.msra.mxu3 %v766_v39  ;;  %v975_v17 = vsel %vm972_vm11, %v1353_v9, %v1354_v8  ;;  %v370_v28 = vlaneseq }
 0x1b4   : > { %577 = vmatpush.msrb.mxu0 %v551_v40  ;;  %597 = vmatpush.msrb.mxu1 %v552_v41 }
 0x1b5   : > { %1185 = vmatmul.msk.f32.vlgmr.msrb.gmra.mxu0 %vm402_vm3, %v1184_v37  ;;  %1186 = vmatmul.msk.f32.vlgmr.msrb.gmra.mxu1 %vm402_vm3, %v1184_v37  ;;  %v1581_v31 = vand.u32 127, %v370_v28 }
 0x1b6   : > { %722 = vmatpush.msra.mxu0 %v699_v44  ;;  %742 = vmatpush.msra.mxu1 %v700_v46 }
 0x1b7   : > { %1194 = vmatmul.msk.f32.vlgmr.msra.gmra.mxu2 %vm402_vm3, %v1193_v43  ;;  %1195 = vmatmul.msk.f32.vlgmr.msra.gmra.mxu3 %vm402_vm3, %v1193_v43  ;;  %v1337_v48 = vpop.permute.xlu1 %1336  ;;  %v372_v33 = vadd.s32 128, %v1581_v31  ;;  %v377_v35 = vand.u32 15, %v1581_v31 }
 0x1b8   : > { %v1322_v51 = vpop.permute.xlu0 %1321  ;;  %v1339_v52 = vunpack.i.h.bf16 %v1337_v48  ;;  %v1338_v53 = vunpack.i.l.bf16 %v1337_v48 }
 0x1b9   : > { %v1324_v56 = vunpack.i.h.bf16 %v1322_v51  ;;  %v1323_v57 = vunpack.i.l.bf16 %v1322_v51  ;;  %v384_v36 = vand.u32 15, %v372_v33  ;;  %vm1585_vm12 = vcmp.ge.s32.totalorder %v377_v35, 1 }
 0x1ba   : > { %v907_v59 = vsel %vm904_vm9, %v1338_v53, %v1339_v52  ;;  %v908_v60 = vsel %vm904_vm9, %v1339_v52, %v1278_v47  ;;  %vm1593_vm14 = vcmp.le.s32.totalorder %v377_v35, 14  ;;  %v452_v43 = vsel %vm1585_vm12, %v423_v29, 0.0 }
 0x1bb   : > { %v697_v61 = vsel %vm696_vm8, %v1264_v49, %v1323_v57  ;;  %v698_v62 = vsel %vm696_vm8, %v1323_v57, %v1324_v56  ;;  %930 = vmatpush.msrb.mxu2 %v907_v59  ;;  %950 = vmatpush.msrb.mxu3 %v908_v60  ;;  %vm1589_vm13 = vcmp.ge.s32.totalorder %v384_v36, 1  ;;  %vm1599_vm15 = vcmp.le.s32.totalorder %v384_v36, 14 }
 0x1bc   : > { %723 = vmatpush.msra.mxu0 %v697_v61  ;;  %743 = vmatpush.msra.mxu1 %v698_v62  ;;  %v453_v47 = vsel %vm1589_vm13, %v443_v30, 0.0 }
 0x1bd   : > { %1191 = vmatmul.msk.f32.vlgmr.msra.gmra.mxu0 %vm402_vm3, %v1190_v58  ;;  %1192 = vmatmul.msk.f32.vlgmr.msra.gmra.mxu1 %vm402_vm3, %v1190_v58 }
 0x1be   : > { %860 = vmatpush.msrb.mxu0 %v837_v63  ;;  %880 = vmatpush.msrb.mxu1 %v838_v0 }
 0x1bf   : > { %v1347_v2 = vpop.permute.xlu1 %1346 }
 0x1c0   : > { %v1342_v5 = vpop.permute.xlu0 %1341  ;;  %v1349_v6 = vunpack.i.h.bf16 %v1347_v2  ;;  %v1348_v7 = vunpack.i.l.bf16 %v1347_v2 }
 0x1c1   : > { %v1344_v10 = vunpack.i.h.bf16 %v1342_v5  ;;  %v1343_v11 = vunpack.i.l.bf16 %v1342_v5 }
 0x1c2   : > { %v905_v13 = vsel %vm904_vm9, %v1279_v3, %v1348_v7  ;;  %v906_v14 = vsel %vm904_vm9, %v1348_v7, %v1349_v6 }
 0x1c3   : > { %v835_v45 = vsel %vm834_vm10, %v1274_v4, %v1343_v11  ;;  %v836_v15 = vsel %vm834_vm10, %v1343_v11, %v1344_v10  ;;  %931 = vmatpush.msrb.mxu2 %v905_v13  ;;  %951 = vmatpush.msrb.mxu3 %v906_v14 }
 0x1c4   : > { %861 = vmatpush.msrb.mxu0 %v835_v45  ;;  %881 = vmatpush.msrb.mxu1 %v836_v15 }
 0x1c5   : > { %1197 = vmatmul.msk.f32.vlgmr.msrb.gmra.mxu0 %vm402_vm3, %v1196_v12  ;;  %1198 = vmatmul.msk.f32.vlgmr.msrb.gmra.mxu1 %vm402_vm3, %v1196_v12 }
 0x1c6   : > { %998 = vmatpush.msra.mxu0 %v975_v17  ;;  %1200 = vmatmul.msk.f32.vlgmr.msrb.gmra.mxu2 %vm402_vm3, %v1199_v16 }
 0x1c7   : > { %1201 = vmatmul.msk.f32.vlgmr.msrb.gmra.mxu3 %vm402_vm3, %v1199_v16  ;;  %v1362_v18 = vpop.permute.xlu1 %1361 }
 0x1c8   : > { %v1357_v19 = vpop.permute.xlu0 %1356  ;;  %v1363_v20 = vunpack.i.l.bf16 %v1362_v18  ;;  %v1364_v23 = vunpack.i.h.bf16 %v1362_v18 }
 0x1c9   : > { %v1359_v21 = vunpack.i.h.bf16 %v1357_v19  ;;  %v1358_v22 = vunpack.i.l.bf16 %v1357_v19 }
 0x1ca   : > { %v974_v27 = vsel %vm972_vm11, %v1363_v20, %v1364_v23 }
 0x1cb   : > { %v976_v25 = vsel %vm972_vm11, %v1354_v8, %v1358_v22  ;;  %v973_v26 = vsel %vm972_vm11, %v1359_v21, %v1363_v20 }
 0x1cc   : > { %1018 = vmatpush.msra.mxu1 %v976_v25  ;;  %999 = vmatpush.msra.mxu0 %v973_v26 }
 0x1cd   : > { %1203 = vmatmul.msk.f32.vlgmr.msra.gmra.mxu0 %vm402_vm3, %v1202_v24 }
 0x1ce   : > { %1019 = vmatpush.msra.mxu1 %v974_v27 }
 0x1cf   : > { %1204 = vmatmul.msk.f32.vlgmr.msra.gmra.mxu1 %vm402_vm3, %v1202_v24 }
 0x21a   : > { %v511_v32 = vpop.f32.mrf.mxu2  ;;  %v531_v34 = vpop.f32.mrf.mxu3 }
 0x21b   : > { %v534_v49 = vadd.f32 %v511_v32, %v452_v43  ;;  %v535_v53 = vadd.f32 %v531_v34, %v453_v47 }
 0x227   : > { %v655_v42 = vpop.f32.mrf.mxu2  ;;  %v675_v46 = vpop.f32.mrf.mxu3 }
 0x228   : > { %v678_v55 = vsel %vm1585_vm12, %v655_v42, 0.0  ;;  %v679_v57 = vsel %vm1589_vm13, %v675_v46, 0.0 }
 0x232   : > { %v579_v37 = vpop.f32.mrf.mxu0  ;;  %v599_v38 = vpop.f32.mrf.mxu1 }
 0x233   : > { %v608_v48 = vsel %vm1593_vm14, %v579_v37, 0.0  ;;  %v609_v52 = vsel %vm1599_vm15, %v599_v38, 0.0 }
 0x234   : > { %v610_v54 = vadd.f32 %v608_v48, %v534_v49  ;;  %v611_v56 = vadd.f32 %v609_v52, %v535_v53 }
 0x236   : > { %v680_v58 = vadd.f32 %v678_v55, %v610_v54  ;;  %v681_v60 = vadd.f32 %v679_v57, %v611_v56 }
 0x23a   : > { %v725_v50 = vpop.f32.mrf.mxu0  ;;  %v745_v51 = vpop.f32.mrf.mxu1 }
 0x23b   : > { %v793_v59 = vpop.f32.mrf.mxu2  ;;  %v748_v61 = vadd.f32 %v725_v50, %v680_v58  ;;  %v813_v62 = vpop.f32.mrf.mxu3  ;;  %v749_v1 = vadd.f32 %v745_v51, %v681_v60 }
 0x23c   : > { %v816_v0 = vsel %vm1593_vm14, %v793_v59, 0.0  ;;  %v817_v3 = vsel %vm1599_vm15, %v813_v62, 0.0 }
 0x23d   : > { %v818_v5 = vadd.f32 %v816_v0, %v748_v61  ;;  %v819_v7 = vadd.f32 %v817_v3, %v749_v1 }
 0x242   : > { %v863_v63 = vpop.f32.mrf.mxu0  ;;  %v883_v2 = vpop.f32.mrf.mxu1 }
 0x243   : > { %v886_v4 = vsel %vm1585_vm12, %v863_v63, 0.0  ;;  %v887_v6 = vsel %vm1589_vm13, %v883_v2, 0.0 }
 0x244   : > { %v888_v8 = vadd.f32 %v886_v4, %v818_v5  ;;  %v889_v10 = vadd.f32 %v887_v6, %v819_v7 }
 0x249   : > { %v933_v9 = vpop.f32.mrf.mxu2 }
 0x24a   : > { %v956_v11 = vadd.f32 %v933_v9, %v888_v8  ;;  %v953_v12 = vpop.f32.mrf.mxu3  ;;  %v1001_v13 = vpop.f32.mrf.mxu0 }
 0x24b   : > { %v1024_v14 = vsel %vm1593_vm14, %v1001_v13, 0.0  ;;  %v957_v45 = vadd.f32 %v953_v12, %v889_v10 }
 0x24c   : > { %v1026_v15 = vadd.f32 %v1024_v14, %v956_v11  ;;  %v1021_v16 = vpop.f32.mrf.mxu1 }
 0x24d   : > { %v1025_v17 = vsel %vm1599_vm15, %v1021_v16, 0.0 }
 0x24e   : > { %v1027_v18 = vadd.f32 %v1025_v17, %v957_v45  ;;  %v1045_v19 = vmul.f32 %v1026_v15, %v1026_v15  ;;  %v1035_v21 = vsel %vm1031_vm0, %v1026_v15, 0.0 }
 0x250   : > { %v1030_v20 = vrot.slane %v1027_v18, 4  ;;  %v1036_v22 = vsel %vm1031_vm0, %v1027_v18, 0.0  ;;  %v1046_v23 = vmul.f32 %v1027_v18, %v1027_v18  ;;  %v1047_v26 = vsel %vm1031_vm0, %v1045_v19, 0.0 }
 0x251   : > { %v1037_v24 = vadd.f32 %v1036_v22, %v1035_v21 }
 0x252   : > { %v1032_v25 = vsel %vm1031_vm0, %v1026_v15, %v1030_v20  ;;  %v1048_v27 = vsel %vm1031_vm0, %v1046_v23, 0.0 }
 0x253   : > { %1038 = vadd.xlane.f32.xlu2 %v1037_v24  ;;  %1034 = vst [vmem:[%s289_s14] sm:$0xff] %v1032_v25  ;;  %v1049_v28 = vadd.f32 %v1048_v27, %v1047_v26 }
 0x255   : > { %1050 = vadd.xlane.f32.xlu0 %v1049_v28 }
 0x2c6   : > { %v1039_v29 = vpop.xlane.xlu2 %1038 }
 0x2c7   : > { %v1041_v30 = vperm.slane %v1039_v29, %v1581_v31 }
 0x2c8   : > { %v1051_v32 = vpop.xlane.xlu0 %1050 }
 0x2c9   : > { %1044 = vst.msk [vmem:[%s293_s17] sm:$0x1] %vm1043_vm1, %v1041_v30  ;;  %v1053_v33 = vperm.slane %v1051_v32, %v1581_v31 }
 0x2cb   : > { %1055 = vst.msk [vmem:[%s296_s20] sm:$0x1] %vm1043_vm1, %v1053_v33 }
 0x2cc PF: > { %p14_p10 = scmp.ge.s32.totalorder %s1454_s25, 4   ;;  %s1664_s21 = smov %s1383_s22 }
 0x2cd   : > { %s1665_s22 = smov %s1463_s28  ;;  %s1666_s23 = smov %s1454_s25 }
 0x2ce   :  { %16 = sbr.rel (!%p14_p10) target bundleno = 2 (0x2), region = 126 }

// kernel: dense_block_forward.11
= control target key start
LH: loop header
LB: loop body
LE: loop exit
PB: predicated region body
PF: predicated region fallthrough
CT: control target
= control target key end

     0   :  { %12 = vsyncpa [#allocation5], 0  ;;  %s1857_s0 = inlined_call_operand.vmem [shape: f32[16,512], index: 0, kind: input, shape index: {}]   ;;  %s1858_s1 = inlined_call_operand.vmem [shape: f32[16,1], index: 1, kind: input, shape index: {}]   ;;  %s1859_s2 = inlined_call_operand.vmem [shape: f32[16,1], index: 2, kind: input, shape index: {}]   ;;  %s1860_s3 = inlined_call_operand.vmem [shape: f32[9,4,16], index: 3, kind: input, shape index: {}]   ;;  %s1861_s4 = inlined_call_operand.vmem [shape: f32[4,512], index: 4, kind: output, shape index: {0}]   ;;  %s1862_s5 = inlined_call_operand.hbm [shape: f32[2,1,4], index: 5, kind: output, shape index: {1}]   ;;  %s1863_s6 = inlined_call_operand.hbm [shape: f32[2,1,4], index: 6, kind: output, shape index: {2}]  }
   0x1   :  { %14 = vsyncpa [#allocation5 + $0x1], 0 }
   0x2   :  { %15 = vsyncpa [#allocation7], 0 }
   0x3   :  { %17 = vsyncpa [#allocation7 + $0x1], 0  ;;  %s1569_s21 = smov 0   ;;  %s1571_s22 = smov 0  }
   0x4   :  { %s1573_s23 = smov 0   ;;  %s1575_s24 = smov 0  }
   0x5 LB: > { %s1590_s25 = sadd.s32 4294967295, %s1521_s24   ;;  %s1211_s26 = sadd.s32 4294967294, %s1521_s24   ;;  %s1521_s24 = sphi %s1575_s24, %s1877_s24   ;;  %s1517_s23 = sphi %s1573_s23, %s1876_s23   ;;  %s1513_s22 = sphi %s1571_s22, %s1875_s22   ;;  %s1509_s21 = sphi %s1569_s21, %s1874_s21  }
   0x6   : > { %s1594_s27 = sadd.s32 1, %s1521_s24   ;;  %s30_s28 = sadd.s32 1, %s1517_s23 }
   0x7   : > { %s27_s29 = ssub.s32 %s1521_s24, %s1594_s27  ;;  %p37_p0 = scmp.ne.s32.totalorder %s1517_s23, %s1513_s22 }
   0x8   : > { %p28_p1 = scmp.eq.s32.totalorder %s27_s29, 0  ;;  %p38_p2 = scmp.eq.s32.totalorder %s1521_s24, 0 }
   0x9   : > { %p156_p3 = scmp.eq.s32.totalorder %s1590_s25, 1  ;;  %p161_p4 = scmp.ne.s32.totalorder %s1513_s22, %s1509_s21 }
   0xa   : > { %s1606_s30 = scalar_select %p28_p1, %s1517_s23, %s30_s28  }
   0xb   : > { %p39_p5 = por %p38_p2, %p37_p0  ;;  %p1608_p6 = por %p156_p3, %p37_p0 }
   0xc   : > { %p162_p7 = scmp.eq.s32.totalorder %s1211_s26, 1  ;;  %p1213_p9 = scmp.ge.s32.totalorder %s1521_s24, 2 }
   0xe   : > { %p1612_p8 = por %p162_p7, %p161_p4  ;;  %213 = sbr.rel (%p1213_p9) target bundleno = 27 (0x1b), region = 28 }
  0x13   : > { %216 = sbr.rel (!%p39_p5) target bundleno = 27 (0x1b), region = 32  ;;  %s218_s9 = sand.u32 (%p39_p5), 1, %s1517_s23  }
  0x14   : > { %s1249_s10 = sshll.u32 (%p39_p5), %s1521_s24, 4  ;;  %s1214_s11 = sshll.u32 (%p39_p5), %s218_s9, 5 }
  0x15   : > { %s223_s14 = scalar_lea.vmem (%p39_p5), %s1857_s0, %s1249_s10  ;;  %s220_s15 = scalar_lea.vmem (%p39_p5), [#allocation3], %s1214_s11 }
  0x16   : > { %v236_v0 = vld [vmem:[%s223_s14] sm:$0xff] (%p39_p5)  ;;  %v238_v1 = vld [vmem:[%s223_s14 + $0x8] sm:$0xff] (%p39_p5) }
  0x17   : > { %v240_v2 = vld [vmem:[%s223_s14 + $0x20] sm:$0xff] (%p39_p5)  ;;  %237 = vst [vmem:[%s220_s15] sm:$0xff] (%p39_p5), %v236_v0  ;;  %v242_v3 = vld [vmem:[%s223_s14 + $0x28] sm:$0xff] (%p39_p5) }
  0x18   : > { %239 = vst [vmem:[%s220_s15 + $0x8] sm:$0xff] %v238_v1 }
  0x19   : > { %241 = vst [vmem:[%s220_s15 + $0x10] sm:$0xff] %v240_v2 }
  0x1a   : > { %243 = vst [vmem:[%s220_s15 + $0x18] sm:$0xff] %v242_v3 }
  0x1b PF: > { %p1217_p10 = scmp.ge.s32.totalorder %s1521_s24, 1  ;;  %p248_p11 = scmp.lt.s32.totalorder %s1521_s24, 3 }
  0x1d   : > { %p249_p12 = pnand %p1217_p10, %p248_p11 }
  0x1e   : > { %s1641_s9 = sand.u32 (!%p249_p12), 1, %s1513_s22   ;;  %s1525_s12 = smov (!%p249_p12), 17  }
  0x1f   : > { %252 = sbr.rel (%p249_p12) target bundleno = 735 (0x2df), region = 55  ;;  %s1218_s10 = sshll.u32 (!%p249_p12), %s1641_s9, 5 }
  0x20   : > { %s257_s11 = scalar_lea.vmem (!%p249_p12), [#allocation3], %s1218_s10  ;;  %s1526_s13 = smov (!%p249_p12), 127  }
  0x21   : > { %s1527_s14 = smov (!%p249_p12), 112   ;;  %s1528_s15 = smov (!%p249_p12), 110  }
  0x22   : > { %s1529_s16 = smov (!%p249_p12), 126   ;;  %s1530_s17 = smov (!%p249_p12), 95  }
  0x23   : > { %s1531_s18 = smov (!%p249_p12), 111   ;;  %s1532_s19 = smov (!%p249_p12), 96  }
  0x24   : > { %v320_v4 = vld [vmem:[%s1859_s2 + $0x8] sm:$0xff]  ;;  %v1523_v6 = vmov 0   ;;  %v319_v7 = vld [vmem:[%s1859_s2] sm:$0xff]  ;;  %vm339_vm0 = vcmask 138240   ;;  %v1524_v9 = vmov 0.0   ;;  %v299_v18 = vld [vmem:[%s257_s11] sm:$0xff]  ;;  %s1093_s26 = scalar_lea.hbm %s1863_s6, %s1590_s25 }
  0x25   : > { %v304_v5 = vld [vmem:[%s1858_s1 + $0x8] sm:$0xff]  ;;  %1306 = vset.pattern.permute.xlu1 %v1523_v6  ;;  %1305 = vset.pattern.permute.xlu0 %v1523_v6  ;;  %v303_v8 = vld [vmem:[%s1858_s1] sm:$0xff]  ;;  %341 = vst.msk [vmem:[#allocation2 + $0x18] sm:$0xff] %vm339_vm0, %v1524_v9  ;;  %v300_v19 = vld [vmem:[%s257_s11 + $0x8] sm:$0xff]  ;;  %vm342_vm1 = vcmask 277640   ;;  %vm365_vm2 = vcmask 1047688  }
  0x26   : > { %328 = vperm.xlu1 %1306, %v320_v4   ;;  %312 = vperm.xlu0 %1305, %v304_v5   ;;  %340 = vst.msk [vmem:[#allocation2] sm:$0xff] %vm339_vm0, %v1524_v9  ;;  %v301_v10 = vld [vmem:[%s257_s11 + $0x10] sm:$0xff]  ;;  %v302_v14 = vld [vmem:[%s257_s11 + $0x18] sm:$0xff]  ;;  %s1533_s20 = smov 94   ;;  %vm404_vm3 = vcmask 130048   ;;  %vm484_vm4 = vcmask 1039360  }
  0x27   : > { %344 = vst.msk [vmem:[#allocation2 + $0x28] sm:$0xff] %vm342_vm1, %v1524_v9  ;;  %v403_v46 = vld [vmem:[%s1860_s3] sm:$0xf]  ;;  %v1223_v58 = vld [vmem:[%s1860_s3 + $0x4] sm:$0xf]  ;;  %vm628_vm5 = vcmask 916480  }
  0x28   : > { %343 = vst.msk [vmem:[#allocation2 + $0x10] sm:$0xff] %vm342_vm1, %v1524_v9  ;;  %vm552_vm6 = vcmask 1031168   ;;  %vm766_vm7 = vcmask 900096   ;;  %vm698_vm8 = vcmask 908288   ;;  %vm906_vm9 = vcmask 777216   ;;  %s1219_s11 = sshll.u32 %s1590_s25, 1 }
  0x29   : > { %vm836_vm10 = vcmask 785408   ;;  %vm974_vm11 = vcmask 769024   ;;  %p294_p13 = scmp.lt.s32.totalorder %s1219_s11, 3  ;;  %s285_s28 = scalar_lea.vmem [#allocation4], %s1641_s9  ;;  %vm1045_vm1 = vcmask 24576  }
  0x2a   : > { %s1794_s29 = sshll.u32 %s285_s28, 4  ;;  %s1083_s29 = int_to_ptr.vmem [resolvable:$true] %s1794_s29 }
  0x2b   : > { %s1879_s11 = smov (!%p294_p13, %s1219_s11), 3 }
  0x2e   : > { %323 = vperm.xlu1 %1306, %v319_v7   ;;  %307 = vperm.xlu0 %1305, %v303_v8  }
  0x98   : > { %v329_v11 = vpop.permute.xlu1 %328  ;;  %v313_v12 = vpop.permute.xlu0 %312 }
  0x99   : > { %v317_v13 = vmul.f32 %v313_v12, %v301_v10  ;;  %v318_v16 = vmul.f32 %v313_v12, %v302_v14 }
  0x9b   : > { %v333_v15 = vadd.f32 %v329_v11, %v317_v13  ;;  %v334_v21 = vadd.f32 %v329_v11, %v318_v16 }
  0x9d   : > { %v337_v17 = vmax.f32 %v333_v15, 0.0  ;;  %v338_v27 = vmax.f32 %v334_v21, 0.0  ;;  %v1229_v15 = vld [vmem:[%s1860_s3 + $0xc] sm:$0xf] }
  0x9f   : > { %353 = vrot.lane.b32.xlu2 %v337_v17, %s1525_s12 }
  0xa0   : > { %v308_v20 = vpop.permute.xlu0 %307  ;;  %v324_v24 = vpop.permute.xlu1 %323 }
  0xa1   : > { %v315_v22 = vmul.f32 %v308_v20, %v299_v18  ;;  %v316_v23 = vmul.f32 %v308_v20, %v300_v19 }
  0xa3   : > { %v331_v25 = vadd.f32 %v324_v24, %v315_v22  ;;  %v332_v26 = vadd.f32 %v324_v24, %v316_v23 }
  0xa5   : > { %v336_v28 = vmax.f32 %v332_v26, 0.0  ;;  %v335_v29 = vmax.f32 %v331_v25, 0.0 }
  0xa7   : > { %355 = vrot.lane.b32.xlu2 %v338_v27, %s1525_s12  ;;  %351 = vrot.lane.b32.xlu1 %v336_v28, %s1525_s12 }
  0xa8   : > { %349 = vrot.lane.b32.xlu0 %v335_v29, %s1525_s12  ;;  %s1220_s12 = sshll.u32 %s1879_s11, 2  ;;  %s291_s11 = scalar_lea.vmem [#allocation6], %s1641_s9 }
  0xf9   : > { %v354_v30 = vpop.permute.xlu2 %353 }
  0xfa   : > { %369 = vst.msk [vmem:[#allocation2 + $0x18] sm:$0xff] %vm365_vm2, %v354_v30 }
 0x101   : > { %v356_v31 = vpop.permute.xlu2 %355  ;;  %v401_v32 = vld [vmem:[#allocation2 + $0x18] sm:$0xff] }
 0x102   : > { %v358_v33 = vsel %vm339_vm0, %v354_v30, %v356_v31  ;;  %371 = vst.msk [vmem:[#allocation2 + $0x28] sm:$0xff] %vm339_vm0, %v356_v31  ;;  %422 = vmatpush.msra.mxu0 %v401_v32 }
 0x103   : > { %442 = vmatpush.msra.mxu1 %v358_v33  ;;  %v1357_v42 = vpack.i.bf16 %v358_v33, %v401_v32 }
 0x109   : > { %v463_v39 = vld [vmem:[#allocation2 + $0x28] sm:$0xff] }
 0x119   : > { %v352_v34 = vpop.permute.xlu1 %351 }
 0x11a   : > { %368 = vst.msk [vmem:[#allocation2 + $0x10] sm:$0xff] %vm339_vm0, %v352_v34  ;;  %v350_v35 = vpop.permute.xlu0 %349 }
 0x11b   : > { %v357_v36 = vsel %vm339_vm0, %v350_v35, %v352_v34  ;;  %366 = vst.msk [vmem:[#allocation2] sm:$0xff] %vm365_vm2, %v350_v35  ;;  %vm1033_vm0 = vcmask 1043456  }
 0x11c   : > { %443 = vmatpush.msra.mxu1 %v357_v36 }
 0x11d   : > { %1222 = vmatmul.msk.f32.vlgmr.msra.gmra.mxu1 %vm404_vm3, %v403_v46 }
 0x121   : > { %v460_v37 = vld [vmem:[#allocation2 + $0x10] sm:$0xff] }
 0x122   : > { %v399_v38 = vld [vmem:[#allocation2] sm:$0xff]  ;;  %v1347_v40 = vpack.i.bf16 %v460_v37, %v357_v36  ;;  %v1226_v37 = vld [vmem:[%s1860_s3 + $0x8] sm:$0xf] }
 0x123   : > { %423 = vmatpush.msra.mxu0 %v399_v38  ;;  %v1317_v41 = vpack.i.bf16 %v399_v38, %v463_v39 }
 0x124   : > { %1348 = vrot.lane.b32.xlu1 %v1347_v40, %s1526_s13  ;;  %1221 = vmatmul.msk.f32.vlgmr.msra.gmra.mxu0 %vm404_vm3, %v403_v46 }
 0x125   : > { %1318 = vrot.lane.b32.xlu2 %v1317_v41, %s1527_s14  ;;  %1308 = vrot.lane.b32.xlu0 %v1317_v41, %s1526_s13 }
 0x12c   : > { %1358 = vrot.lane.b32.xlu1 %v1357_v42, %s1527_s14 }
 0x12d   : > { %1328 = vrot.lane.b32.xlu2 %v1317_v41, %s1528_s15  ;;  %1313 = vrot.lane.b32.xlu0 %v1317_v41, %s1529_s16 }
 0x134   : > { %1368 = vrot.lane.b32.xlu1 %v1347_v40, %s1527_s14 }
 0x135   : > { %1338 = vrot.lane.b32.xlu2 %v1317_v41, %s1530_s17  ;;  %1323 = vrot.lane.b32.xlu0 %v1317_v41, %s1531_s18 }
 0x13c   : > { %1378 = vrot.lane.b32.xlu1 %v1357_v42, %s1528_s15 }
 0x13d   : > { %1343 = vrot.lane.b32.xlu2 %v1357_v42, %s1526_s13  ;;  %1333 = vrot.lane.b32.xlu0 %v1317_v41, %s1532_s19  ;;  %s1801_s13 = sshll.u32 %s1093_s26, 4  ;;  %s1098_s13 = int_to_ptr.hbm [resolvable:$true] %s1801_s13 }
 0x144   : > { %1388 = vrot.lane.b32.xlu1 %v1347_v40, %s1528_s15  ;;  %s297_s15 = scalar_lea.vmem %s1861_s4, %s1220_s12  ;;  %s1799_s12 = sshll.u32 %s291_s11, 4  ;;  %s1096_s12 = int_to_ptr.vmem [resolvable:$true] %s1799_s12 }
 0x145   : > { %1353 = vrot.lane.b32.xlu2 %v1357_v42, %s1529_s16  ;;  %1363 = vrot.lane.b32.xlu0 %v1347_v40, %s1529_s16 }
 0x14c   : > { %1398 = vrot.lane.b32.xlu1 %v1357_v42, %s1530_s17 }
 0x14d   : > { %1373 = vrot.lane.b32.xlu2 %v1357_v42, %s1531_s18  ;;  %1383 = vrot.lane.b32.xlu0 %v1347_v40, %s1531_s18  ;;  %s1080_s18 = scalar_lea.hbm %s1862_s5, %s1590_s25  ;;  %s1064_s25 = scalar_lea.sflag [#allocation5], %s1641_s9 }
 0x14e   : > { %s1796_s10 = sshll.u32 %s1080_s18, 4  ;;  %s1447_s18 = scalar_lea.hbm %s1862_s5, 2  ;;  %s1085_s10 = int_to_ptr.hbm [resolvable:$true] %s1796_s10 }
 0x14f   : > { %s1441_s14 = sshra.s32 %s1085_s10, 4  ;;  %s1442_s14 = int_to_ptr.hbm [resolvable:$true] %s1441_s14 }
 0x150   : > { %p1448_p3 = scmp.lt.s32.totalorder %s1442_s14, %s1862_s5 }
 0x154   : > { %1408 = vrot.lane.b32.xlu1 %v1347_v40, %s1530_s17 }
 0x155   : > { %1393 = vrot.lane.b32.xlu2 %v1357_v42, %s1532_s19  ;;  %1403 = vrot.lane.b32.xlu0 %v1347_v40, %s1532_s19 }
 0x15c   : > { %1423 = vrot.lane.b32.xlu1 %v1347_v40, %s1533_s20 }
 0x15d   : > { %1413 = vrot.lane.b32.xlu2 %v1357_v42, %s1533_s20  ;;  %1418 = vrot.lane.b32.xlu0 %v1317_v41, %s1533_s20 }
 0x17f   : > { %v1319_v43 = vpop.permute.xlu2 %1318 }
 0x180   : > { %v1320_v62 = vunpack.i.l.bf16 %v1319_v43  ;;  %v1321_v11 = vunpack.i.h.bf16 %v1319_v43  ;;  %v1235_v43 = vld [vmem:[%s1860_s3 + $0x14] sm:$0xf] }
 0x187   : > { %v1648_v44 = vpop.permute.xlu2 %1328 }
 0x188   : > { %v1330_v19 = vunpack.i.l.bf16 %v1648_v44  ;;  %v1331_v26 = vunpack.i.h.bf16 %v1648_v44 }
 0x18f   : > { %v1650_v45 = vpop.permute.xlu2 %1338 }
 0x196   : > { %v1349_v47 = vpop.permute.xlu1 %1348 }
 0x197   : > { %v1344_v48 = vpop.permute.xlu2 %1343  ;;  %v1309_v49 = vpop.permute.xlu0 %1308  ;;  %v1351_v50 = vunpack.i.h.bf16 %v1349_v47  ;;  %v1350_v51 = vunpack.i.l.bf16 %v1349_v47  ;;  %v1340_v47 = vunpack.i.l.bf16 %v1650_v45 }
 0x198   : > { %v1346_v52 = vunpack.i.h.bf16 %v1344_v48  ;;  %v1345_v53 = vunpack.i.l.bf16 %v1344_v48  ;;  %v1311_v54 = vunpack.i.h.bf16 %v1309_v49  ;;  %v1310_v55 = vunpack.i.l.bf16 %v1309_v49 }
 0x199   : > { %v486_v60 = vsel %vm484_vm4, %v1350_v51, %v1351_v50 }
 0x19a   : > { %v487_v56 = vsel %vm484_vm4, %v1345_v53, %v1346_v52  ;;  %v488_v57 = vsel %vm484_vm4, %v1346_v52, %v1310_v55  ;;  %v485_v59 = vsel %vm484_vm4, %v1311_v54, %v1350_v51 }
 0x19b   : > { %510 = vmatpush.msra.mxu2 %v487_v56  ;;  %530 = vmatpush.msra.mxu3 %v488_v57 }
 0x19d   : > { %511 = vmatpush.msra.mxu2 %v485_v59  ;;  %531 = vmatpush.msra.mxu3 %v486_v60 }
 0x19e   : > { %v1359_v61 = vpop.permute.xlu1 %1358  ;;  %1224 = vmatmul.msk.f32.vlgmr.msra.gmra.mxu2 %vm404_vm3, %v1223_v58  ;;  %1225 = vmatmul.msk.f32.vlgmr.msra.gmra.mxu3 %vm404_vm3, %v1223_v58  ;;  %v1232_v58 = vld [vmem:[%s1860_s3 + $0x10] sm:$0xf] }
 0x19f   : > { %v1354_v63 = vpop.permute.xlu2 %1353  ;;  %v1314_v0 = vpop.permute.xlu0 %1313  ;;  %v1361_v1 = vunpack.i.h.bf16 %v1359_v61  ;;  %v1360_v2 = vunpack.i.l.bf16 %v1359_v61 }
 0x1a0   : > { %v1356_v3 = vunpack.i.h.bf16 %v1354_v63  ;;  %v1355_v4 = vunpack.i.l.bf16 %v1354_v63  ;;  %v1315_v5 = vunpack.i.l.bf16 %v1314_v0  ;;  %v1316_v28 = vunpack.i.h.bf16 %v1314_v0 }
 0x1a1   : > { %v631_v6 = vsel %vm628_vm5, %v1360_v2, %v1361_v1  ;;  %v632_v7 = vsel %vm628_vm5, %v1361_v1, %v1320_v62 }
 0x1a2   : > { %v555_v8 = vsel %vm552_vm6, %v1355_v4, %v1356_v3  ;;  %v556_v9 = vsel %vm552_vm6, %v1356_v3, %v1315_v5  ;;  %654 = vmatpush.msrb.mxu2 %v631_v6  ;;  %674 = vmatpush.msrb.mxu3 %v632_v7  ;;  %v1341_v3 = vunpack.i.h.bf16 %v1650_v45 }
 0x1a3   : > { %578 = vmatpush.msrb.mxu0 %v555_v8  ;;  %598 = vmatpush.msrb.mxu1 %v556_v9 }
 0x1a6   : > { %v1369_v10 = vpop.permute.xlu1 %1368 }
 0x1a7   : > { %v1666_v12 = vpop.permute.xlu0 %1323  ;;  %v1371_v13 = vunpack.i.h.bf16 %v1369_v10  ;;  %v1370_v14 = vunpack.i.l.bf16 %v1369_v10  ;;  %v1374_v23 = vpop.permute.xlu2 %1373 }
 0x1a8   : > { %v1376_v29 = vunpack.i.h.bf16 %v1374_v23  ;;  %v1375_v33 = vunpack.i.l.bf16 %v1374_v23  ;;  %v1325_v34 = vunpack.i.l.bf16 %v1666_v12  ;;  %v1326_v49 = vunpack.i.h.bf16 %v1666_v12  ;;  %v1238_v12 = vld [vmem:[%s1860_s3 + $0x18] sm:$0xf] }
 0x1a9   : > { %v629_v16 = vsel %vm628_vm5, %v1321_v11, %v1370_v14  ;;  %v630_v17 = vsel %vm628_vm5, %v1370_v14, %v1371_v13 }
 0x1aa   : > { %655 = vmatpush.msrb.mxu2 %v629_v16  ;;  %675 = vmatpush.msrb.mxu3 %v630_v17  ;;  %v701_v44 = vsel %vm698_vm8, %v1375_v33, %v1376_v29  ;;  %v702_v46 = vsel %vm698_vm8, %v1376_v29, %v1325_v34  ;;  %v1241_v16 = vld [vmem:[%s1860_s3 + $0x1c] sm:$0xf]  ;;  %v425_v29 = vpop.f32.mrf.mxu0 }
 0x1ab   : > { %1230 = vmatmul.msk.f32.vlgmr.msrb.gmra.mxu2 %vm404_vm3, %v1229_v15  ;;  %1231 = vmatmul.msk.f32.vlgmr.msrb.gmra.mxu3 %vm404_vm3, %v1229_v15 }
 0x1ae   : > { %v1379_v18 = vpop.permute.xlu1 %1378 }
 0x1af   : > { %v1676_v20 = vpop.permute.xlu0 %1333  ;;  %v1381_v21 = vunpack.i.h.bf16 %v1379_v18  ;;  %v1380_v22 = vunpack.i.l.bf16 %v1379_v18  ;;  %v1394_v42 = vpop.permute.xlu2 %1393 }
 0x1b0   : > { %v1396_v50 = vunpack.i.h.bf16 %v1394_v42  ;;  %v1395_v54 = vunpack.i.l.bf16 %v1394_v42  ;;  %v1335_v55 = vunpack.i.l.bf16 %v1676_v20  ;;  %v1336_v4 = vunpack.i.h.bf16 %v1676_v20 }
 0x1b1   : > { %v769_v24 = vsel %vm766_vm7, %v1380_v22, %v1381_v21  ;;  %v770_v25 = vsel %vm766_vm7, %v1381_v21, %v1330_v19 }
 0x1b2   : > { %792 = vmatpush.msra.mxu2 %v769_v24  ;;  %812 = vmatpush.msra.mxu3 %v770_v25  ;;  %v839_v63 = vsel %vm836_vm10, %v1395_v54, %v1396_v50  ;;  %v840_v0 = vsel %vm836_vm10, %v1396_v50, %v1335_v55  ;;  %v1244_v24 = vld [vmem:[%s1860_s3 + $0x20] sm:$0xf] }
 0x1b6   : > { %v1389_v27 = vpop.permute.xlu1 %1388 }
 0x1b7   : > { %v1364_v30 = vpop.permute.xlu0 %1363  ;;  %v1391_v31 = vunpack.i.h.bf16 %v1389_v27  ;;  %v1390_v32 = vunpack.i.l.bf16 %v1389_v27  ;;  %v1414_v1 = vpop.permute.xlu2 %1413 }
 0x1b8   : > { %v1366_v35 = vunpack.i.h.bf16 %v1364_v30  ;;  %v1365_v36 = vunpack.i.l.bf16 %v1364_v30  ;;  %v1416_v8 = vunpack.i.h.bf16 %v1414_v1  ;;  %v1415_v9 = vunpack.i.l.bf16 %v1414_v1  ;;  %v445_v30 = vpop.f32.mrf.mxu1 }
 0x1b9   : > { %v767_v38 = vsel %vm766_vm7, %v1331_v26, %v1390_v32  ;;  %v768_v39 = vsel %vm766_vm7, %v1390_v32, %v1391_v31 }
 0x1ba   : > { %v553_v40 = vsel %vm552_vm6, %v1316_v28, %v1365_v36  ;;  %v554_v41 = vsel %vm552_vm6, %v1365_v36, %v1366_v35  ;;  %793 = vmatpush.msra.mxu2 %v767_v38  ;;  %813 = vmatpush.msra.mxu3 %v768_v39  ;;  %v977_v17 = vsel %vm974_vm11, %v1415_v9, %v1416_v8  ;;  %v372_v28 = vlaneseq }
 0x1bb   : > { %579 = vmatpush.msrb.mxu0 %v553_v40  ;;  %599 = vmatpush.msrb.mxu1 %v554_v41 }
 0x1bc   : > { %1227 = vmatmul.msk.f32.vlgmr.msrb.gmra.mxu0 %vm404_vm3, %v1226_v37  ;;  %1228 = vmatmul.msk.f32.vlgmr.msrb.gmra.mxu1 %vm404_vm3, %v1226_v37  ;;  %v1737_v31 = vand.u32 127, %v372_v28 }
 0x1bd   : > { %724 = vmatpush.msra.mxu0 %v701_v44  ;;  %744 = vmatpush.msra.mxu1 %v702_v46 }
 0x1be   : > { %1236 = vmatmul.msk.f32.vlgmr.msra.gmra.mxu2 %vm404_vm3, %v1235_v43  ;;  %1237 = vmatmul.msk.f32.vlgmr.msra.gmra.mxu3 %vm404_vm3, %v1235_v43  ;;  %v1399_v48 = vpop.permute.xlu1 %1398  ;;  %v374_v33 = vadd.s32 128, %v1737_v31  ;;  %v379_v35 = vand.u32 15, %v1737_v31 }
 0x1bf   : > { %v1384_v51 = vpop.permute.xlu0 %1383  ;;  %v1401_v52 = vunpack.i.h.bf16 %v1399_v48  ;;  %v1400_v53 = vunpack.i.l.bf16 %v1399_v48 }
 0x1c0   : > { %v1386_v56 = vunpack.i.h.bf16 %v1384_v51  ;;  %v1385_v57 = vunpack.i.l.bf16 %v1384_v51  ;;  %v386_v36 = vand.u32 15, %v374_v33  ;;  %vm1741_vm12 = vcmp.ge.s32.totalorder %v379_v35, 1 }
 0x1c1   : > { %v909_v59 = vsel %vm906_vm9, %v1400_v53, %v1401_v52  ;;  %v910_v60 = vsel %vm906_vm9, %v1401_v52, %v1340_v47  ;;  %vm1749_vm14 = vcmp.le.s32.totalorder %v379_v35, 14  ;;  %v454_v43 = vsel %vm1741_vm12, %v425_v29, 0.0 }
 0x1c2   : > { %v699_v61 = vsel %vm698_vm8, %v1326_v49, %v1385_v57  ;;  %v700_v62 = vsel %vm698_vm8, %v1385_v57, %v1386_v56  ;;  %932 = vmatpush.msrb.mxu2 %v909_v59  ;;  %952 = vmatpush.msrb.mxu3 %v910_v60  ;;  %vm1745_vm13 = vcmp.ge.s32.totalorder %v386_v36, 1  ;;  %vm1755_vm15 = vcmp.le.s32.totalorder %v386_v36, 14 }
 0x1c3   : > { %725 = vmatpush.msra.mxu0 %v699_v61  ;;  %745 = vmatpush.msra.mxu1 %v700_v62  ;;  %v455_v47 = vsel %vm1745_vm13, %v445_v30, 0.0 }
 0x1c4   : > { %1233 = vmatmul.msk.f32.vlgmr.msra.gmra.mxu0 %vm404_vm3, %v1232_v58  ;;  %1234 = vmatmul.msk.f32.vlgmr.msra.gmra.mxu1 %vm404_vm3, %v1232_v58 }
 0x1c5   : > { %862 = vmatpush.msrb.mxu0 %v839_v63  ;;  %882 = vmatpush.msrb.mxu1 %v840_v0 }
 0x1c6   : > { %v1409_v2 = vpop.permute.xlu1 %1408 }
 0x1c7   : > { %v1404_v5 = vpop.permute.xlu0 %1403  ;;  %v1411_v6 = vunpack.i.h.bf16 %v1409_v2  ;;  %v1410_v7 = vunpack.i.l.bf16 %v1409_v2 }
 0x1c8   : > { %v1406_v10 = vunpack.i.h.bf16 %v1404_v5  ;;  %v1405_v11 = vunpack.i.l.bf16 %v1404_v5 }
 0x1c9   : > { %v907_v13 = vsel %vm906_vm9, %v1341_v3, %v1410_v7  ;;  %v908_v14 = vsel %vm906_vm9, %v1410_v7, %v1411_v6 }
 0x1ca   : > { %v837_v45 = vsel %vm836_vm10, %v1336_v4, %v1405_v11  ;;  %v838_v15 = vsel %vm836_vm10, %v1405_v11, %v1406_v10  ;;  %933 = vmatpush.msrb.mxu2 %v907_v13  ;;  %953 = vmatpush.msrb.mxu3 %v908_v14 }
 0x1cb   : > { %863 = vmatpush.msrb.mxu0 %v837_v45  ;;  %883 = vmatpush.msrb.mxu1 %v838_v15 }
 0x1cc   : > { %1239 = vmatmul.msk.f32.vlgmr.msrb.gmra.mxu0 %vm404_vm3, %v1238_v12  ;;  %1240 = vmatmul.msk.f32.vlgmr.msrb.gmra.mxu1 %vm404_vm3, %v1238_v12 }
 0x1cd   : > { %1000 = vmatpush.msra.mxu0 %v977_v17  ;;  %1242 = vmatmul.msk.f32.vlgmr.msrb.gmra.mxu2 %vm404_vm3, %v1241_v16 }
 0x1ce   : > { %1243 = vmatmul.msk.f32.vlgmr.msrb.gmra.mxu3 %vm404_vm3, %v1241_v16  ;;  %v1424_v18 = vpop.permute.xlu1 %1423 }
 0x1cf   : > { %v1419_v19 = vpop.permute.xlu0 %1418  ;;  %v1425_v20 = vunpack.i.l.bf16 %v1424_v18  ;;  %v1426_v23 = vunpack.i.h.bf16 %v1424_v18 }
 0x1d0   : > { %v1421_v21 = vunpack.i.h.bf16 %v1419_v19  ;;  %v1420_v22 = vunpack.i.l.bf16 %v1419_v19 }
 0x1d1   : > { %v976_v27 = vsel %vm974_vm11, %v1425_v20, %v1426_v23 }
 0x1d2   : > { %v978_v25 = vsel %vm974_vm11, %v1416_v8, %v1420_v22  ;;  %v975_v26 = vsel %vm974_vm11, %v1421_v21, %v1425_v20 }
 0x1d3   : > { %1020 = vmatpush.msra.mxu1 %v978_v25  ;;  %1001 = vmatpush.msra.mxu0 %v975_v26 }
 0x1d4   : > { %1245 = vmatmul.msk.f32.vlgmr.msra.gmra.mxu0 %vm404_vm3, %v1244_v24 }
 0x1d5   : > { %1021 = vmatpush.msra.mxu1 %v976_v27 }
 0x1d6   : > { %1246 = vmatmul.msk.f32.vlgmr.msra.gmra.mxu1 %vm404_vm3, %v1244_v24 }
 0x221   : > { %v513_v32 = vpop.f32.mrf.mxu2  ;;  %v533_v34 = vpop.f32.mrf.mxu3 }
 0x222   : > { %v536_v49 = vadd.f32 %v513_v32, %v454_v43  ;;  %v537_v53 = vadd.f32 %v533_v34, %v455_v47 }
 0x22e   : > { %v657_v42 = vpop.f32.mrf.mxu2  ;;  %v677_v46 = vpop.f32.mrf.mxu3 }
 0x22f   : > { %v680_v55 = vsel %vm1741_vm12, %v657_v42, 0.0  ;;  %v681_v57 = vsel %vm1745_vm13, %v677_v46, 0.0 }
 0x239   : > { %v581_v37 = vpop.f32.mrf.mxu0  ;;  %v601_v38 = vpop.f32.mrf.mxu1 }
 0x23a   : > { %v610_v48 = vsel %vm1749_vm14, %v581_v37, 0.0  ;;  %v611_v52 = vsel %vm1755_vm15, %v601_v38, 0.0 }
 0x23b   : > { %v612_v54 = vadd.f32 %v610_v48, %v536_v49  ;;  %v613_v56 = vadd.f32 %v611_v52, %v537_v53 }
 0x23d   : > { %v682_v58 = vadd.f32 %v680_v55, %v612_v54  ;;  %v683_v60 = vadd.f32 %v681_v57, %v613_v56 }
 0x241   : > { %v727_v50 = vpop.f32.mrf.mxu0  ;;  %v747_v51 = vpop.f32.mrf.mxu1 }
 0x242   : > { %v795_v59 = vpop.f32.mrf.mxu2  ;;  %v750_v61 = vadd.f32 %v727_v50, %v682_v58  ;;  %v815_v62 = vpop.f32.mrf.mxu3  ;;  %v751_v1 = vadd.f32 %v747_v51, %v683_v60 }
 0x243   : > { %v818_v0 = vsel %vm1749_vm14, %v795_v59, 0.0  ;;  %v819_v3 = vsel %vm1755_vm15, %v815_v62, 0.0 }
 0x244   : > { %v820_v5 = vadd.f32 %v818_v0, %v750_v61  ;;  %v821_v7 = vadd.f32 %v819_v3, %v751_v1 }
 0x249   : > { %v865_v63 = vpop.f32.mrf.mxu0  ;;  %v885_v2 = vpop.f32.mrf.mxu1 }
 0x24a   : > { %v888_v4 = vsel %vm1741_vm12, %v865_v63, 0.0  ;;  %v889_v6 = vsel %vm1745_vm13, %v885_v2, 0.0 }
 0x24b   : > { %v890_v8 = vadd.f32 %v888_v4, %v820_v5  ;;  %v891_v10 = vadd.f32 %v889_v6, %v821_v7 }
 0x250   : > { %v935_v9 = vpop.f32.mrf.mxu2 }
 0x251   : > { %v958_v11 = vadd.f32 %v935_v9, %v890_v8  ;;  %v955_v12 = vpop.f32.mrf.mxu3  ;;  %v1003_v13 = vpop.f32.mrf.mxu0 }
 0x252   : > { %v1026_v14 = vsel %vm1749_vm14, %v1003_v13, 0.0  ;;  %v959_v45 = vadd.f32 %v955_v12, %v891_v10 }
 0x253   : > { %v1028_v15 = vadd.f32 %v1026_v14, %v958_v11  ;;  %v1023_v16 = vpop.f32.mrf.mxu1 }
 0x254   : > { %v1027_v17 = vsel %vm1755_vm15, %v1023_v16, 0.0 }
 0x255   : > { %v1029_v18 = vadd.f32 %v1027_v17, %v959_v45  ;;  %v1047_v19 = vmul.f32 %v1028_v15, %v1028_v15  ;;  %v1037_v21 = vsel %vm1033_vm0, %v1028_v15, 0.0 }
 0x257   : > { %v1032_v20 = vrot.slane %v1029_v18, 4  ;;  %v1038_v22 = vsel %vm1033_vm0, %v1029_v18, 0.0  ;;  %v1048_v23 = vmul.f32 %v1029_v18, %v1029_v18  ;;  %v1049_v26 = vsel %vm1033_vm0, %v1047_v19, 0.0 }
 0x258   : > { %v1039_v24 = vadd.f32 %v1038_v22, %v1037_v21 }
 0x259   : > { %v1034_v25 = vsel %vm1033_vm0, %v1028_v15, %v1032_v20  ;;  %v1050_v27 = vsel %vm1033_vm0, %v1048_v23, 0.0 }
 0x25a   : > { %1040 = vadd.xlane.f32.xlu2 %v1039_v24  ;;  %1036 = vst [vmem:[%s297_s15] sm:$0xff] %v1034_v25  ;;  %v1051_v28 = vadd.f32 %v1050_v27, %v1049_v26  ;;  %s1443_s15 = scalar_lea.hbm %s1442_s14, 1 }
 0x25b   : > { %p1444_p0 = scmp.ne.s32.totalorder %s1442_s14, %s1443_s15  ;;  %p1449_p4 = scmp.lt.s32.totalorder %s1447_s18, %s1443_s15 }
 0x25c   : > { %1052 = vadd.xlane.f32.xlu0 %v1051_v28 }
 0x25d   : > { %p1445_p1 = pnand %p1444_p0, %p1608_p6  ;;  %p1450_p5 = por %p1449_p4, %p1448_p3 }
 0x25f   : > { %p1446_p2 = pneg %p1445_p1 }
 0x261   : > { %p1451_p7 = pnand %p1450_p5, %p1446_p2 }
 0x2cd   : > { %v1041_v29 = vpop.xlane.xlu2 %1040 }
 0x2ce   : > { %v1043_v30 = vperm.slane %v1041_v29, %v1737_v31 }
 0x2cf   : > { %v1053_v32 = vpop.xlane.xlu0 %1052 }
 0x2d0   : > { %v1055_v33 = vperm.slane %v1053_v32, %v1737_v31  ;;  %1046 = vst.msk [vmem:[%s285_s28] sm:$0x1] %vm1045_vm1, %v1043_v30 }
 0x2d1   : > { %1454 = shalt.err (!%p1451_p7)
}
 0x2d2   : > { %1250 = dma.vmem_to_hbm [thread:$0]  (%p1608_p6), %s1083_s29, 16, %s1085_s10, %s1064_s25   ;;  %1057 = vst.msk [vmem:[%s291_s11] sm:$0x1] %vm1045_vm1, %v1055_v33 }
 0x2d3   : > { %s1068_s26 = scalar_lea.sflag [#allocation7], %s1641_s9  ;;  %s1469_s28 = sshra.s32 %s1098_s13, 4  ;;  %s1470_s28 = int_to_ptr.hbm [resolvable:$true] %s1469_s28 }
 0x2d4   : > { %s1471_s16 = scalar_lea.hbm %s1470_s28, 1  ;;  %s1475_s17 = scalar_lea.hbm %s1863_s6, 2 }
 0x2d5   : > { %p1472_p10 = scmp.ne.s32.totalorder %s1470_s28, %s1471_s16  ;;  %p1476_p13 = scmp.lt.s32.totalorder %s1470_s28, %s1863_s6 }
 0x2d6   : > { %p1477_p0 = scmp.lt.s32.totalorder %s1475_s17, %s1471_s16 }
 0x2d7   : > { %p1473_p11 = pnand %p1472_p10, %p1608_p6 }
 0x2d8   : > { %p1478_p1 = por %p1477_p0, %p1476_p13 }
 0x2d9   : > { %p1474_p12 = pneg %p1473_p11 }
 0x2db   : > { %p1479_p2 = pnand %p1478_p1, %p1474_p12 }
 0x2dd   : > { %1482 = shalt.err (!%p1479_p2)
}
 0x2de   : > { %1251 = dma.vmem_to_hbm [thread:$0]  (%p1608_p6), %s1096_s12, 16, %s1098_s13, %s1068_s26  }
 0x2df PF: > { %s1117_s9 = sand.u32 1, %s1509_s21   ;;  %p1255_p3 = pnand %p1213_p9, %p1612_p8 }
 0x2e0   : > { %s1118_s29 = scalar_lea.sflag [#allocation5], %s1117_s9 }
 0x2e1   : > { %p1256_p4 = pneg %p1255_p3 }
 0x2e3   : > { %1500 = dma.done.wait (%p1256_p4), %s1118_s29, 16  }
 0x2e4   : > { %1502 = vsyncadd (%p1256_p4), %s1118_s29, 4294967280  ;;  %s1127_s10 = scalar_lea.sflag [#allocation7], %s1117_s9 }
 0x2e5   : > { %1504 = dma.done.wait (%p1256_p4), %s1127_s10, 16  }
 0x2e6   : > { %1506 = vsyncadd (%p1256_p4), %s1127_s10, 4294967280  ;;  %p20_p6 = scmp.ge.s32.totalorder %s1594_s27, 4   ;;  %s1874_s21 = smov %s1513_s22 }
 0x2e7   : > { %s1875_s22 = smov %s1517_s23  ;;  %s1876_s23 = smov %s1606_s30 }
 0x2e8   : > { %s1877_s24 = smov %s1594_s27  ;;  %22 = sbr.rel (!%p20_p6) target bundleno = 5 (0x5), region = 136 }
 0x2ed   :  { %1132 = vsyncpa [#allocation5], 1 }
 0x2ee   :  { %1134 = vsyncpa [#allocation5 + $0x1], 1 }
 0x2ef   :  { %1135 = vsyncpa [#allocation7], 1 }
 0x2f0   :  { %1137 = vsyncpa [#allocation7 + $0x1], 1 }

</bundles_post_ra>
